<compile_context>
chip_gen: v7x
topology: tpu7x:2x2x1
jax: 0.10.0
libtpu: 0.0.40
codegen_flags: <defaults>
</compile_context>

<pallas_src>
import jax
import jax.numpy as jnp
from jax.experimental import pallas as pl
from jax.experimental.pallas import tpu as pltpu

CNN_D = 15  # matches `cnn_d` in the PyTorch script


def _round_up(n, m):
    return ((n + m - 1) // m) * m


def _conv_tanh_max_kernel(x_ref, w_ref, b_ref, neg_ref, o_ref):
    """Fused (all kernel sizes) Conv1d + max-over-time + bias + tanh.

    x_ref:   (bb, L_pad, C)      time-padded input block, channels-last
    w_ref:   (K_pad, O_pad)      packed im2col weights (zero taps / zero pad rows)
    b_ref:   (1, O_pad)          packed bias (added AFTER the time max)
    neg_ref: (Lout_pad, O_pad)   additive pre-activation mask: 0 where (t, col)
                                 is a valid conv position for that column's
                                 branch, -1e30 otherwise
    o_ref:   (bb, O_pad)         tanh(max_t(conv) + bias)
    """
    bb, l_pad, c = x_ref.shape
    k_pad, o_pad = w_ref.shape
    lout_pad = neg_ref.shape[0]
    kmax = l_pad - lout_pad + 1

    # im2col ONCE per block: concat the kmax shifted (bb, Lout_pad, C) windows
    # along the lane axis and zero-pad lanes up to K_pad (=128).
    cols = [x_ref[:, j:j + lout_pad, :] for j in range(kmax)]
    lane_pad = k_pad - kmax * c
    if lane_pad:
        cols.append(jnp.zeros((bb, lout_pad, lane_pad), x_ref.dtype))
    xcol = jnp.concatenate(cols, axis=-1)                 # (bb, Lout_pad, K_pad)

    # One big MXU pass: M = bb * Lout_pad rows.  Lout_pad is a multiple of 16,
    # so the flatten / un-flatten reshapes are layout-preserving.
    acc = jnp.dot(xcol.reshape(bb * lout_pad, k_pad), w_ref[...],
                  preferred_element_type=jnp.float32)     # (bb*Lout_pad, O_pad) f32
    acc = acc.reshape(bb, lout_pad, o_pad)

    # Mask invalid time steps on the PRE-activation, reduce over time, then
    # apply bias + tanh once on the reduced result (tanh is monotone, bias is
    # time-invariant, so this equals max_t tanh(conv + b)).
    acc = acc + neg_ref[...]                              # broadcast (Lout_pad, O_pad)
    red = jnp.max(acc, axis=1)                            # (bb, O_pad) f32
    o_ref[...] = jnp.tanh(red + b_ref[...])


def _fused_conv_tanh_max(x_pad, w_big, b_big, neg_mask, block_b):
    """One pallas_call for the whole module (all kernel sizes, all batch rows)."""
    b_pad, l_pad, c = x_pad.shape
    k_pad, o_pad = w_big.shape
    lout_pad = neg_mask.shape[0]
    grid = (b_pad // block_b,)
    # NOTE: blocks here are tiny (x block ~ block_b*l_pad*C*2 B, w ~ K_pad*O_pad*2 B),
    # so the default scoped-VMEM limit is ample even on v7x (64 MiB physical).
    return pl.pallas_call(
        _conv_tanh_max_kernel,
        out_shape=jax.ShapeDtypeStruct((b_pad, o_pad), jnp.float32),
        grid=grid,
        in_specs=[
            pl.BlockSpec((block_b, l_pad, c), lambda i: (i, 0, 0)),
            pl.BlockSpec((k_pad, o_pad), lambda i: (0, 0)),
            pl.BlockSpec((1, o_pad), lambda i: (0, 0)),
            pl.BlockSpec((lout_pad, o_pad), lambda i: (0, 0)),
        ],
        out_specs=pl.BlockSpec((block_b, o_pad), lambda i: (i, 0)),
        compiler_params=pltpu.CompilerParams(
            dimension_semantics=("parallel",)),  # shards batch tiles across TCs on v7x
    )(x_pad, w_big, b_big, neg_mask)


class Conv2dPallas:
    """Mirrors the PyTorch `Conv2d` module's forward pass."""

    def __init__(self, kernel_sizes, in_channels=CNN_D, key=None,
                 compute_dtype=jnp.bfloat16):
        if key is None:
            key = jax.random.PRNGKey(0)
        self.kernel_sizes = tuple(int(k) for k in kernel_sizes)
        assert self.kernel_sizes, "need at least one kernel size"
        self.in_channels = int(in_channels)
        self.compute_dtype = compute_dtype
        self.k_max = max(self.kernel_sizes)
        self.k_min = min(self.kernel_sizes)
        self.branch_out = tuple(25 * k for k in self.kernel_sizes)
        self.o_total = sum(self.branch_out)
        self.o_pad = _round_up(self.o_total, 128)                # lane-dense output width
        self.k_pad = _round_up(self.k_max * self.in_channels, 128)  # MXU K dim

        c, kmax = self.in_channels, self.k_max
        w_big = jnp.zeros((self.k_pad, self.o_pad), jnp.float32)
        b_big = jnp.zeros((1, self.o_pad), jnp.float32)
        # Kernel size owning each output column.  Lane-padding columns get
        # k_min (always "valid"); their weights/bias are zero so they produce
        # tanh(0)=0 and are sliced off anyway.
        col_k = jnp.full((self.o_pad,), self.k_min, jnp.int32)

        off = 0
        for ksize, o_k in zip(self.kernel_sizes, self.branch_out):
            key, kw, kb = jax.random.split(key, 3)
            # PyTorch Conv1d default init: U(-bound, bound), bound = 1/sqrt(C*k)
            bound = float((c * ksize) ** -0.5)
            w_ock = jax.random.uniform(
                kw, (o_k, c, ksize), minval=-bound, maxval=bound,
                dtype=jnp.float32)
            b_o = jax.random.uniform(
                kb, (o_k,), minval=-bound, maxval=bound, dtype=jnp.float32)
            # Pack tap j of this branch at rows [j*C, (j+1)*C); taps >= ksize
            # stay zero (they only ever multiply the zero time padding), and
            # rows >= kmax*C stay zero (they multiply the zero K-pad lanes).
            for j in range(ksize):
                w_big = w_big.at[j * c:(j + 1) * c, off:off + o_k].set(
                    w_ock[:, :, j].T)
            b_big = b_big.at[0, off:off + o_k].set(b_o)
            col_k = col_k.at[off:off + o_k].set(ksize)
            off += o_k

        self.w_big = w_big.astype(compute_dtype)   # MXU operand (bf16 by default)
        self.b_big = b_big                          # kept f32: added post-max
        self.col_k = col_k
        self._forward = jax.jit(self._forward_impl)

    def _forward_impl(self, words):
        # words: (B, C, L) — PyTorch NCL convention.
        B, c, L = words.shape
        assert c == self.in_channels, (c, self.in_channels)
        assert L >= self.k_max, (
            f"sequence length {L} shorter than largest kernel {self.k_max}")

        lout = L - self.k_min + 1                       # widest branch's output length
        lout_pad = _round_up(lout, 16)                  # sublane-aligned time rows
        l_pad = lout_pad + self.k_max - 1               # time padding so every shifted
                                                        # window slice stays in bounds

        # block_b: fill the MXU (M = block_b * Lout_pad >= ~512) and amortize
        # per-grid-step overhead; keep it a multiple of 8 for aligned stores.
        block_b = max(8, min(256, _round_up(max(1, 512 // lout_pad), 8)))
        b_pad = _round_up(B, block_b)                   # pad batch -> full final block

        x = jnp.transpose(words, (0, 2, 1))             # NCL -> (B, L, C)
        x = jnp.pad(x, ((0, b_pad - B), (0, l_pad - L), (0, 0)))
        x = x.astype(self.compute_dtype)

        # Pre-activation additive mask: a column belonging to branch k is only
        # valid for t < L - k + 1; padded time rows are invalid for all columns.
        t = jnp.arange(lout_pad, dtype=jnp.int32)[:, None]        # (Lout_pad, 1)
        valid_len = (L - self.col_k + 1)[None, :]                 # (1, O_pad)
        neg = jnp.where(t < valid_len, 0.0, -1e30).astype(jnp.float32)

        y = _fused_conv_tanh_max(x, self.w_big, self.b_big, neg, block_b)
        return y[:B, :self.o_total]                     # drop batch / lane padding

    def __call__(self, words):
        return self._forward(words)


def _reference_forward(model, words):
    """Pure-JAX reference: per-branch valid Conv1d -> tanh -> max over time."""
    x = jnp.transpose(words, (0, 2, 1))
    x = x.astype(model.compute_dtype).astype(jnp.float32)  # match kernel rounding
    _, L, c = x.shape
    w = model.w_big.astype(jnp.float32)
    b = model.b_big[0]
    outs, off = [], 0
    for k, o_k in zip(model.kernel_sizes, model.branch_out):
        lout_k = L - k + 1
        cols = jnp.concatenate(
            [x[:, j:j + lout_k, :] for j in range(k)], axis=-1)   # (B, lout_k, k*C)
        acc = jnp.einsum('blk,ko->blo', cols, w[:k * c, off:off + o_k],
                         preferred_element_type=jnp.float32) + b[off:off + o_k]
        outs.append(jnp.max(jnp.tanh(acc), axis=1))
        off += o_k
    return jnp.concatenate(outs, axis=1)


if __name__ == "__main__":
    key = jax.random.PRNGKey(0)
    k_in, k_params = jax.random.split(key)

    B, C, L = 2, CNN_D, 16
    kernel_sizes = (3, 4, 5)

    words = jax.random.normal(k_in, (B, C, L), dtype=jnp.float32)

    model = Conv2dPallas(kernel_sizes, in_channels=C, key=k_params)
    y = jax.block_until_ready(model(words))

    expected_out = sum(25 * k for k in kernel_sizes)
    assert y.shape == (B, expected_out), y.shape
    assert bool(jnp.all(jnp.isfinite(y)))

    # Numerical self-check against a pure-JAX reference of the same math
    # (validates weight packing, zero-tap/K padding, the pre-activation
    # time-validity mask, and the post-max bias+tanh reordering).
    y_ref = _reference_forward(model, words)
    max_err = float(jnp.max(jnp.abs(y - y_ref)))
    assert max_err < 5e-3, max_err

    print("KERNEL_OK")
</pallas_src>

<mosaic_0001>
module attributes {stable_mosaic.version = 11 : i64} {
  func.func @_conv_tanh_max_kernel(%arg0: i32, %arg1: memref<32x20x15xbf16, #tpu.memory_space<vmem>>, %arg2: memref<128x384xbf16, #tpu.memory_space<vmem>>, %arg3: memref<1x384xf32, #tpu.memory_space<vmem>>, %arg4: memref<16x384xf32, #tpu.memory_space<vmem>>, %arg5: memref<32x384xf32, #tpu.memory_space<vmem>>) attributes {dimension_semantics = [#tpu.dimension_semantics<parallel>], iteration_bounds = array<i64: 1>, scalar_prefetch = 0 : i64, scratch_operands = 0 : i64, tpu.core_type = #tpu.core_type<tc>, window_params = [{transform_indices = @transform_0, window_bounds = array<i64: 32, 20, 15>}, {pipeline_mode = #tpu.pipeline_mode<synchronous>, transform_indices = @transform_1, window_bounds = array<i64: 128, 384>}, {pipeline_mode = #tpu.pipeline_mode<synchronous>, transform_indices = @transform_2, window_bounds = array<i64: 1, 384>}, {pipeline_mode = #tpu.pipeline_mode<synchronous>, transform_indices = @transform_3, window_bounds = array<i64: 16, 384>}, {transform_indices = @transform_4, window_bounds = array<i64: 32, 384>}]} {
    %c0 = arith.constant 0 : index
    %c0_0 = arith.constant 0 : index
    %c0_1 = arith.constant 0 : index
    %0 = vector.load %arg1[%c0, %c0_0, %c0_1] : memref<32x20x15xbf16, #tpu.memory_space<vmem>>, vector<32x16x15xbf16>
    %c0_2 = arith.constant 0 : index
    %c1 = arith.constant 1 : index
    %c0_3 = arith.constant 0 : index
    %1 = vector.load %arg1[%c0_2, %c1, %c0_3] : memref<32x20x15xbf16, #tpu.memory_space<vmem>>, vector<32x16x15xbf16>
    %c0_4 = arith.constant 0 : index
    %c2 = arith.constant 2 : index
    %c0_5 = arith.constant 0 : index
    %2 = vector.load %arg1[%c0_4, %c2, %c0_5] : memref<32x20x15xbf16, #tpu.memory_space<vmem>>, vector<32x16x15xbf16>
    %c0_6 = arith.constant 0 : index
    %c3 = arith.constant 3 : index
    %c0_7 = arith.constant 0 : index
    %3 = vector.load %arg1[%c0_6, %c3, %c0_7] : memref<32x20x15xbf16, #tpu.memory_space<vmem>>, vector<32x16x15xbf16>
    %c0_8 = arith.constant 0 : index
    %c4 = arith.constant 4 : index
    %c0_9 = arith.constant 0 : index
    %4 = vector.load %arg1[%c0_8, %c4, %c0_9] : memref<32x20x15xbf16, #tpu.memory_space<vmem>>, vector<32x16x15xbf16>
    %cst = arith.constant 0.000000e+00 : bf16
    %5 = vector.broadcast %cst : bf16 to vector<32x16x53xbf16>
    %6 = tpu.concatenate %0, %1, %2, %3, %4, %5 in 2 : vector<32x16x15xbf16>, vector<32x16x15xbf16>, vector<32x16x15xbf16>, vector<32x16x15xbf16>, vector<32x16x15xbf16>, vector<32x16x53xbf16> -> vector<32x16x128xbf16>
    %7 = vector.shape_cast %6 : vector<32x16x128xbf16> to vector<512x128xbf16>
    %c0_10 = arith.constant 0 : index
    %c0_11 = arith.constant 0 : index
    %8 = vector.load %arg2[%c0_10, %c0_11] : memref<128x384xbf16, #tpu.memory_space<vmem>>, vector<128x384xbf16>
    %cst_12 = arith.constant dense<0.000000e+00> : vector<512x384xf32>
    %9 = tpu.matmul %7, %8, %cst_12 {dimension_numbers = #tpu.dot_dimension_numbers<[1], [0], [0], [1], [0, 0, 1, 1], [], []>} : vector<512x128xbf16>, vector<128x384xbf16>, vector<512x384xf32> -> vector<512x384xf32>
    %10 = vector.shape_cast %9 : vector<512x384xf32> to vector<32x16x384xf32>
    %c0_13 = arith.constant 0 : index
    %c0_14 = arith.constant 0 : index
    %11 = vector.load %arg4[%c0_13, %c0_14] : memref<16x384xf32, #tpu.memory_space<vmem>>, vector<16x384xf32>
    %12 = vector.shape_cast %11 : vector<16x384xf32> to vector<1x16x384xf32>
    %13 = vector.broadcast %12 : vector<1x16x384xf32> to vector<32x16x384xf32>
    %14 = arith.addf %10, %13 : vector<32x16x384xf32>
    %cst_15 = arith.constant dense<0xFF800000> : vector<32x384xf32>
    %15 = vector.multi_reduction <maximumf>, %14, %cst_15 [1] : vector<32x16x384xf32> to vector<32x384xf32>
    %c0_16 = arith.constant 0 : index
    %c0_17 = arith.constant 0 : index
    %16 = vector.load %arg3[%c0_16, %c0_17] : memref<1x384xf32, #tpu.memory_space<vmem>>, vector<1x384xf32>
    %17 = vector.broadcast %16 : vector<1x384xf32> to vector<32x384xf32>
    %18 = arith.addf %15, %17 : vector<32x384xf32>
    %19 = math.tanh %18 : vector<32x384xf32>
    %c0_18 = arith.constant 0 : index
    %c0_19 = arith.constant 0 : index
    %20 = vector.load %arg5[%c0_18, %c0_19] : memref<32x384xf32, #tpu.memory_space<vmem>>, vector<32x384xf32>
    tpu.vector_store %arg5[%c0_18, %c0_19], %19 {strides = array<i32>} : memref<32x384xf32, #tpu.memory_space<vmem>>, vector<32x384xf32>,
    return
  }
  func.func @transform_0(%arg0: i32) -> (i32, i32, i32) {
    %c0_i32 = arith.constant 0 : i32
    %c0_i32_0 = arith.constant 0 : i32
    %c0_i32_1 = arith.constant 0 : i32
    return %arg0, %c0_i32, %c0_i32_0 : i32, i32, i32
  }
  func.func @transform_1(%arg0: i32) -> (i32, i32) {
    %c0_i32 = arith.constant 0 : i32
    %c0_i32_0 = arith.constant 0 : i32
    %c0_i32_1 = arith.constant 0 : i32
    return %c0_i32, %c0_i32_0 : i32, i32
  }
  func.func @transform_2(%arg0: i32) -> (i32, i32) {
    %c0_i32 = arith.constant 0 : i32
    %c0_i32_0 = arith.constant 0 : i32
    %c0_i32_1 = arith.constant 0 : i32
    return %c0_i32, %c0_i32_0 : i32, i32
  }
  func.func @transform_3(%arg0: i32) -> (i32, i32) {
    %c0_i32 = arith.constant 0 : i32
    %c0_i32_0 = arith.constant 0 : i32
    %c0_i32_1 = arith.constant 0 : i32
    return %c0_i32, %c0_i32_0 : i32, i32
  }
  func.func @transform_4(%arg0: i32) -> (i32, i32) {
    %c0_i32 = arith.constant 0 : i32
    %c0_i32_0 = arith.constant 0 : i32
    return %arg0, %c0_i32 : i32, i32
  }
}

</mosaic_0001>

<bundles_post_ra>
// kernel: _forward_impl.1
= control target key start
LH: loop header
LB: loop body
LE: loop exit
PB: predicated region body
PF: predicated region fallthrough
CT: control target
= control target key end

     0   :  { %vm1011_vm0 = vcmask 1046528   ;;  %vm466_vm1 = vsmask.f32 7424  ;;  %vm1973_vm2 = vcmask 1045504   ;;  %vm1268_vm3 = vsmask.f32 6400  ;;  %s8251_s0 = inlined_call_operand.vmem [shape: bf16[32,20,15], index: 0, kind: input, shape index: {}]   ;;  %s8252_s1 = inlined_call_operand.vmem [shape: bf16[128,384], index: 1, kind: input, shape index: {}]   ;;  %s8253_s3 = inlined_call_operand.vmem [shape: f32[16,384], index: 3, kind: input, shape index: {}]   ;;  %s8254_s2 = inlined_call_operand.vmem [shape: f32[1,384], index: 2, kind: input, shape index: {}]   ;;  %s8255_s4 = inlined_call_operand.vmem [shape: f32[32,384], index: 4, kind: output, shape index: {}]  }
   0x1   :  { %v5456_v0 = vld [vmem:[%s8251_s0 + $0x124] sm:$0xf]  ;;  %v138_v1 = vld [vmem:[%s8251_s0 + $0x120] sm:$0xe]  ;;  %s5423_s5 = smov 30   ;;  %s5424_s16 = smov 15  }
   0x2   :  { %v5029_v2 = vld [vmem:[%s8251_s0 + $0x128] ss:$0 sps:$4 sm:$0x11]   ;;  %v4728_v3 = vcombine.low %v138_v1, %v5456_v0  ;;  %v66_v4 = vld [vmem:[%s8251_s0 + $0x120] sm:$0xf]  ;;  %s5425_s23 = smov 45  }
   0x3   :  { %v5469_v5 = vcombine.low %v66_v4, %v5456_v0  ;;  %v19_v6 = vld [vmem:[%s8251_s0 + $0x4] sm:$0xf]  ;;  %v114_v7 = vld [vmem:[%s8251_s0] sm:$0xe]  ;;  %v1085_v9 = vrot.slane %v5029_v2, 1  ;;  %v763_v10 = vshll.u32 %v5029_v2, 16 }
   0x4   :  { %v1084_v8 = vrot.slane %v4728_v3, 1  ;;  %v5032_v11 = vld [vmem:[%s8251_s0 + $0x8] ss:$0 sps:$4 sm:$0x11]   ;;  %v4704_v12 = vcombine.low %v114_v7, %v19_v6  ;;  %v18_v23 = vld [vmem:[%s8251_s0] sm:$0xf] }
   0x5   :  { %v756_v13 = vshrl.u32 %v5469_v5, 16  ;;  %v758_v14 = vshll.u32 %v5469_v5, 16  ;;  %v765_v16 = vrot.slane %v763_v10, 1  ;;  %v1013_v18 = vrot.slane %v5032_v11, 1  ;;  %v178_v29 = vld [vmem:[%s8251_s0] sm:$0xc] }
   0x6   :  { %v1086_v15 = vsel %vm1011_vm0, %v1084_v8, %v1085_v9  ;;  %v1012_v17 = vrot.slane %v4704_v12, 1  ;;  %v5034_v19 = vld [vmem:[%s8251_s0 + $0x8] ss:$0 sps:$4 sm:$0x33]   ;;  %v1270_v21 = vshrl.u32 %v4704_v12, 16  ;;  %v1273_v22 = vshll.u32 %v4704_v12, 16 }
   0x7   :  { %1156 = vrot.lane.b32.xlu1 %v1086_v15, %s5423_s5  ;;  %v760_v20 = vrot.slane %v758_v14, 1  ;;  %v475_v24 = vshll.u32 %v5032_v11, 16  ;;  %v1278_v26 = vshrl.u32 %v5034_v19, 16  ;;  %v1281_v27 = vshll.u32 %v5034_v19, 16  ;;  %v20_v38 = vld [vmem:[%s8251_s0 + $0xc] sm:$0xf] }
   0x8   :  { %v1014_v25 = vsel %vm1011_vm0, %v1012_v17, %v1013_v18  ;;  %v5491_v28 = vcombine.low %v18_v23, %v19_v6  ;;  %v1272_v31 = vrot.slane %v1270_v21, 1  ;;  %v1275_v32 = vrot.slane %v1273_v22, 2  ;;  %v5037_v43 = vld [vmem:[%s8251_s0 + $0x128] ss:$0 sps:$4 sm:$0x33]   ;;  %s5426_s7 = smov 60  }
   0x9   :  { %v761_v30 = vor.u32 %v760_v20, %v756_v13  ;;  %v477_v33 = vrot.slane %v475_v24, 1  ;;  %v1280_v34 = vrot.slane %v1278_v26, 1  ;;  %v1283_v35 = vrot.slane %v1281_v27, 2  ;;  %v5509_v44 = vld [vmem:[%s8251_s0 + $0x10] sm:$0xf] }
   0xa   :  { %v468_v36 = vshrl.u32 %v5491_v28, 16  ;;  %v470_v37 = vshll.u32 %v5491_v28, 16  ;;  %v1276_v40 = vor.u32 %v1275_v32, %v1272_v31  ;;  %v4768_v41 = vcombine.low %v178_v29, %v19_v6  ;;  %v5039_v53 = vld [vmem:[%s8251_s0 + $0x14] ss:$0 sps:$4 sm:$0x11]  }
   0xb   :  { %v766_v39 = vsel %vm466_vm1, %v761_v30, %v765_v16  ;;  %1108 = vrot.lane.b32.xlu1 %v1014_v25, %s5423_s5  ;;  %v1975_v42 = vrot.slane %v5034_v19, 2  ;;  %v1284_v45 = vor.u32 %v1283_v35, %v1280_v34  ;;  %v1678_v47 = vshrl.u32 %v4728_v3, 16  ;;  %v202_v58 = vld [vmem:[%s8251_s0 + $0x120] sm:$0xc]  ;;  %v115_v59 = vld [vmem:[%s8251_s0 + $0xc] sm:$0xe] }
   0xc   :  { %899 = vrot.lane.b32.xlu0 %v766_v39, %s5424_s16  ;;  %v472_v46 = vrot.slane %v470_v37, 1  ;;  %v1681_v48 = vshll.u32 %v4728_v3, 16  ;;  %v1974_v49 = vrot.slane %v4768_v41, 2  ;;  %v1686_v50 = vshrl.u32 %v5037_v43, 16  ;;  %v68_v1 = vld [vmem:[%s8251_s0 + $0x12c] sm:$0xf] }
   0xd   :  { %v1689_v51 = vshll.u32 %v5037_v43, 16  ;;  %v5513_v52 = vcombine.low %v20_v38, %v5509_v44  ;;  %v1285_v54 = vsel %vm1268_vm3, %v1276_v40, %v1284_v45  ;;  %v1680_v56 = vrot.slane %v1678_v47, 1  ;;  %v5536_v7 = vld [vmem:[%s8251_s0 + $0x130] sm:$0xf]  ;;  %v139_v25 = vld [vmem:[%s8251_s0 + $0x12c] sm:$0xe] }
   0xe   :  { %v473_v55 = vor.u32 %v472_v46, %v468_v36  ;;  %v1683_v57 = vrot.slane %v1681_v48, 2  ;;  %v1976_v60 = vsel %vm1973_vm2, %v1974_v49, %v1975_v42  ;;  %v1688_v61 = vrot.slane %v1686_v50, 1  ;;  %v5544_v12 = vld [vmem:[%s8251_s0 + $0x134] ss:$0 sps:$4 sm:$0x11]  }
   0xf   :  { %1813 = vrot.lane.b32.xlu1 %v1285_v54, %s5425_s23  ;;  %v1691_v62 = vrot.slane %v1689_v51, 2  ;;  %v480_v63 = vshrl.u32 %v5513_v52, 16  ;;  %v482_v4 = vshll.u32 %v5513_v52, 16  ;;  %v487_v6 = vshll.u32 %v5039_v53, 16  ;;  %v179_v31 = vld [vmem:[%s8251_s0 + $0xc] sm:$0xc] }
  0x10   :  { %v478_v2 = vsel %vm466_vm1, %v473_v55, %v477_v33  ;;  %v1684_v3 = vor.u32 %v1683_v57, %v1680_v56  ;;  %v4792_v9 = vcombine.low %v202_v58, %v5456_v0  ;;  %v2047_v10 = vrot.slane %v5037_v43, 2  ;;  %v5552_v17 = vld [vmem:[%s8251_s0 + $0x14] ss:$0 sps:$4 sm:$0x33]   ;;  %v22_v41 = vld [vmem:[%s8251_s0 + $0x18] sm:$0xf] }
  0x11   :  { %851 = vrot.lane.b32.xlu0 %v478_v2, %s5424_s16  ;;  %v1692_v8 = vor.u32 %v1691_v62, %v1688_v61  ;;  %v4705_v11 = vcombine.low %v115_v59, %v5509_v44  ;;  %v484_v13 = vrot.slane %v482_v4, 1  ;;  %v489_v14 = vrot.slane %v487_v6, 1  ;;  %v5573_v36 = vld [vmem:[%s8251_s0 + $0x134] ss:$0 sps:$4 sm:$0x33]  }
  0x12   :  { %v1016_v15 = vrot.slane %v5039_v53, 1  ;;  %v5547_v16 = vcombine.low %v68_v1, %v5536_v7  ;;  %v2046_v18 = vrot.slane %v4792_v9, 2  ;;  %v775_v20 = vshll.u32 %v5544_v12, 16  ;;  %v5585_v42 = vld [vmem:[%s8251_s0 + $0x1c] sm:$0xf] }
  0x13   :  { %2070 = vrot.lane.b32.xlu1 %v1976_v60, %s5426_s7  ;;  %v1693_v0 = vsel %vm1268_vm3, %v1684_v3, %v1692_v8  ;;  %v1015_v19 = vrot.slane %v4705_v11, 1  ;;  %v485_v21 = vor.u32 %v484_v13, %v480_v63  ;;  %v1287_v24 = vshrl.u32 %v4705_v11, 16  ;;  %v203_v48 = vld [vmem:[%s8251_s0 + $0x12c] sm:$0xc]  ;;  %v116_v58 = vld [vmem:[%s8251_s0 + $0x18] sm:$0xe] }
  0x14   :  { %v768_v22 = vshrl.u32 %v5547_v16, 16  ;;  %v770_v23 = vshll.u32 %v5547_v16, 16  ;;  %v2048_v26 = vsel %vm1973_vm2, %v2046_v18, %v2047_v10  ;;  %v777_v29 = vrot.slane %v775_v20, 1  ;;  %v5596_v54 = vld [vmem:[%s8251_s0 + $0x20] ss:$0 sps:$4 sm:$0x11]  }
  0x15   :  { %1861 = vrot.lane.b32.xlu0 %v1693_v0, %s5425_s23  ;;  %v1017_v27 = vsel %vm1011_vm0, %v1015_v19, %v1016_v15  ;;  %v1290_v30 = vshll.u32 %v4705_v11, 16  ;;  %v490_v32 = vsel %vm466_vm1, %v485_v21, %v489_v14  ;;  %v1289_v34 = vrot.slane %v1287_v24, 1  ;;  %v70_v62 = vld [vmem:[%s8251_s0 + $0x138] sm:$0xf]  ;;  %v5611_v63 = vld [vmem:[%s8251_s0 + $0x13c] sm:$0xf] }
  0x16   :  { %v772_v33 = vrot.slane %v770_v23, 1  ;;  %v1295_v35 = vshrl.u32 %v5552_v17, 16  ;;  %v1298_v38 = vshll.u32 %v5552_v17, 16  ;;  %v4729_v39 = vcombine.low %v139_v25, %v5536_v7  ;;  %v5623_v10 = vld [vmem:[%s8251_s0 + $0x140] ss:$0 sps:$4 sm:$0x11]  }
  0x17   :  { %853 = vrot.lane.b32.xlu1 %v490_v32, %s5424_s16  ;;  %v1292_v37 = vrot.slane %v1290_v30, 2  ;;  %v1088_v40 = vrot.slane %v5544_v12, 1  ;;  %v4769_v46 = vcombine.low %v179_v31, %v5509_v44  ;;  %v1978_v47 = vrot.slane %v5552_v17, 2  ;;  %v5635_v18 = vld [vmem:[%s8251_s0 + $0x20] ss:$0 sps:$4 sm:$0x33]  }
  0x18   :  { %v773_v43 = vor.u32 %v772_v33, %v768_v22  ;;  %v1297_v45 = vrot.slane %v1295_v35, 1  ;;  %v1300_v50 = vrot.slane %v1298_v38, 2  ;;  %v1087_v51 = vrot.slane %v4729_v39, 1  ;;  %v5652_v32 = vld [vmem:[%s8251_s0 + $0x140] ss:$0 sps:$4 sm:$0x33]  }
  0x19   :  { %2118 = vrot.lane.b32.xlu0 %v2048_v26, %s5426_s7  ;;  %v1293_v49 = vor.u32 %v1292_v37, %v1289_v34  ;;  %v1695_v53 = vshrl.u32 %v4729_v39, 16  ;;  %v1977_v44 = vrot.slane %v4769_v46, 2  ;;  %v1698_v56 = vshll.u32 %v4729_v39, 16  ;;  %v140_v26 = vld [vmem:[%s8251_s0 + $0x138] sm:$0xe] }
  0x1a   :  { %v778_v55 = vsel %vm466_vm1, %v773_v43, %v777_v29  ;;  %v1703_v57 = vshrl.u32 %v5573_v36, 16  ;;  %v1301_v59 = vor.u32 %v1300_v50, %v1297_v45  ;;  %v1706_v61 = vshll.u32 %v5573_v36, 16 }
  0x1b   :  { %1110 = vrot.lane.b32.xlu1 %v1017_v27, %s5423_s5  ;;  %v1697_v60 = vrot.slane %v1695_v53, 1  ;;  %v1700_v1 = vrot.slane %v1698_v56, 2  ;;  %v5614_v3 = vcombine.low %v22_v41, %v5585_v42  ;;  %v499_v8 = vshll.u32 %v5596_v54, 16  ;;  %v180_v41 = vld [vmem:[%s8251_s0 + $0x18] sm:$0xc] }
  0x1c   :  { %v1705_v2 = vrot.slane %v1703_v57, 1  ;;  %v1302_v4 = vsel %vm1268_vm3, %v1293_v49, %v1301_v59  ;;  %v1708_v6 = vrot.slane %v1706_v61, 2  ;;  %v4793_v9 = vcombine.low %v203_v48, %v5536_v7  ;;  %v5671_v53 = vld [vmem:[%s8251_s0 + $0x28] sm:$0xf]  ;;  %v117_v61 = vld [vmem:[%s8251_s0 + $0x24] sm:$0xe] }
  0x1d   :  { %901 = vrot.lane.b32.xlu0 %v778_v55, %s5424_s16  ;;  %v1089_v11 = vsel %vm1011_vm0, %v1087_v51, %v1088_v40  ;;  %v1701_v12 = vor.u32 %v1700_v1, %v1697_v60  ;;  %v492_v13 = vshrl.u32 %v5614_v3, 16  ;;  %v494_v14 = vshll.u32 %v5614_v3, 16  ;;  %v5678_v57 = vld [vmem:[%s8251_s0 + $0x2c] ss:$0 sps:$4 sm:$0x11]  }
  0x1e   :  { %v1979_v15 = vsel %vm1973_vm2, %v1977_v44, %v1978_v47  ;;  %v1709_v17 = vor.u32 %v1708_v6, %v1705_v2  ;;  %v2050_v0 = vrot.slane %v5573_v36, 2  ;;  %v4706_v7 = vcombine.low %v116_v58, %v5585_v42  ;;  %v24_v47 = vld [vmem:[%s8251_s0 + $0x24] sm:$0xf] }
  0x1f   :  { %1815 = vrot.lane.b32.xlu1 %v1302_v4, %s5425_s23  ;;  %v496_v19 = vrot.slane %v494_v14, 1  ;;  %v501_v20 = vrot.slane %v499_v8, 1  ;;  %v2049_v21 = vrot.slane %v4793_v9, 2  ;;  %v5638_v22 = vcombine.low %v70_v62, %v5611_v63  ;;  %v72_v2 = vld [vmem:[%s8251_s0 + $0x144] sm:$0xf] }
  0x20   :  { %v1019_v23 = vrot.slane %v5596_v54, 1  ;;  %v787_v24 = vshll.u32 %v5623_v10, 16  ;;  %v1304_v25 = vshrl.u32 %v4706_v7, 16  ;;  %v1710_v27 = vsel %vm1268_vm3, %v1701_v12, %v1709_v17  ;;  %v5694_v4 = vld [vmem:[%s8251_s0 + $0x148] sm:$0xf] }
  0x21   :  { %1158 = vrot.lane.b32.xlu0 %v1089_v11, %s5423_s5  ;;  %v497_v29 = vor.u32 %v496_v19, %v492_v13  ;;  %v780_v30 = vshrl.u32 %v5638_v22, 16  ;;  %v782_v31 = vshll.u32 %v5638_v22, 16  ;;  %v1018_v33 = vrot.slane %v4706_v7, 1 }
  0x22   :  { %v1306_v34 = vrot.slane %v1304_v25, 1  ;;  %v1307_v35 = vshll.u32 %v4706_v7, 16  ;;  %v1312_v36 = vshrl.u32 %v5635_v18, 16  ;;  %v1315_v39 = vshll.u32 %v5635_v18, 16 }
  0x23   :  { %2072 = vrot.lane.b32.xlu1 %v1979_v15, %s5426_s7  ;;  %v502_v37 = vsel %vm466_vm1, %v497_v29, %v501_v20  ;;  %v784_v38 = vrot.slane %v782_v31, 1  ;;  %v4730_v40 = vcombine.low %v140_v26, %v5611_v63  ;;  %v789_v43 = vrot.slane %v787_v24, 1  ;;  %v204_v15 = vld [vmem:[%s8251_s0 + $0x138] sm:$0xc] }
  0x24   :  { %v1309_v45 = vrot.slane %v1307_v35, 2  ;;  %v1314_v46 = vrot.slane %v1312_v36, 1  ;;  %v2051_v48 = vsel %vm1973_vm2, %v2049_v21, %v2050_v0  ;;  %v1317_v50 = vrot.slane %v1315_v39, 2  ;;  %v5712_v20 = vld [vmem:[%s8251_s0 + $0x14c] ss:$0 sps:$4 sm:$0x11]  }
  0x25   :  { %1863 = vrot.lane.b32.xlu0 %v1710_v27, %s5425_s23  ;;  %v785_v49 = vor.u32 %v784_v38, %v780_v30  ;;  %v1091_v51 = vrot.slane %v5623_v10, 1  ;;  %v4770_v55 = vcombine.low %v180_v41, %v5585_v42  ;;  %v1712_v44 = vshrl.u32 %v4730_v40, 16  ;;  %v181_v41 = vld [vmem:[%s8251_s0 + $0x24] sm:$0xc] }
  0x26   :  { %v1310_v54 = vor.u32 %v1309_v45, %v1306_v34  ;;  %v1715_v56 = vshll.u32 %v4730_v40, 16  ;;  %v1020_v58 = vsel %vm1011_vm0, %v1018_v33, %v1019_v23  ;;  %v1318_v59 = vor.u32 %v1317_v50, %v1314_v46  ;;  %v5722_v23 = vld [vmem:[%s8251_s0 + $0x2c] ss:$0 sps:$4 sm:$0x33]   ;;  %v141_v34 = vld [vmem:[%s8251_s0 + $0x144] sm:$0xe] }
  0x27   :  { %855 = vrot.lane.b32.xlu1 %v502_v37, %s5424_s16  ;;  %v1720_v60 = vshrl.u32 %v5652_v32, 16  ;;  %v790_v42 = vsel %vm466_vm1, %v785_v49, %v789_v43  ;;  %v1090_v62 = vrot.slane %v4730_v40, 1  ;;  %v1723_v1 = vshll.u32 %v5652_v32, 16 }
  0x28   :  { %v1714_v6 = vrot.slane %v1712_v44, 1  ;;  %v1717_v8 = vrot.slane %v1715_v56, 2  ;;  %v5697_v10 = vcombine.low %v24_v47, %v5671_v53  ;;  %v1319_v11 = vsel %vm1268_vm3, %v1310_v54, %v1318_v59  ;;  %v5755_v54 = vld [vmem:[%s8251_s0 + $0x34] sm:$0xf] }
  0x29   :  { %2120 = vrot.lane.b32.xlu0 %v2051_v48, %s5426_s7  ;;  %v1722_v9 = vrot.slane %v1720_v60, 1  ;;  %v1980_v12 = vrot.slane %v4770_v55, 2  ;;  %v1981_v13 = vrot.slane %v5635_v18, 2  ;;  %v1725_v14 = vrot.slane %v1723_v1, 2 }
  0x2a   :  { %v504_v17 = vshrl.u32 %v5697_v10, 16  ;;  %v506_v0 = vshll.u32 %v5697_v10, 16  ;;  %v511_v7 = vshll.u32 %v5678_v57, 16  ;;  %v4707_v19 = vcombine.low %v117_v61, %v5671_v53  ;;  %v5746_v48 = vld [vmem:[%s8251_s0 + $0x14c] ss:$0 sps:$4 sm:$0x33]  }
  0x2b   :  { %1112 = vrot.lane.b32.xlu1 %v1020_v58, %s5423_s5  ;;  %v1092_v18 = vsel %vm1011_vm0, %v1090_v62, %v1091_v51  ;;  %v5717_v21 = vcombine.low %v72_v2, %v5694_v4  ;;  %v1718_v24 = vor.u32 %v1717_v8, %v1714_v6  ;;  %v1726_v25 = vor.u32 %v1725_v14, %v1722_v9  ;;  %v26_v51 = vld [vmem:[%s8251_s0 + $0x30] sm:$0xf] }
  0x2c   :  { %v508_v26 = vrot.slane %v506_v0, 1  ;;  %v4794_v27 = vcombine.low %v204_v15, %v5611_v63  ;;  %v1982_v29 = vsel %vm1973_vm2, %v1980_v12, %v1981_v13  ;;  %v2053_v30 = vrot.slane %v5652_v32, 2  ;;  %v118_v2 = vld [vmem:[%s8251_s0 + $0x30] sm:$0xe]  ;;  %v5783_v15 = vld [vmem:[%s8251_s0 + $0x154] sm:$0xf] }
  0x2d   :  { %903 = vrot.lane.b32.xlu0 %v790_v42, %s5424_s16  ;;  %v794_v31 = vshll.u32 %v5717_v21, 16  ;;  %v1321_v33 = vshrl.u32 %v4707_v19, 16  ;;  %v513_v36 = vrot.slane %v511_v7, 1  ;;  %v792_v37 = vshrl.u32 %v5717_v21, 16  ;;  %v74_v14 = vld [vmem:[%s8251_s0 + $0x150] sm:$0xf] }
  0x2e   :  { %v509_v35 = vor.u32 %v508_v26, %v504_v17  ;;  %v799_v38 = vshll.u32 %v5712_v20, 16  ;;  %v1324_v39 = vshll.u32 %v4707_v19, 16  ;;  %v1329_v40 = vshrl.u32 %v5722_v23, 16 }
  0x2f   :  { %1817 = vrot.lane.b32.xlu1 %v1319_v11, %s5425_s23  ;;  %v796_v63 = vrot.slane %v794_v31, 1  ;;  %v1332_v32 = vshll.u32 %v5722_v23, 16  ;;  %v1727_v43 = vsel %vm1268_vm3, %v1718_v24, %v1726_v25  ;;  %v2052_v45 = vrot.slane %v4794_v27, 2 }
  0x30   :  { %v1022_v46 = vrot.slane %v5678_v57, 1  ;;  %v4731_v47 = vcombine.low %v141_v34, %v5694_v4  ;;  %v1021_v49 = vrot.slane %v4707_v19, 1  ;;  %v1323_v50 = vrot.slane %v1321_v33, 1 }
  0x31   :  { %1160 = vrot.lane.b32.xlu0 %v1092_v18, %s5423_s5  ;;  %v514_v55 = vsel %vm466_vm1, %v509_v35, %v513_v36  ;;  %v1326_v44 = vrot.slane %v1324_v39, 2  ;;  %v1331_v56 = vrot.slane %v1329_v40, 1  ;;  %v1334_v57 = vrot.slane %v1332_v32, 2  ;;  %v5809_v36 = vld [vmem:[%s8251_s0 + $0x158] ss:$0 sps:$4 sm:$0x11]  }
  0x32   :  { %v797_v58 = vor.u32 %v796_v63, %v792_v37  ;;  %v801_v59 = vrot.slane %v799_v38, 1  ;;  %v4771_v60 = vcombine.low %v181_v41, %v5671_v53  ;;  %v2054_v61 = vsel %vm1973_vm2, %v2052_v45, %v2053_v30  ;;  %v5774_v53 = vld [vmem:[%s8251_s0 + $0x38] ss:$0 sps:$4 sm:$0x11]   ;;  %v142_v32 = vld [vmem:[%s8251_s0 + $0x150] sm:$0xe] }
  0x33   :  { %2074 = vrot.lane.b32.xlu1 %v1982_v29, %s5426_s7  ;;  %v1729_v42 = vshrl.u32 %v4731_v47, 16  ;;  %v1732_v62 = vshll.u32 %v4731_v47, 16  ;;  %v1737_v1 = vshrl.u32 %v5746_v48, 16  ;;  %v1094_v6 = vrot.slane %v5712_v20, 1  ;;  %v205_v29 = vld [vmem:[%s8251_s0 + $0x144] sm:$0xc] }
  0x34   :  { %v1740_v8 = vshll.u32 %v5746_v48, 16  ;;  %v5769_v9 = vcombine.low %v26_v51, %v5755_v54  ;;  %v1023_v11 = vsel %vm1011_vm0, %v1021_v49, %v1022_v46  ;;  %v1327_v12 = vor.u32 %v1326_v44, %v1323_v50 }
  0x35   :  { %1865 = vrot.lane.b32.xlu0 %v1727_v43, %s5425_s23  ;;  %v1335_v13 = vor.u32 %v1334_v57, %v1331_v56  ;;  %v802_v17 = vsel %vm466_vm1, %v797_v58, %v801_v59  ;;  %v1093_v0 = vrot.slane %v4731_v47, 1  ;;  %v1983_v7 = vrot.slane %v4771_v60, 2  ;;  %v28_v60 = vld [vmem:[%s8251_s0 + $0x3c] sm:$0xf] }
  0x36   :  { %v518_v19 = vshll.u32 %v5769_v9, 16  ;;  %v1731_v20 = vrot.slane %v1729_v42, 1  ;;  %v1734_v18 = vrot.slane %v1732_v62, 2  ;;  %v1739_v24 = vrot.slane %v1737_v1, 1 }
  0x37   :  { %857 = vrot.lane.b32.xlu1 %v514_v55, %s5424_s16  ;;  %v1742_v25 = vrot.slane %v1740_v8, 2  ;;  %v1984_v26 = vrot.slane %v5722_v23, 2  ;;  %v523_v27 = vshll.u32 %v5774_v53, 16  ;;  %v4708_v30 = vcombine.low %v118_v2, %v5755_v54  ;;  %v5803_v23 = vld [vmem:[%s8251_s0 + $0x38] ss:$0 sps:$4 sm:$0x33]  }
  0x38   :  { %v5796_v31 = vcombine.low %v74_v14, %v5783_v15  ;;  %v1336_v33 = vsel %vm1268_vm3, %v1327_v12, %v1335_v13  ;;  %v516_v34 = vshrl.u32 %v5769_v9, 16  ;;  %v520_v35 = vrot.slane %v518_v19, 1  ;;  %v182_v2 = vld [vmem:[%s8251_s0 + $0x30] sm:$0xc] }
  0x39   :  { %2122 = vrot.lane.b32.xlu0 %v2054_v61, %s5426_s7  ;;  %v1095_v38 = vsel %vm1011_vm0, %v1093_v0, %v1094_v6  ;;  %v1735_v63 = vor.u32 %v1734_v18, %v1731_v20  ;;  %v1743_v39 = vor.u32 %v1742_v25, %v1739_v24  ;;  %v4795_v40 = vcombine.low %v205_v29, %v5694_v4  ;;  %v5824_v4 = vld [vmem:[%s8251_s0 + $0x158] ss:$0 sps:$4 sm:$0x33]   ;;  %v5840_v61 = vld [vmem:[%s8251_s0 + $0x40] sm:$0xf] }
  0x3a   :  { %v806_v37 = vshll.u32 %v5796_v31, 16  ;;  %v1985_v41 = vsel %vm1973_vm2, %v1983_v7, %v1984_v26  ;;  %v525_v43 = vrot.slane %v523_v27, 1  ;;  %v1338_v45 = vshrl.u32 %v4708_v30, 16  ;;  %v5088_v18 = vld [vmem:[%s8252_s1 + $0x4] ss:$12 sps:$4 sm:$0xff]  }
  0x3b   :  { %1114 = vrot.lane.b32.xlu1 %v1023_v11, %s5423_s5  ;;  %v521_v46 = vor.u32 %v520_v35, %v516_v34  ;;  %v1341_v47 = vshll.u32 %v4708_v30, 16  ;;  %v1346_v49 = vshrl.u32 %v5803_v23, 16  ;;  %v1349_v50 = vshll.u32 %v5803_v23, 16  ;;  %v76_v25 = vld [vmem:[%s8251_s0 + $0x15c] sm:$0xf]  ;;  %2620 = vmatprep.subr.bf16.mxu0 %v5088_v18 }
  0x3c   :  { %v804_v51 = vshrl.u32 %v5796_v31, 16  ;;  %v808_v55 = vrot.slane %v806_v37, 1  ;;  %v811_v44 = vshll.u32 %v5809_v36, 16  ;;  %v5830_v56 = vcombine.low %v142_v32, %v5783_v15  ;;  %v5873_v26 = vld [vmem:[%s8251_s0 + $0x160] sm:$0xf]  ;;  %5008 = vmatprep.subr.bf16.mxu1 %v5088_v18 }
  0x3d   :  { %905 = vrot.lane.b32.xlu0 %v802_v17, %s5424_s16  ;;  %v1744_v57 = vsel %vm1268_vm3, %v1735_v63, %v1743_v39  ;;  %v2055_v58 = vrot.slane %v4795_v40, 2  ;;  %v2056_v59 = vrot.slane %v5746_v48, 2  ;;  %v1024_v42 = vrot.slane %v4708_v30, 1  ;;  %v206_v34 = vld [vmem:[%s8251_s0 + $0x150] sm:$0xc] }
  0x3e   :  { %v1025_v62 = vrot.slane %v5774_v53, 1  ;;  %v1340_v1 = vrot.slane %v1338_v45, 1  ;;  %v526_v48 = vsel %vm466_vm1, %v521_v46, %v525_v43  ;;  %v1343_v6 = vrot.slane %v1341_v47, 2  ;;  %v5856_v53 = vld [vmem:[%s8251_s0 + $0x44] ss:$0 sps:$4 sm:$0x11]  }
  0x3f   :  { %1819 = vrot.lane.b32.xlu1 %v1336_v33, %s5425_s23  ;;  %v1348_v8 = vrot.slane %v1346_v49, 1  ;;  %v1351_v11 = vrot.slane %v1349_v50, 2  ;;  %v809_v12 = vor.u32 %v808_v55, %v804_v51  ;;  %v813_v13 = vrot.slane %v811_v44, 1  ;;  %v119_v35 = vld [vmem:[%s8251_s0 + $0x3c] sm:$0xe] }
  0x40   :  { %v1746_v14 = vshrl.u32 %v5830_v56, 16  ;;  %v5851_v17 = vcombine.low %v28_v60, %v5840_v61  ;;  %v2057_v0 = vsel %vm1973_vm2, %v2055_v58, %v2056_v59  ;;  %v1749_v7 = vshll.u32 %v5830_v56, 16  ;;  %v5890_v39 = vld [vmem:[%s8251_s0 + $0x164] ss:$0 sps:$4 sm:$0x11]  }
  0x41   :  { %1162 = vrot.lane.b32.xlu0 %v1095_v38, %s5423_s5  ;;  %v1754_v19 = vshrl.u32 %v5824_v4, 16  ;;  %v1757_v20 = vshll.u32 %v5824_v4, 16  ;;  %v1026_v24 = vsel %vm1011_vm0, %v1024_v42, %v1025_v62  ;;  %v1344_v27 = vor.u32 %v1343_v6, %v1340_v1  ;;  %v5093_v45 = vld [vmem:[%s8252_s1] ss:$12 sps:$4 sm:$0xff]   ;;  %v5094_v49 = vld [vmem:[%s8252_s1 + $0x1c] ss:$12 sps:$4 sm:$0xff]  }
  0x42   :  { %v1352_v29 = vor.u32 %v1351_v11, %v1348_v8  ;;  %v4772_v30 = vcombine.low %v182_v2, %v5755_v54  ;;  %v530_v33 = vshll.u32 %v5851_v17, 16  ;;  %v814_v37 = vsel %vm466_vm1, %v809_v12, %v813_v13  ;;  %2621 = vmatpush1.bf16.msra.mxu0 %v5093_v45  ;;  %5016 = vmatpush1.bf16.msra.mxu1 %v5093_v45  ;;  %v30_v62 = vld [vmem:[%s8251_s0 + $0x48] sm:$0xf]  ;;  %v5927_v1 = vld [vmem:[%s8251_s0 + $0x4c] sm:$0xf] }
  0x43   :  { %2076 = vrot.lane.b32.xlu1 %v1985_v41, %s5426_s7  ;;  %v1096_v38 = vrot.slane %v5830_v56, 1  ;;  %v1097_v54 = vrot.slane %v5809_v36, 1  ;;  %v1748_v63 = vrot.slane %v1746_v14, 1  ;;  %v1751_v40 = vrot.slane %v1749_v7, 2  ;;  %2622 = vmatprep.subr.bf16.mxu0 %v5094_v49  ;;  %v5099_v8 = vld [vmem:[%s8252_s1 + $0x18] ss:$12 sps:$4 sm:$0xff]  }
  0x44   :  { %v1756_v32 = vrot.slane %v1754_v19, 1  ;;  %v1759_v41 = vrot.slane %v1757_v20, 2  ;;  %v5893_v43 = vcombine.low %v76_v25, %v5873_v26  ;;  %v1987_v36 = vrot.slane %v5803_v23, 2  ;;  %v5912_v56 = vld [vmem:[%s8251_s0 + $0x44] ss:$0 sps:$4 sm:$0x33]   ;;  %5009 = vmatprep.subr.bf16.mxu1 %v5094_v49 }
  0x45   :  { %1867 = vrot.lane.b32.xlu0 %v1744_v57, %s5425_s23  ;;  %v535_v46 = vshll.u32 %v5856_v53, 16  ;;  %v5902_v47 = vcombine.low %v119_v35, %v5840_v61  ;;  %v1353_v50 = vsel %vm1268_vm3, %v1344_v27, %v1352_v29  ;;  %v1986_v51 = vrot.slane %v4772_v30, 2  ;;  %v143_v57 = vld [vmem:[%s8251_s0 + $0x15c] sm:$0xe] }
  0x46   :  { %v528_v55 = vshrl.u32 %v5851_v17, 16  ;;  %v532_v44 = vrot.slane %v530_v33, 1  ;;  %v4796_v23 = vcombine.low %v206_v34, %v5783_v15  ;;  %v1098_v58 = vsel %vm1011_vm0, %v1096_v38, %v1097_v54  ;;  %v5950_v18 = vld [vmem:[%s8251_s0 + $0x164] ss:$0 sps:$4 sm:$0x33]   ;;  %2623 = vmatpush1.bf16.msra.mxu0 %v5099_v8  ;;  %5017 = vmatpush1.bf16.msra.mxu1 %v5099_v8 }
  0x47   :  { %859 = vrot.lane.b32.xlu1 %v526_v48, %s5424_s16  ;;  %v1752_v59 = vor.u32 %v1751_v40, %v1748_v63  ;;  %v1760_v60 = vor.u32 %v1759_v41, %v1756_v32  ;;  %v818_v42 = vshll.u32 %v5893_v43, 16  ;;  %v537_v15 = vrot.slane %v535_v46, 1  ;;  %v183_v35 = vld [vmem:[%s8251_s0 + $0x3c] sm:$0xc] }
  0x48   :  { %v823_v2 = vshll.u32 %v5890_v39, 16  ;;  %v1355_v48 = vshrl.u32 %v5902_v47, 16  ;;  %v1358_v6 = vshll.u32 %v5902_v47, 16  ;;  %v1988_v11 = vsel %vm1973_vm2, %v1986_v51, %v1987_v36  ;;  %v5973_v32 = vld [vmem:[%s8251_s0 + $0x50] ss:$0 sps:$4 sm:$0x11]  }
  0x49   :  { %2124 = vrot.lane.b32.xlu0 %v2057_v0, %s5426_s7  ;;  %v533_v12 = vor.u32 %v532_v44, %v528_v55  ;;  %v1363_v13 = vshrl.u32 %v5912_v56, 16  ;;  %v1366_v14 = vshll.u32 %v5912_v56, 16  ;;  %v5100_v0 = vld [vmem:[%s8252_s1 + $0x34] ss:$12 sps:$4 sm:$0xff]   ;;  %v2058_v7 = vrot.slane %v4796_v23, 2 }
  0x4a   :  { %v2059_v19 = vrot.slane %v5824_v4, 2  ;;  %v5945_v20 = vcombine.low %v143_v57, %v5873_v26  ;;  %v1028_v25 = vrot.slane %v5856_v53, 1  ;;  %v816_v27 = vshrl.u32 %v5893_v43, 16  ;;  %2624 = vmatprep.subr.bf16.mxu0 %v5100_v0  ;;  %v5104_v4 = vld [vmem:[%s8252_s1 + $0x30] ss:$12 sps:$4 sm:$0xff]   ;;  %5010 = vmatprep.subr.bf16.mxu1 %v5100_v0 }
  0x4b   :  { %1116 = vrot.lane.b32.xlu1 %v1026_v24, %s5423_s5  ;;  %v1761_v24 = vsel %vm1268_vm3, %v1752_v59, %v1760_v60  ;;  %v820_v29 = vrot.slane %v818_v42, 1  ;;  %v1027_v30 = vrot.slane %v5902_v47, 1  ;;  %v825_v33 = vrot.slane %v823_v2, 1  ;;  %2625 = vmatpush1.bf16.msra.mxu0 %v5104_v4  ;;  %v5109_v36 = vld [vmem:[%s8252_s1 + $0x48] ss:$12 sps:$4 sm:$0xff]  }
  0x4c   :  { %v1357_v34 = vrot.slane %v1355_v48, 1  ;;  %v5964_v53 = vcombine.low %v30_v62, %v5927_v1  ;;  %v538_v38 = vsel %vm466_vm1, %v533_v12, %v537_v15  ;;  %v1360_v54 = vrot.slane %v1358_v6, 2  ;;  %v78_v51 = vld [vmem:[%s8251_s0 + $0x168] sm:$0xf]  ;;  %v5990_v55 = vld [vmem:[%s8251_s0 + $0x16c] sm:$0xf]  ;;  %5018 = vmatpush1.bf16.msra.mxu1 %v5104_v4 }
  0x4d   :  { %907 = vrot.lane.b32.xlu0 %v814_v37, %s5424_s16  ;;  %v5105_v37 = vld [vmem:[%s8252_s1 + $0x4c] ss:$12 sps:$4 sm:$0xff]   ;;  %v1365_v63 = vrot.slane %v1363_v13, 1  ;;  %v1368_v40 = vrot.slane %v1366_v14, 2  ;;  %v1763_v41 = vshrl.u32 %v5945_v20, 16  ;;  %v1766_v45 = vshll.u32 %v5945_v20, 16 }
  0x4e   :  { %v2060_v46 = vsel %vm1973_vm2, %v2058_v7, %v2059_v19  ;;  %v821_v47 = vor.u32 %v820_v29, %v816_v27  ;;  %v1771_v49 = vshrl.u32 %v5950_v18, 16  ;;  %2626 = vmatprep.subr.bf16.mxu0 %v5105_v37  ;;  %v1029_v44 = vsel %vm1011_vm0, %v1027_v30, %v1028_v25  ;;  %5011 = vmatprep.subr.bf16.mxu1 %v5105_v37  ;;  %v5110_v57 = vld [vmem:[%s8252_s1 + $0x64] ss:$12 sps:$4 sm:$0xff]   ;;  %v207_v62 = vld [vmem:[%s8251_s0 + $0x15c] sm:$0xc] }
  0x4f   :  { %1821 = vrot.lane.b32.xlu1 %v1353_v50, %s5425_s23  ;;  %v1774_v50 = vshll.u32 %v5950_v18, 16  ;;  %v542_v23 = vshll.u32 %v5964_v53, 16  ;;  %v1369_v59 = vor.u32 %v1368_v40, %v1365_v63  ;;  %v1100_v60 = vrot.slane %v5890_v39, 1  ;;  %v120_v15 = vld [vmem:[%s8251_s0 + $0x48] sm:$0xe]  ;;  %2627 = vmatpush1.bf16.msra.mxu0 %v5109_v36 }
  0x50   :  { %v4773_v42 = vcombine.low %v183_v35, %v5840_v61  ;;  %v1099_v2 = vrot.slane %v5945_v20, 1  ;;  %v1765_v48 = vrot.slane %v1763_v41, 1  ;;  %v1768_v6 = vrot.slane %v1766_v45, 2  ;;  %v6016_v13 = vld [vmem:[%s8251_s0 + $0x170] ss:$0 sps:$4 sm:$0x11]   ;;  %2628 = vmatprep.subr.bf16.mxu0 %v5110_v57  ;;  %5019 = vmatpush1.bf16.msra.mxu1 %v5109_v36 }
  0x51   :  { %1164 = vrot.lane.b32.xlu0 %v1098_v58, %s5423_s5  ;;  %v1361_v58 = vor.u32 %v1360_v54, %v1357_v34  ;;  %v6009_v8 = vcombine.low %v78_v51, %v5990_v55  ;;  %v826_v61 = vsel %vm466_vm1, %v821_v47, %v825_v33  ;;  %v1773_v39 = vrot.slane %v1771_v49, 1  ;;  %v6026_v19 = vld [vmem:[%s8251_s0 + $0x50] ss:$0 sps:$4 sm:$0x33]   ;;  %5012 = vmatprep.subr.bf16.mxu1 %v5110_v57  ;;  %v5115_v29 = vld [vmem:[%s8252_s1 + $0x60] ss:$12 sps:$4 sm:$0xff]  }
  0x52   :  { %v547_v12 = vshll.u32 %v5973_v32, 16  ;;  %v540_v14 = vshrl.u32 %v5964_v53, 16  ;;  %v544_v0 = vrot.slane %v542_v23, 1  ;;  %v6021_v7 = vcombine.low %v120_v15, %v5927_v1  ;;  %v5116_v34 = vld [vmem:[%s8252_s1 + $0x7c] ss:$12 sps:$4 sm:$0xff]  }
  0x53   :  { %2078 = vrot.lane.b32.xlu1 %v1988_v11, %s5426_s7  ;;  %v1776_v11 = vrot.slane %v1774_v50, 2  ;;  %v1370_v20 = vsel %vm1268_vm3, %v1361_v58, %v1369_v59  ;;  %v1990_v25 = vrot.slane %v5912_v56, 2  ;;  %v4797_v27 = vcombine.low %v207_v62, %v5873_v26  ;;  %2629 = vmatpush1.bf16.msra.mxu0 %v5115_v29  ;;  %v6057_v47 = vld [vmem:[%s8251_s0 + $0x170] ss:$0 sps:$4 sm:$0x33]  }
  0x54   :  { %v1101_v4 = vsel %vm1011_vm0, %v1099_v2, %v1100_v60  ;;  %v1769_v30 = vor.u32 %v1768_v6, %v1765_v48  ;;  %v830_v33 = vshll.u32 %v6009_v8, 16  ;;  %v549_v37 = vrot.slane %v547_v12, 1  ;;  %5020 = vmatpush1.bf16.msra.mxu1 %v5115_v29  ;;  %2630 = vmatprep.subr.bf16.mxu0 %v5116_v34  ;;  %v5121_v49 = vld [vmem:[%s8252_s1 + $0x78] ss:$12 sps:$4 sm:$0xff]   ;;  %v32_v23 = vld [vmem:[%s8251_s0 + $0x54] sm:$0xf] }
  0x55   :  { %1869 = vrot.lane.b32.xlu0 %v1761_v24, %s5425_s23  ;;  %v1989_v24 = vrot.slane %v4773_v42, 2  ;;  %v1777_v35 = vor.u32 %v1776_v11, %v1773_v39  ;;  %v2062_v56 = vrot.slane %v5950_v18, 2  ;;  %v835_v26 = vshll.u32 %v6016_v13, 16  ;;  %v184_v18 = vld [vmem:[%s8251_s0 + $0x48] sm:$0xc]  ;;  %5013 = vmatprep.subr.bf16.mxu1 %v5116_v34 }
  0x56   :  { %v545_v54 = vor.u32 %v544_v0, %v540_v14  ;;  %v1372_v63 = vshrl.u32 %v6021_v7, 16  ;;  %v1375_v40 = vshll.u32 %v6021_v7, 16  ;;  %v1380_v41 = vshrl.u32 %v6026_v19, 16  ;;  %v6073_v57 = vld [vmem:[%s8251_s0 + $0x58] sm:$0xf] }
  0x57   :  { %861 = vrot.lane.b32.xlu1 %v538_v38, %s5424_s16  ;;  %v144_v38 = vld [vmem:[%s8251_s0 + $0x168] sm:$0xe]  ;;  %v1991_v45 = vsel %vm1973_vm2, %v1989_v24, %v1990_v25  ;;  %v2061_v36 = vrot.slane %v4797_v27, 2  ;;  %v828_v50 = vshrl.u32 %v6009_v8, 16  ;;  %v832_v51 = vrot.slane %v830_v33, 1  ;;  %2631 = vmatpush1.bf16.msra.mxu0 %v5121_v49 }
  0x58   :  { %v1778_v58 = vsel %vm1268_vm3, %v1769_v30, %v1777_v35  ;;  %v1030_v59 = vrot.slane %v6021_v7, 1  ;;  %v1031_v60 = vrot.slane %v5973_v32, 1  ;;  %v837_v42 = vrot.slane %v835_v26, 1  ;;  %v5122_v62 = vld [vmem:[%s8252_s1 + $0x94] ss:$12 sps:$4 sm:$0xff]   ;;  %5021 = vmatpush1.bf16.msra.mxu1 %v5121_v49 }
  0x59   :  { %2126 = vrot.lane.b32.xlu0 %v2060_v46, %s5426_s7  ;;  %v1383_v46 = vshll.u32 %v6026_v19, 16  ;;  %v550_v15 = vsel %vm466_vm1, %v545_v54, %v549_v37  ;;  %v1374_v2 = vrot.slane %v1372_v63, 1  ;;  %v1377_v48 = vrot.slane %v1375_v40, 2  ;;  %2632 = vmatprep.subr.bf16.mxu0 %v5122_v62  ;;  %v5126_v12 = vld [vmem:[%s8252_s1 + $0x90] ss:$12 sps:$4 sm:$0xff]  }
  0x5a   :  { %v1382_v6 = vrot.slane %v1380_v41, 1  ;;  %v1103_v39 = vrot.slane %v6016_v13, 1  ;;  %v4774_v11 = vcombine.low %v184_v18, %v5927_v1  ;;  %v6086_v32 = vcombine.low %v32_v23, %v6073_v57  ;;  %5014 = vmatprep.subr.bf16.mxu1 %v5122_v62  ;;  %v121_v25 = vld [vmem:[%s8251_s0 + $0x54] sm:$0xe]  ;;  %v5127_v27 = vld [vmem:[%s8252_s1 + $0xac] ss:$12 sps:$4 sm:$0xff]  }
  0x5b   :  { %1118 = vrot.lane.b32.xlu1 %v1029_v44, %s5423_s5  ;;  %v6065_v44 = vcombine.low %v144_v38, %v5990_v55  ;;  %v833_v14 = vor.u32 %v832_v51, %v828_v50  ;;  %v2063_v1 = vsel %vm1973_vm2, %v2061_v36, %v2062_v56  ;;  %v1791_v24 = vshll.u32 %v6057_v47, 16  ;;  %2633 = vmatpush1.bf16.msra.mxu0 %v5126_v12  ;;  %v6112_v30 = vld [vmem:[%s8251_s0 + $0x178] sm:$0xf]  ;;  %v6118_v37 = vld [vmem:[%s8251_s0 + $0x5c] ss:$0 sps:$4 sm:$0x11]  }
  0x5c   :  { %5022 = vmatpush1.bf16.msra.mxu1 %v5126_v12  ;;  %v1032_v29 = vsel %vm1011_vm0, %v1030_v59, %v1031_v60  ;;  %v1378_v33 = vor.u32 %v1377_v48, %v1374_v2  ;;  %v1993_v35 = vrot.slane %v6026_v19, 2  ;;  %v554_v56 = vshll.u32 %v6086_v32, 16  ;;  %2634 = vmatprep.subr.bf16.mxu0 %v5127_v27  ;;  %v5131_v19 = vld [vmem:[%s8252_s1 + $0xa8] ss:$12 sps:$4 sm:$0xff]  }
  0x5d   :  { %909 = vrot.lane.b32.xlu0 %v826_v61, %s5424_s16  ;;  %v1385_v61 = vrot.slane %v1383_v46, 2  ;;  %v1102_v0 = vrot.slane %v6065_v44, 1  ;;  %v1780_v7 = vshrl.u32 %v6065_v44, 16  ;;  %v1783_v13 = vshll.u32 %v6065_v44, 16  ;;  %5015 = vmatprep.subr.bf16.mxu1 %v5127_v27  ;;  %v208_v18 = vld [vmem:[%s8251_s0 + $0x168] sm:$0xc] }
  0x5e   :  { %v838_v26 = vsel %vm466_vm1, %v833_v14, %v837_v42  ;;  %v1992_v38 = vrot.slane %v4774_v11, 2  ;;  %v1793_v41 = vrot.slane %v1791_v24, 2  ;;  %v6139_v46 = vld [vmem:[%s8251_s0 + $0x5c] ss:$0 sps:$4 sm:$0x33]   ;;  %v552_v50 = vshrl.u32 %v6086_v32, 16 }
  0x5f   :  { %1823 = vrot.lane.b32.xlu1 %v1370_v20, %s5425_s23  ;;  %v1788_v20 = vshrl.u32 %v6057_v47, 16  ;;  %v1386_v34 = vor.u32 %v1385_v61, %v1382_v6  ;;  %v1782_v54 = vrot.slane %v1780_v7, 1  ;;  %v1785_v63 = vrot.slane %v1783_v13, 2  ;;  %2635 = vmatpush1.bf16.msra.mxu0 %v5131_v19  ;;  %v6147_v23 = vld [vmem:[%s8251_s0 + $0x17c] ss:$0 sps:$4 sm:$0x11]  }
  0x60   :  { %v556_v51 = vrot.slane %v554_v56, 1  ;;  %v559_v44 = vshll.u32 %v6118_v37, 16  ;;  %5023 = vmatpush1.bf16.msra.mxu1 %v5131_v19  ;;  %v1994_v59 = vsel %vm1973_vm2, %v1992_v38, %v1993_v35  ;;  %v4798_v60 = vcombine.low %v208_v18, %v5990_v55  ;;  %v145_v42 = vld [vmem:[%s8251_s0 + $0x174] sm:$0xe] }
  0x61   :  { %1166 = vrot.lane.b32.xlu0 %v1101_v4, %s5423_s5  ;;  %v80_v4 = vld [vmem:[%s8251_s0 + $0x174] sm:$0xf]  ;;  %v1790_v40 = vrot.slane %v1788_v20, 1  ;;  %v1387_v49 = vsel %vm1268_vm3, %v1378_v33, %v1386_v34  ;;  %v1786_v62 = vor.u32 %v1785_v63, %v1782_v54  ;;  %v1397_v61 = vshrl.u32 %v6139_v46, 16 }
  0x62   :  { %v6133_v36 = vcombine.low %v80_v4, %v6112_v30  ;;  %v557_v11 = vor.u32 %v556_v51, %v552_v50  ;;  %v561_v55 = vrot.slane %v559_v44, 1  ;;  %v847_v12 = vshll.u32 %v6147_v23, 16  ;;  %v6172_v20 = vld [vmem:[%s8251_s0 + $0x17c] ss:$0 sps:$4 sm:$0x33]  }
  0x63   :  { %2080 = vrot.lane.b32.xlu1 %v1991_v45, %s5426_s7  ;;  %v6130_v45 = vcombine.low %v121_v25, %v6073_v57  ;;  %v4735_v14 = vcombine.low %v145_v42, %v6112_v30  ;;  %v2064_v7 = vrot.slane %v4798_v60, 2  ;;  %v2065_v13 = vrot.slane %v6057_v47, 2  ;;  %v185_v35 = vld [vmem:[%s8251_s0 + $0x54] sm:$0xc]  ;;  %v122_v50 = vld [vmem:[%s8251_s0 + $0x60] sm:$0xe] }
  0x64   :  { %v842_v2 = vshll.u32 %v6133_v36, 16  ;;  %v840_v27 = vshrl.u32 %v6133_v36, 16  ;;  %v1399_v34 = vrot.slane %v1397_v61, 1  ;;  %v849_v56 = vrot.slane %v847_v12, 1  ;;  %v34_v51 = vld [vmem:[%s8251_s0 + $0x60] sm:$0xf] }
  0x65   :  { %1871 = vrot.lane.b32.xlu0 %v1778_v58, %s5425_s23  ;;  %v1104_v58 = vsel %vm1011_vm0, %v1102_v0, %v1103_v39  ;;  %v1389_v48 = vshrl.u32 %v6130_v45, 16  ;;  %v1392_v6 = vshll.u32 %v6130_v45, 16  ;;  %v1400_v39 = vshll.u32 %v6139_v46, 16 }
  0x66   :  { %v8256_v0 = vmov 0   ;;  %v1033_v25 = vrot.slane %v6130_v45, 1  ;;  %v1800_v38 = vshll.u32 %v4735_v14, 16  ;;  %v1105_v54 = vrot.slane %v4735_v14, 1 }
  0x67   :  { %863 = vrot.lane.b32.xlu1 %v550_v15, %s5424_s16  ;;  %v1794_v15 = vor.u32 %v1793_v41, %v1790_v40  ;;  %2652 = vmatprep.mubr.bf16.mxu0 %v8256_v0  ;;  %v1391_v4 = vrot.slane %v1389_v48, 1  ;;  %v1394_v33 = vrot.slane %v1392_v6, 2  ;;  %v1402_v47 = vrot.slane %v1400_v39, 2 }
  0x68   :  { %2892 = vmatprep.mubr.bf16.mxu1 %v8256_v0  ;;  %v1106_v63 = vrot.slane %v6147_v23, 1  ;;  %v1805_v19 = vshrl.u32 %v6172_v20, 16  ;;  %v1808_v40 = vshll.u32 %v6172_v20, 16  ;;  %v2066_v41 = vsel %vm1973_vm2, %v2064_v7, %v2065_v13 }
  0x69   :  { %2128 = vrot.lane.b32.xlu0 %v2063_v1, %s5426_s7  ;;  %v1034_v1 = vrot.slane %v6118_v37, 1  ;;  %v1795_v24 = vsel %vm1268_vm3, %v1786_v62, %v1794_v15  ;;  %v562_v37 = vsel %vm466_vm1, %v557_v11, %v561_v55  ;;  %v4775_v45 = vcombine.low %v185_v35, %v6073_v57  ;;  %v6201_v57 = vld [vmem:[%s8251_s0 + $0x68] ss:$0 sps:$4 sm:$0x11]   ;;  %v186_v62 = vld [vmem:[%s8251_s0 + $0x60] sm:$0xc] }
  0x6a   :  { %v1395_v44 = vor.u32 %v1394_v33, %v1391_v4  ;;  %v1403_v23 = vor.u32 %v1402_v47, %v1399_v34  ;;  %v1802_v42 = vrot.slane %v1800_v38, 2  ;;  %v1807_v48 = vrot.slane %v1805_v19, 1  ;;  %v6242_v47 = vld [vmem:[%s8251_s0 + $0x74] ss:$0 sps:$4 sm:$0x11]  }
  0x6b   :  { %1120 = vrot.lane.b32.xlu1 %v1032_v29, %s5423_s5  ;;  %v844_v29 = vrot.slane %v842_v2, 1  ;;  %v1996_v2 = vrot.slane %v6139_v46, 2  ;;  %v1810_v6 = vrot.slane %v1808_v40, 2  ;;  %v1107_v11 = vsel %vm1011_vm0, %v1105_v54, %v1106_v63  ;;  %v36_v40 = vld [vmem:[%s8251_s0 + $0x6c] sm:$0xf] }
  0x6c   :  { %v1995_v55 = vrot.slane %v4775_v45, 2  ;;  %vm2134_vm4 = vcmask 121856   ;;  %v1404_v46 = vsel %vm1268_vm3, %v1395_v44, %v1403_v23  ;;  %vm2199_vm5 = vcmask 244736  }
  0x6d   :  { %911 = vrot.lane.b32.xlu0 %v838_v26, %s5424_s16  ;;  %v1797_v26 = vshrl.u32 %v4735_v14, 16  ;;  %v845_v18 = vor.u32 %v844_v29, %v840_v27  ;;  %v6221_v14 = vld [vmem:[%s8251_s0 + $0x68] ss:$0 sps:$4 sm:$0x33]   ;;  %vm2264_vm6 = vcmask 367616   ;;  %vm2329_vm7 = vcmask 490496  }
  0x6e   :  { %v1037_v29 = vrot.slane %v6201_v57, 1  ;;  %v1811_v4 = vor.u32 %v1810_v6, %v1807_v48  ;;  %v2068_v33 = vrot.slane %v6172_v20, 2  ;;  %vm2394_vm8 = vcmask 613376  }
  0x6f   :  { %1825 = vrot.lane.b32.xlu1 %v1387_v49, %s5425_s23  ;;  %v35_v49 = vld [vmem:[%s8251_s0 + $0x64] sm:$0xf]  ;;  %v1799_v60 = vrot.slane %v1797_v26, 1  ;;  %v850_v39 = vsel %vm466_vm1, %v845_v18, %v849_v56  ;;  %v1999_v20 = vrot.slane %v6221_v14, 2  ;;  %v1414_v18 = vshrl.u32 %v6221_v14, 16 }
  0x70   :  { %v6214_v61 = vcombine.low %v34_v51, %v35_v49  ;;  %v4712_v12 = vcombine.low %v122_v50, %v35_v49  ;;  %v4776_v13 = vcombine.low %v186_v62, %v35_v49  ;;  %v1417_v45 = vshll.u32 %v6221_v14, 16  ;;  %v187_v49 = vld [vmem:[%s8251_s0 + $0x6c] sm:$0xc] }
  0x71   :  { %1168 = vrot.lane.b32.xlu0 %v1104_v58, %s5423_s5  ;;  %v209_v58 = vld [vmem:[%s8251_s0 + $0x174] sm:$0xc]  ;;  %v1803_v27 = vor.u32 %v1802_v42, %v1799_v60  ;;  %vm4438_vm9 = vcmask 1041409   ;;  %vm4441_vm10 = vcmask 1042434   ;;  %vm4444_vm11 = vcmask 1043459  }
  0x72   :  { %v4799_v7 = vcombine.low %v209_v58, %v6112_v30  ;;  %v566_v34 = vshll.u32 %v6214_v61, 16  ;;  %v1406_v26 = vshrl.u32 %v4712_v12, 16  ;;  %v1409_v38 = vshll.u32 %v4712_v12, 16  ;;  %v6265_v58 = vld [vmem:[%s8251_s0 + $0x74] ss:$0 sps:$4 sm:$0x33]  }
  0x73   :  { %2082 = vrot.lane.b32.xlu1 %v1994_v59, %s5426_s7  ;;  %v1035_v59 = vsel %vm1011_vm0, %v1033_v25, %v1034_v1  ;;  %v571_v1 = vshll.u32 %v6201_v57, 16  ;;  %v123_v25 = vld [vmem:[%s8251_s0 + $0x6c] sm:$0xe]  ;;  %v1998_v63 = vrot.slane %v4776_v13, 2  ;;  %v1812_v51 = vsel %vm1268_vm3, %v1803_v27, %v1811_v4 }
  0x74   :  { %v2067_v54 = vrot.slane %v4799_v7, 2  ;;  %v564_v44 = vshrl.u32 %v6214_v61, 16  ;;  %v568_v23 = vrot.slane %v566_v34, 1  ;;  %v1040_v57 = vrot.slane %v6242_v47, 1  ;;  %v124_v7 = vld [vmem:[%s8251_s0 + $0x78] sm:$0xe] }
  0x75   :  { %1873 = vrot.lane.b32.xlu0 %v1795_v24, %s5425_s23  ;;  %v6230_v24 = vld [vmem:[%s8251_s0 + $0x70] sm:$0xf]  ;;  %v573_v19 = vrot.slane %v571_v1, 1  ;;  %v1408_v60 = vrot.slane %v1406_v26, 1  ;;  %v1411_v42 = vrot.slane %v1409_v38, 2  ;;  %v1419_v14 = vrot.slane %v1417_v45, 2 }
  0x76   :  { %v6245_v56 = vcombine.low %v123_v25, %v6230_v24  ;;  %v6269_v62 = vcombine.low %v36_v40, %v6230_v24  ;;  %v2069_v6 = vsel %vm1973_vm2, %v2067_v54, %v2068_v33  ;;  %v2000_v25 = vsel %vm1973_vm2, %v1998_v63, %v1999_v20  ;;  %v6308_v38 = vld [vmem:[%s8251_s0 + $0x80] ss:$0 sps:$4 sm:$0x11]  }
  0x77   :  { %865 = vrot.lane.b32.xlu1 %v562_v37, %s5424_s16  ;;  %v1036_v37 = vrot.slane %v4712_v12, 1  ;;  %v1416_v12 = vrot.slane %v1414_v18, 1  ;;  %v569_v27 = vor.u32 %v568_v23, %v564_v44  ;;  %v583_v26 = vshll.u32 %v6242_v47, 16  ;;  %v188_v47 = vld [vmem:[%s8251_s0 + $0x78] sm:$0xc] }
  0x78   :  { %v1423_v20 = vshrl.u32 %v6245_v56, 16  ;;  %v1426_v18 = vshll.u32 %v6245_v56, 16  ;;  %v1431_v45 = vshrl.u32 %v6265_v58, 16  ;;  %v576_v44 = vshrl.u32 %v6269_v62, 16 }
  0x79   :  { %2130 = vrot.lane.b32.xlu0 %v2066_v41, %s5426_s7  ;;  %v6211_v15 = vpop.permute.xlu1 %1156  ;;  %v1997_v41 = vsel %vm1973_vm2, %v1995_v55, %v1996_v2  ;;  %v1038_v48 = vsel %vm1011_vm0, %v1036_v37, %v1037_v29  ;;  %v2002_v29 = vrot.slane %v6265_v58, 2  ;;  %vm4447_vm12 = vcmask 1044484  }
  0x7a   :  { %vm4450_vm13 = vcmask 1045509   ;;  %vm4453_vm14 = vcmask 1046534   ;;  %vm4456_vm15 = vcmask 1047559  }
  0x7b   :  { %1122 = vrot.lane.b32.xlu1 %v1035_v59, %s5423_s5  ;;  %v1039_v59 = vrot.slane %v6245_v56, 1  ;;  %v585_v56 = vrot.slane %v583_v26, 1 }
  0x7d   :  { %913 = vrot.lane.b32.xlu0 %v850_v39, %s5424_s16  ;;  %v1109_v30 = vpop.permute.xlu1 %1108  ;;  %v6277_v39 = vld [vmem:[%s8251_s0 + $0x7c] sm:$0xf]  ;;  %v1041_v4 = vsel %vm1011_vm0, %v1039_v59, %v1040_v57 }
  0x7e   :  { %v900_v35 = vpop.permute.xlu0 %899  ;;  %v6311_v54 = vcombine.low %v124_v7, %v6277_v39 }
  0x7f   :  { %1827 = vrot.lane.b32.xlu1 %v1404_v46, %s5425_s23  ;;  %v4777_v46 = vcombine.low %v187_v49, %v6230_v24  ;;  %v578_v24 = vshll.u32 %v6269_v62, 16  ;;  %v1434_v49 = vshll.u32 %v6265_v58, 16 }
  0x80   :  { %v1042_v58 = vrot.slane %v6311_v54, 1  ;;  %v1443_v26 = vshll.u32 %v6311_v54, 16 }
  0x81   :  { %1170 = vrot.lane.b32.xlu0 %v1107_v11, %s5423_s5  ;;  %v1814_v50 = vpop.permute.xlu1 %1813  ;;  %v38_v11 = vld [vmem:[%s8251_s0 + $0x78] sm:$0xf]  ;;  %v2001_v63 = vrot.slane %v4777_v46, 2  ;;  %v580_v23 = vrot.slane %v578_v24, 1 }
  0x82   :  { %v6296_v33 = vcombine.low %v38_v11, %v6277_v39  ;;  %v125_v11 = vld [vmem:[%s8251_s0 + $0x84] sm:$0xe] }
  0x83   :  { %v852_v2 = vpop.permute.xlu0 %851  ;;  %2084 = vrot.lane.b32.xlu1 %v1997_v41, %s5426_s7  ;;  %v574_v41 = vsel %vm466_vm1, %v569_v27, %v573_v19  ;;  %v581_v7 = vor.u32 %v580_v23, %v576_v44  ;;  %v40_v27 = vld [vmem:[%s8251_s0 + $0x84] sm:$0xf]  ;;  %v1445_v23 = vrot.slane %v1443_v26, 2 }
  0x84   :  { %v2136_v55 = vsel %vm2134_vm4, %v5491_v28, %v852_v2  ;;  %v590_v19 = vshll.u32 %v6296_v33, 16  ;;  %v1043_v2 = vrot.slane %v6308_v38, 1 }
  0x85   :  { %v2201_v13 = vsel %vm2199_vm5, %v2136_v55, %v1109_v30  ;;  %1875 = vrot.lane.b32.xlu0 %v1812_v51, %s5425_s23  ;;  %v2071_v1 = vpop.permute.xlu1 %2070  ;;  %v2184_v30 = vsel %vm2134_vm4, %v5469_v5, %v900_v35  ;;  %v1412_v5 = vor.u32 %v1411_v42, %v1408_v60  ;;  %v1420_v35 = vor.u32 %v1419_v14, %v1416_v12 }
  0x86   :  { %v2266_v28 = vsel %vm2264_vm6, %v2201_v13, %v1814_v50  ;;  %v5145_v50 = vld [vmem:[%s8251_s0 + $0x80] ss:$0 sps:$4 sm:$0x33]   ;;  %v2249_v51 = vsel %vm2199_vm5, %v2184_v30, %v6211_v15  ;;  %v4778_v60 = vcombine.low %v188_v47, %v6277_v39  ;;  %v1428_v55 = vrot.slane %v1426_v18, 2 }
  0x87   :  { %v6301_v34 = vsel %vm2329_vm7, %v2266_v28, %v2071_v1  ;;  %v1862_v37 = vpop.permute.xlu0 %1861  ;;  %1124 = vrot.lane.b32.xlu1 %v1038_v48, %s5423_s5  ;;  %v1421_v15 = vsel %vm1268_vm3, %v1412_v5, %v1420_v35  ;;  %v1425_v48 = vrot.slane %v1423_v20, 1  ;;  %v1433_v12 = vrot.slane %v1431_v45, 1 }
  0x88   :  { %4824 = vmatmul.mubr.msk.bf16.vlgmr.msra.gmra.mrb[0].mxu0 %vm2394_vm8, %v6301_v34  ;;  %v2314_v57 = vsel %vm2264_vm6, %v2249_v51, %v1862_v37  ;;  %v1436_v14 = vrot.slane %v1434_v49, 2  ;;  %v2005_v46 = vrot.slane %v5145_v50, 2  ;;  %v588_v13 = vshrl.u32 %v6296_v33, 16 }
  0x89   :  { %2132 = vrot.lane.b32.xlu0 %v2069_v6, %s5426_s7  ;;  %v854_v40 = vpop.permute.xlu1 %853  ;;  %2662 = vmatprep.mubr.bf16.mxu0 %v8256_v0  ;;  %v6344_v6 = vld [vmem:[%s8251_s0 + $0x88] sm:$0xf]  ;;  %v592_v1 = vrot.slane %v590_v19, 1  ;;  %v2004_v30 = vrot.slane %v4778_v60, 2  ;;  %v1440_v37 = vshrl.u32 %v6311_v54, 16  ;;  %v2003_v5 = vsel %vm1973_vm2, %v2001_v63, %v2002_v29 }
  0x8a   :  { %v2138_v28 = vsel %vm2134_vm4, %v5513_v52, %v854_v40  ;;  %v1448_v35 = vshrl.u32 %v5145_v50, 16  ;;  %v1451_v20 = vshll.u32 %v5145_v50, 16  ;;  %v1429_v47 = vor.u32 %v1428_v55, %v1425_v48  ;;  %v189_v54 = vld [vmem:[%s8251_s0 + $0x84] sm:$0xc]  ;;  %v126_v55 = vld [vmem:[%s8251_s0 + $0x90] sm:$0xe] }
  0x8b   :  { %v2119_v59 = vpop.permute.xlu0 %2118  ;;  %2086 = vrot.lane.b32.xlu1 %v2000_v25, %s5426_s7  ;;  %v595_v25 = vshll.u32 %v6308_v38, 16  ;;  %v6367_v38 = vld [vmem:[%s8251_s0 + $0x8c] ss:$0 sps:$4 sm:$0x11]   ;;  %v1437_v40 = vor.u32 %v1436_v14, %v1433_v12  ;;  %v6375_v29 = vcombine.low %v40_v27, %v6344_v6  ;;  %v593_v18 = vor.u32 %v592_v1, %v588_v13 }
  0x8c   :  { %v6337_v42 = vsel %vm2329_vm7, %v2314_v57, %v2119_v59  ;;  %v1044_v50 = vsel %vm1011_vm0, %v1042_v58, %v1043_v2  ;;  %v2006_v51 = vsel %vm1973_vm2, %v2004_v30, %v2005_v46  ;;  %v6382_v44 = vrot.slane %v1440_v37, 1  ;;  %v5150_v19 = vld [vmem:[%s8251_s0 + $0x8c] ss:$0 sps:$4 sm:$0x33]   ;;  %v190_v30 = vld [vmem:[%s8251_s0 + $0x90] sm:$0xc] }
  0x8d   :  { %867 = vrot.lane.b32.xlu0 %v574_v41, %s5424_s16  ;;  %4848 = vmatmul.mubr.msk.bf16.vlgmr.msra.gmra.mrb[0].mxu1 %vm2394_vm8, %v6337_v42  ;;  %v1111_v39 = vpop.permute.xlu1 %1110  ;;  %v586_v41 = vsel %vm466_vm1, %v581_v7, %v585_v56  ;;  %v597_v45 = vrot.slane %v595_v25, 1  ;;  %v1046_v57 = vrot.slane %v6367_v38, 1  ;;  %v1450_v59 = vrot.slane %v1448_v35, 1  ;;  %v42_v7 = vld [vmem:[%s8251_s0 + $0x90] sm:$0xf] }
  0x8e   :  { %2902 = vmatprep.mubr.bf16.mxu1 %v8256_v0  ;;  %v2203_v63 = vsel %vm2199_vm5, %v2138_v28, %v1111_v39  ;;  %v1453_v56 = vrot.slane %v1451_v20, 2  ;;  %v4779_v60 = vcombine.low %v189_v54, %v6344_v6  ;;  %v1438_v48 = vsel %vm1268_vm3, %v1429_v47, %v1437_v40  ;;  %v6418_v35 = vld [vmem:[%s8251_s0 + $0x98] ss:$0 sps:$4 sm:$0x11]  }
  0x8f   :  { %v902_v24 = vpop.permute.xlu0 %901  ;;  %1126 = vrot.lane.b32.xlu1 %v1041_v4, %s5423_s5  ;;  %v4715_v4 = vcombine.low %v125_v11, %v6344_v6  ;;  %v602_v39 = vshll.u32 %v6375_v29, 16  ;;  %v598_v12 = vsel %vm466_vm1, %v593_v18, %v597_v45  ;;  %v1446_v1 = vor.u32 %v1445_v23, %v6382_v44  ;;  %v5155_v18 = vld [vmem:[%s8251_s0 + $0x98] ss:$0 sps:$4 sm:$0x33]  }
  0x90   :  { %v2008_v25 = vrot.slane %v5150_v19, 2  ;;  %v1465_v27 = vshrl.u32 %v5150_v19, 16  ;;  %v1468_v28 = vshll.u32 %v5150_v19, 16  ;;  %v1454_v37 = vor.u32 %v1453_v56, %v1450_v59  ;;  %v127_v19 = vld [vmem:[%s8251_s0 + $0x9c] sm:$0xe] }
  0x91   :  { %1829 = vrot.lane.b32.xlu0 %v1421_v15, %s5425_s23  ;;  %v1816_v52 = vpop.permute.xlu1 %1815  ;;  %v43_v15 = vld [vmem:[%s8251_s0 + $0x94] sm:$0xf]  ;;  %v1045_v11 = vrot.slane %v4715_v4, 1  ;;  %v1457_v14 = vshrl.u32 %v4715_v4, 16  ;;  %v1460_v46 = vshll.u32 %v4715_v4, 16  ;;  %v2007_v26 = vrot.slane %v4779_v60, 2 }
  0x92   :  { %v2268_v58 = vsel %vm2264_vm6, %v2203_v63, %v1816_v52  ;;  %v6420_v20 = vcombine.low %v126_v55, %v43_v15  ;;  %v2186_v52 = vsel %vm2134_vm4, %v5547_v16, %v902_v24  ;;  %v600_v40 = vshrl.u32 %v6375_v29, 16 }
  0x93   :  { %v1159_v49 = vpop.permute.xlu0 %1158  ;;  %2088 = vrot.lane.b32.xlu1 %v2003_v5, %s5426_s7  ;;  %v607_v5 = vshll.u32 %v6367_v38, 16  ;;  %v604_v4 = vrot.slane %v602_v39, 1  ;;  %v6426_v54 = vcombine.low %v42_v7, %v43_v15  ;;  %v1459_v63 = vrot.slane %v1457_v14, 1 }
  0x94   :  { %v2251_v38 = vsel %vm2199_vm5, %v2186_v52, %v1159_v49  ;;  %v4780_v45 = vcombine.low %v190_v30, %v43_v15  ;;  %v1047_v24 = vsel %vm1011_vm0, %v1045_v11, %v1046_v57  ;;  %v1467_v44 = vrot.slane %v1465_v27, 1  ;;  %v6438_v49 = vld [vmem:[%s8251_s0 + $0xa0] sm:$0xf]  ;;  %v44_v57 = vld [vmem:[%s8251_s0 + $0x9c] sm:$0xf] }
  0x95   :  { %869 = vrot.lane.b32.xlu0 %v586_v41, %s5424_s16  ;;  %v2073_v2 = vpop.permute.xlu1 %2072  ;;  %v1462_v41 = vrot.slane %v1460_v46, 2  ;;  %v1470_v23 = vrot.slane %v1468_v28, 2  ;;  %v2009_v56 = vsel %vm1973_vm2, %v2007_v26, %v2008_v25  ;;  %v609_v60 = vrot.slane %v607_v5, 1  ;;  %v191_v28 = vld [vmem:[%s8251_s0 + $0x9c] sm:$0xc] }
  0x96   :  { %v6400_v6 = vsel %vm2329_vm7, %v2268_v58, %v2073_v2  ;;  %v1455_v58 = vsel %vm1268_vm3, %v1446_v1, %v1454_v37  ;;  %v605_v2 = vor.u32 %v604_v4, %v600_v40  ;;  %v614_v11 = vshll.u32 %v6426_v54, 16 }
  0x97   :  { %v1864_v13 = vpop.permute.xlu0 %1863  ;;  %1128 = vrot.lane.b32.xlu1 %v1044_v50, %s5423_s5  ;;  %4825 = vmatmul.mubr.msk.bf16.gmra.mrb[4].mxu0 %vm2394_vm8, %v6400_v6  ;;  %v1463_v39 = vor.u32 %v1462_v41, %v1459_v63  ;;  %v2010_v55 = vrot.slane %v4780_v45, 2  ;;  %v2011_v14 = vrot.slane %v5155_v18, 2  ;;  %v6464_v46 = vcombine.low %v127_v19, %v6438_v49  ;;  %v5160_v63 = vld [vmem:[%s8251_s0 + $0xa4] ss:$0 sps:$4 sm:$0x33]  }
  0x98   :  { %2672 = vmatprep.mubr.bf16.mxu0 %v8256_v0  ;;  %v2316_v50 = vsel %vm2264_vm6, %v2251_v38, %v1864_v13  ;;  %v1471_v1 = vor.u32 %v1470_v23, %v1467_v44  ;;  %v1474_v25 = vshrl.u32 %v6420_v20, 16  ;;  %v1477_v27 = vshll.u32 %v6420_v20, 16  ;;  %v6495_v44 = vld [vmem:[%s8251_s0 + $0xac] sm:$0xf]  ;;  %v128_v23 = vld [vmem:[%s8251_s0 + $0xa8] sm:$0xe] }
  0x99   :  { %1831 = vrot.lane.b32.xlu0 %v1438_v48, %s5425_s23  ;;  %v856_v47 = vpop.permute.xlu1 %855  ;;  %v1048_v48 = vrot.slane %v6420_v20, 1  ;;  %v619_v30 = vshll.u32 %v6418_v35, 16  ;;  %v1482_v37 = vshrl.u32 %v5155_v18, 16  ;;  %v1485_v26 = vshll.u32 %v5155_v18, 16 }
  0x9a   :  { %v2140_v7 = vsel %vm2134_vm4, %v5614_v3, %v856_v47  ;;  %v6476_v5 = vcombine.low %v44_v57, %v6438_v49  ;;  %v610_v52 = vsel %vm466_vm1, %v605_v2, %v609_v60  ;;  %v612_v20 = vshrl.u32 %v6426_v54, 16 }
  0x9b   :  { %v2121_v16 = vpop.permute.xlu0 %2120  ;;  %2090 = vrot.lane.b32.xlu1 %v2006_v51, %s5426_s7  ;;  %v1049_v51 = vrot.slane %v6418_v35, 1  ;;  %v616_v40 = vrot.slane %v614_v11, 1  ;;  %v1051_v38 = vrot.slane %v6464_v46, 1  ;;  %v4781_v41 = vcombine.low %v191_v28, %v6438_v49 }
  0x9c   :  { %v6444_v59 = vsel %vm2329_vm7, %v2316_v50, %v2121_v16  ;;  %v1472_v45 = vsel %vm1268_vm3, %v1463_v39, %v1471_v1  ;;  %v2012_v50 = vsel %vm1973_vm2, %v2010_v55, %v2011_v14  ;;  %v1476_v16 = vrot.slane %v1474_v25, 1 }
  0x9d   :  { %8263 = vst [vmem:[#allocation2_spill] sm:$0xff] %v6444_v59  ;;  %871 = vrot.lane.b32.xlu0 %v598_v12, %s5424_s16  ;;  %4849 = vmatmul.mubr.msk.bf16.gmra.mrb[4].mxu1 %vm2394_vm8, %v6444_v59  ;;  %v1113_v15 = vpop.permute.xlu1 %1112  ;;  %v6461_v12 = vld [vmem:[%s8251_s0 + $0xa4] ss:$0 sps:$4 sm:$0x11]   ;;  %v1050_v47 = vsel %vm1011_vm0, %v1048_v48, %v1049_v51  ;;  %v621_v19 = vrot.slane %v619_v30, 1  ;;  %v1484_v49 = vrot.slane %v1482_v37, 1 }
  0x9e   :  { %2912 = vmatprep.mubr.bf16.mxu1 %v8256_v0  ;;  %v2205_v4 = vsel %vm2199_vm5, %v2140_v7, %v1113_v15  ;;  %v1052_v35 = vrot.slane %v6461_v12, 1  ;;  %v1487_v60 = vrot.slane %v1485_v26, 2  ;;  %v617_v15 = vor.u32 %v616_v40, %v612_v20  ;;  %v46_v7 = vld [vmem:[%s8251_s0 + $0xa8] sm:$0xf] }
  0x9f   :  { %v904_v13 = vpop.permute.xlu0 %903  ;;  %1130 = vrot.lane.b32.xlu1 %v1047_v24, %s5423_s5  ;;  %v1479_v24 = vrot.slane %v1477_v27, 2  ;;  %v1491_v2 = vshrl.u32 %v6464_v46, 16  ;;  %v1494_v48 = vshll.u32 %v6464_v46, 16  ;;  %v2013_v55 = vrot.slane %v4781_v41, 2  ;;  %v192_v30 = vld [vmem:[%s8251_s0 + $0xa8] sm:$0xc] }
  0xa0   :  { %v1053_v39 = vsel %vm1011_vm0, %v1051_v38, %v1052_v35  ;;  %v2014_v14 = vrot.slane %v5160_v63, 2  ;;  %v631_v46 = vshll.u32 %v6461_v12, 16  ;;  %v1499_v27 = vshrl.u32 %v5160_v63, 16  ;;  %v6547_v35 = vld [vmem:[%s8251_s0 + $0xb8] sm:$0xf] }
  0xa1   :  { %1833 = vrot.lane.b32.xlu0 %v1455_v58, %s5425_s23  ;;  %v1818_v3 = vpop.permute.xlu1 %1817  ;;  %v6506_v58 = vld [vmem:[%s8251_s0 + $0xb0] ss:$0 sps:$4 sm:$0x11]   ;;  %v1480_v25 = vor.u32 %v1479_v24, %v1476_v16  ;;  %v1502_v28 = vshll.u32 %v5160_v63, 16  ;;  %v1488_v37 = vor.u32 %v1487_v60, %v1484_v49  ;;  %v624_v26 = vshrl.u32 %v6476_v5, 16 }
  0xa2   :  { %v2270_v51 = vsel %vm2264_vm6, %v2205_v4, %v1818_v3  ;;  %v2188_v12 = vsel %vm2134_vm4, %v5638_v22, %v904_v13  ;;  %v6537_v40 = vrot.slane %v1491_v2, 1  ;;  %v6539_v4 = vrot.slane %v1494_v48, 2  ;;  %v6559_v16 = vld [vmem:[%s8251_s0 + $0xbc] ss:$0 sps:$4 sm:$0x11]  }
  0xa3   :  { %v1161_v18 = vpop.permute.xlu0 %1160  ;;  %2092 = vrot.lane.b32.xlu1 %v2009_v56, %s5426_s7  ;;  %v626_v56 = vshll.u32 %v6476_v5, 16  ;;  %v6542_v38 = vcombine.low %v46_v7, %v6495_v44  ;;  %v622_v41 = vsel %vm466_vm1, %v617_v15, %v621_v19  ;;  %v2015_v22 = vsel %vm1973_vm2, %v2013_v55, %v2014_v14  ;;  %v5190_v7 = vld [vmem:[%s8252_s1 + $0x8] ss:$12 sps:$4 sm:$0xff]  }
  0xa4   :  { %v2253_v63 = vsel %vm2199_vm5, %v2188_v12, %v1161_v18  ;;  %v4782_v13 = vcombine.low %v192_v30, %v6495_v44  ;;  %v1055_v18 = vrot.slane %v6506_v58, 1  ;;  %v1501_v19 = vrot.slane %v1499_v27, 1  ;;  %4928 = vmatprep.subr.bf16.mxu1 %v5190_v7 }
  0xa5   :  { %873 = vrot.lane.b32.xlu0 %v610_v52, %s5424_s16  ;;  %v2075_v57 = vpop.permute.xlu1 %2074  ;;  %v628_v3 = vrot.slane %v626_v56, 1  ;;  %v6527_v52 = vcombine.low %v128_v23, %v6495_v44  ;;  %v1504_v49 = vrot.slane %v1502_v28, 2  ;;  %v48_v44 = vld [vmem:[%s8251_s0 + $0xb4] sm:$0xf]  ;;  %v1489_v56 = vsel %vm1268_vm3, %v1480_v25, %v1488_v37  ;;  %v6594_v28 = vld [vmem:[%s8251_s0 + $0xd0] sm:$0xf]  ;;  %4929 = vmatpush3.bf16.msra.mxu1 %v5190_v7 }
  0xa6   :  { %v6511_v11 = vsel %vm2329_vm7, %v2270_v51, %v2075_v57  ;;  %v633_v51 = vrot.slane %v631_v46, 1  ;;  %v1497_v48 = vor.u32 %v6539_v4, %v6537_v40  ;;  %v638_v55 = vshll.u32 %v6542_v38, 16 }
  0xa7   :  { %v1866_v1 = vpop.permute.xlu0 %1865  ;;  %1132 = vrot.lane.b32.xlu1 %v1050_v47, %s5423_s5  ;;  %4826 = vmatmul.mubr.msk.bf16.gmra.mrb[8].mxu0 %vm2394_vm8, %v6511_v11  ;;  %v6532_v47 = vld [vmem:[%s8251_s0 + $0xb0] ss:$0 sps:$4 sm:$0x33]   ;;  %v1054_v57 = vrot.slane %v6527_v52, 1  ;;  %v629_v2 = vor.u32 %v628_v3, %v624_v26  ;;  %v1508_v46 = vshrl.u32 %v6527_v52, 16  ;;  %v1511_v27 = vshll.u32 %v6527_v52, 16 }
  0xa8   :  { %2682 = vmatprep.mubr.bf16.mxu0 %v8256_v0  ;;  %v2318_v24 = vsel %vm2264_vm6, %v2253_v63, %v1866_v1  ;;  %v2016_v1 = vrot.slane %v4782_v13, 2  ;;  %v2017_v25 = vrot.slane %v6532_v47, 2  ;;  %v1505_v26 = vor.u32 %v1504_v49, %v1501_v19  ;;  %v193_v52 = vld [vmem:[%s8251_s0 + $0xb4] sm:$0xc] }
  0xa9   :  { %1835 = vrot.lane.b32.xlu0 %v1472_v45, %s5425_s23  ;;  %v858_v20 = vpop.permute.xlu1 %857  ;;  %v129_v45 = vld [vmem:[%s8251_s0 + $0xb4] sm:$0xe]  ;;  %v1516_v3 = vshrl.u32 %v6532_v47, 16  ;;  %v1519_v12 = vshll.u32 %v6532_v47, 16  ;;  %v636_v40 = vshrl.u32 %v6542_v38, 16  ;;  %v643_v4 = vshll.u32 %v6506_v58, 16 }
  0xaa   :  { %v6582_v14 = vcombine.low %v129_v45, %v6547_v35  ;;  %v2142_v30 = vsel %vm2134_vm4, %v5697_v10, %v858_v20  ;;  %v1058_v63 = vrot.slane %v6559_v16, 1  ;;  %v6608_v10 = vcombine.low %v48_v44, %v6547_v35  ;;  %v6621_v19 = vld [vmem:[%s8251_s0 + $0xd4] ss:$0 sps:$4 sm:$0x11]  }
  0xab   :  { %v2123_v23 = vpop.permute.xlu0 %2122  ;;  %2094 = vrot.lane.b32.xlu1 %v2012_v50, %s5426_s7  ;;  %v52_v50 = vld [vmem:[%s8251_s0 + $0xcc] sm:$0xf]  ;;  %v634_v47 = vsel %vm466_vm1, %v629_v2, %v633_v51  ;;  %v640_v20 = vrot.slane %v638_v55, 1  ;;  %v1510_v58 = vrot.slane %v1508_v46, 1  ;;  %v1518_v44 = vrot.slane %v1516_v3, 1 }
  0xac   :  { %v6568_v60 = vsel %vm2329_vm7, %v2318_v24, %v2123_v23  ;;  %v6614_v13 = vcombine.low %v52_v50, %v6594_v28  ;;  %v1513_v24 = vrot.slane %v1511_v27, 2  ;;  %v4783_v23 = vcombine.low %v193_v52, %v6547_v35  ;;  %v6630_v35 = vld [vmem:[%s8251_s0 + $0xbc] ss:$0 sps:$4 sm:$0x33]   ;;  %v5195_v55 = vld [vmem:[%s8252_s1 + $0x20] ss:$12 sps:$4 sm:$0xff]  }
  0xad   :  { %8264 = vst [vmem:[#allocation3_spill] sm:$0xff] %v6568_v60  ;;  %875 = vrot.lane.b32.xlu0 %v622_v41, %s5424_s16  ;;  %4850 = vmatmul.mubr.msk.bf16.gmra.mrb[8].mxu1 %vm2394_vm8, %v6568_v60  ;;  %v1115_v15 = vpop.permute.xlu1 %1114  ;;  %v1057_v41 = vrot.slane %v6582_v14, 1  ;;  %v1056_v51 = vsel %vm1011_vm0, %v1054_v57, %v1055_v18  ;;  %v1506_v50 = vsel %vm1268_vm3, %v1497_v48, %v1505_v26  ;;  %v650_v2 = vshll.u32 %v6608_v10, 16  ;;  %v6648_v46 = vld [vmem:[%s8251_s0 + $0xc4] sm:$0xf] }
  0xae   :  { %2922 = vmatprep.mubr.bf16.mxu1 %v8256_v0  ;;  %v2207_v45 = vsel %vm2199_vm5, %v2142_v30, %v1115_v15  ;;  %v2018_v15 = vsel %vm1973_vm2, %v2016_v1, %v2017_v25  ;;  %v641_v57 = vor.u32 %v640_v20, %v636_v40  ;;  %v645_v48 = vrot.slane %v643_v4, 1  ;;  %v131_v1 = vld [vmem:[%s8251_s0 + $0xcc] sm:$0xe]  ;;  %v50_v25 = vld [vmem:[%s8251_s0 + $0xc0] sm:$0xf]  ;;  %4930 = vmatprep.subr.bf16.mxu1 %v5195_v55 }
  0xaf   :  { %v906_v37 = vpop.permute.xlu0 %905  ;;  %1134 = vrot.lane.b32.xlu1 %v1053_v39, %s5423_s5  ;;  %v674_v7 = vshll.u32 %v6614_v13, 16  ;;  %v1059_v30 = vsel %vm1011_vm0, %v1057_v41, %v1058_v63  ;;  %v1514_v26 = vor.u32 %v1513_v24, %v1510_v58  ;;  %v6654_v3 = vrot.slane %v4783_v23, 2  ;;  %v5198_v63 = vld [vmem:[%s8252_s1 + $0x38] ss:$12 sps:$4 sm:$0xff]   ;;  %4931 = vmatpush3.bf16.msra.mxu1 %v5195_v55 }
  0xb0   :  { %v648_v40 = vshrl.u32 %v6608_v10, 16  ;;  %v655_v4 = vshll.u32 %v6559_v16, 16  ;;  %v672_v20 = vshrl.u32 %v6614_v13, 16  ;;  %v1525_v41 = vshrl.u32 %v6582_v14, 16  ;;  %4932 = vmatprep.subr.bf16.mxu1 %v5198_v63 }
  0xb1   :  { %1837 = vrot.lane.b32.xlu0 %v1489_v56, %s5425_s23  ;;  %v1820_v39 = vpop.permute.xlu1 %1819  ;;  %v1521_v56 = vrot.slane %v1519_v12, 2  ;;  %v2190_v58 = vsel %vm2134_vm4, %v5717_v21, %v906_v37  ;;  %v676_v24 = vrot.slane %v674_v7, 1  ;;  %v1533_v23 = vshrl.u32 %v6630_v35, 16 }
  0xb2   :  { %v4721_v21 = vcombine.low %v131_v1, %v6594_v28  ;;  %v6683_v37 = vcombine.low %v50_v25, %v6648_v46  ;;  %v2020_v55 = vrot.slane %v6630_v35, 2  ;;  %v1527_v1 = vrot.slane %v1525_v41, 1  ;;  %v130_v25 = vld [vmem:[%s8251_s0 + $0xc0] sm:$0xe] }
  0xb3   :  { %v1163_v49 = vpop.permute.xlu0 %1162  ;;  %2096 = vrot.lane.b32.xlu1 %v2015_v22, %s5426_s7  ;;  %v2272_v22 = vsel %vm2264_vm6, %v2207_v45, %v1820_v39  ;;  %v1522_v52 = vor.u32 %v1521_v56, %v1518_v44  ;;  %v679_v39 = vshll.u32 %v6621_v19, 16  ;;  %v1528_v45 = vshll.u32 %v6582_v14, 16  ;;  %v6677_v56 = vld [vmem:[%s8251_s0 + $0xc8] ss:$0 sps:$4 sm:$0x11]   ;;  %4933 = vmatpush3.bf16.msra.mxu1 %v5198_v63 }
  0xb4   :  { %v1536_v44 = vshll.u32 %v6630_v35, 16  ;;  %v646_v14 = vsel %vm466_vm1, %v641_v57, %v645_v48  ;;  %v1535_v35 = vrot.slane %v1533_v23, 1  ;;  %v667_v41 = vshll.u32 %v6677_v56, 16 }
  0xb5   :  { %877 = vrot.lane.b32.xlu0 %v634_v47, %s5424_s16  ;;  %v2077_v18 = vpop.permute.xlu1 %2076  ;;  %v652_v47 = vrot.slane %v650_v2, 1  ;;  %v681_v7 = vrot.slane %v679_v39, 1  ;;  %v1064_v39 = vrot.slane %v6621_v19, 1  ;;  %v1559_v23 = vshrl.u32 %v4721_v21, 16 }
  0xb6   :  { %v6651_v27 = vsel %vm2329_vm7, %v2272_v22, %v2077_v18  ;;  %v657_v18 = vrot.slane %v655_v4, 1  ;;  %v1063_v4 = vrot.slane %v4721_v21, 1 }
  0xb7   :  { %v1868_v12 = vpop.permute.xlu0 %1867  ;;  %1136 = vrot.lane.b32.xlu1 %v1056_v51, %s5423_s5  ;;  %4827 = vmatmul.mubr.msk.bf16.gmra.mrb[12].mxu0 %vm2394_vm8, %v6651_v27  ;;  %v2255_v51 = vsel %vm2199_vm5, %v2190_v58, %v1163_v49  ;;  %v1523_v49 = vsel %vm1268_vm3, %v1514_v26, %v1522_v52  ;;  %v653_v48 = vor.u32 %v652_v47, %v648_v40  ;;  %v1538_v52 = vrot.slane %v1536_v44, 2  ;;  %v5202_v40 = vld [vmem:[%s8252_s1 + $0x50] ss:$12 sps:$4 sm:$0xff]   ;;  %v6719_v58 = vld [vmem:[%s8251_s0 + $0xe8] sm:$0xf] }
  0xb8   :  { %2692 = vmatprep.mubr.bf16.mxu0 %v8256_v0  ;;  %v2320_v2 = vsel %vm2264_vm6, %v2255_v51, %v1868_v12  ;;  %v677_v26 = vor.u32 %v676_v24, %v672_v20  ;;  %v1530_v12 = vrot.slane %v1528_v45, 2  ;;  %v662_v47 = vshll.u32 %v6683_v37, 16  ;;  %v195_v20 = vld [vmem:[%s8251_s0 + $0xcc] sm:$0xc]  ;;  %v56_v45 = vld [vmem:[%s8251_s0 + $0xe4] sm:$0xf]  ;;  %4934 = vmatprep.subr.bf16.mxu1 %v5202_v40 }
  0xb9   :  { %1839 = vrot.lane.b32.xlu0 %v1506_v50, %s5425_s23  ;;  %v860_v16 = vpop.permute.xlu1 %859  ;;  %v6688_v50 = vld [vmem:[%s8251_s0 + $0xd4] ss:$0 sps:$4 sm:$0x33]   ;;  %v1562_v44 = vshll.u32 %v4721_v21, 16  ;;  %v2021_v51 = vsel %vm1973_vm2, %v6654_v3, %v2020_v55  ;;  %v658_v63 = vsel %vm466_vm1, %v653_v48, %v657_v18  ;;  %v1539_v3 = vor.u32 %v1538_v52, %v1535_v35  ;;  %4935 = vmatpush3.bf16.msra.mxu1 %v5202_v40 }
  0xba   :  { %v2144_v19 = vsel %vm2134_vm4, %v5769_v9, %v860_v16  ;;  %v5205_v9 = vld [vmem:[%s8252_s1 + $0x68] ss:$12 sps:$4 sm:$0xff]   ;;  %v682_v16 = vsel %vm466_vm1, %v677_v26, %v681_v7  ;;  %v1531_v21 = vor.u32 %v1530_v12, %v1527_v1  ;;  %v664_v60 = vrot.slane %v662_v47, 1  ;;  %v6759_v40 = vld [vmem:[%s8251_s0 + $0xec] ss:$0 sps:$4 sm:$0x11]  }
  0xbb   :  { %v2125_v22 = vpop.permute.xlu0 %2124  ;;  %2098 = vrot.lane.b32.xlu1 %v2018_v15, %s5426_s7  ;;  %v6742_v55 = vld [vmem:[%s8251_s0 + $0xc8] ss:$0 sps:$4 sm:$0x33]   ;;  %v1561_v18 = vrot.slane %v1559_v23, 1  ;;  %v1564_v48 = vrot.slane %v1562_v44, 2  ;;  %v4785_v7 = vcombine.low %v195_v20, %v6594_v28  ;;  %v6750_v1 = vcombine.low %v56_v45, %v6719_v58  ;;  %4936 = vmatprep.subr.bf16.mxu1 %v5205_v9 }
  0xbc   :  { %v6695_v57 = vsel %vm2329_vm7, %v2320_v2, %v2125_v22  ;;  %v1570_v2 = vshll.u32 %v6688_v50, 16  ;;  %v6731_v22 = vcombine.low %v130_v25, %v6648_v46  ;;  %v669_v26 = vrot.slane %v667_v41, 1  ;;  %v194_v28 = vld [vmem:[%s8251_s0 + $0xc0] sm:$0xc] }
  0xbd   :  { %8265 = vst [vmem:[#allocation4_spill] sm:$0xff] %v6695_v57  ;;  %879 = vrot.lane.b32.xlu0 %v646_v14, %s5424_s16  ;;  %4851 = vmatmul.mubr.msk.bf16.gmra.mrb[12].mxu1 %vm2394_vm8, %v6695_v57  ;;  %v1117_v15 = vpop.permute.xlu1 %1116  ;;  %v1567_v14 = vshrl.u32 %v6688_v50, 16  ;;  %v660_v57 = vshrl.u32 %v6683_v37, 16  ;;  %v1540_v41 = vsel %vm1268_vm3, %v1531_v21, %v1539_v3  ;;  %v1550_v45 = vshrl.u32 %v6742_v55, 16 }
  0xbe   :  { %2932 = vmatprep.mubr.bf16.mxu1 %v8256_v0  ;;  %v2209_v25 = vsel %vm2199_vm5, %v2144_v19, %v1117_v15  ;;  %v1065_v0 = vsel %vm1011_vm0, %v1063_v4, %v1064_v39  ;;  %v54_v15 = vld [vmem:[%s8251_s0 + $0xd8] sm:$0xf]  ;;  %v1572_v35 = vrot.slane %v1570_v2, 2  ;;  %v1542_v52 = vshrl.u32 %v6731_v22, 16  ;;  %v6767_v4 = vld [vmem:[%s8251_s0 + $0xdc] sm:$0xf]  ;;  %4937 = vmatpush3.bf16.msra.mxu1 %v5205_v9 }
  0xbf   :  { %v6723_v24 = vpop.permute.xlu0 %907  ;;  %1138 = vrot.lane.b32.xlu1 %v1059_v30, %s5423_s5  ;;  %v1569_v12 = vrot.slane %v1567_v14, 1  ;;  %v1545_v20 = vshll.u32 %v6731_v22, 16  ;;  %v665_v23 = vor.u32 %v664_v60, %v660_v57  ;;  %v1061_v44 = vrot.slane %v6677_v56, 1  ;;  %v133_v14 = vld [vmem:[%s8251_s0 + $0xe4] sm:$0xe] }
  0xc0   :  { %v5209_v2 = vld [vmem:[%s8252_s1 + $0x80] ss:$12 sps:$4 sm:$0xff]   ;;  %v1565_v60 = vor.u32 %v1564_v48, %v1561_v18  ;;  %v1060_v56 = vrot.slane %v6731_v22, 1  ;;  %v2025_v57 = vrot.slane %v4785_v7, 2  ;;  %v2026_v3 = vrot.slane %v6688_v50, 2 }
  0xc1   :  { %1841 = vrot.lane.b32.xlu0 %v1523_v49, %s5425_s23  ;;  %v1822_v30 = vpop.permute.xlu1 %1821  ;;  %v1573_v21 = vor.u32 %v1572_v35, %v1569_v12  ;;  %v6791_v9 = vrot.slane %v1542_v52, 1  ;;  %4938 = vmatprep.subr.bf16.mxu1 %v5209_v2  ;;  %v2192_v22 = vsel %vm2134_vm4, %v5796_v31, %v6723_v24  ;;  %v1547_v50 = vrot.slane %v1545_v20, 2 }
  0xc2   :  { %v2274_v39 = vsel %vm2264_vm6, %v2209_v25, %v1822_v30  ;;  %v8266_v25 = vmov 0   ;;  %v1552_v48 = vrot.slane %v1550_v45, 1  ;;  %v4784_v7 = vcombine.low %v194_v28, %v6648_v46  ;;  %4939 = vmatpush3.bf16.msra.mxu1 %v5209_v2  ;;  %v6827_v45 = vld [vmem:[%s8251_s0 + $0xec] ss:$0 sps:$4 sm:$0x33]  }
  0xc3   :  { %v1165_v49 = vpop.permute.xlu0 %1164  ;;  %2100 = vrot.lane.b32.xlu1 %v2021_v51, %s5426_s7  ;;  %v1553_v51 = vshll.u32 %v6742_v55, 16  ;;  %v670_v35 = vsel %vm466_vm1, %v665_v23, %v669_v26  ;;  %v696_v46 = vshrl.u32 %v6750_v1, 16  ;;  %v1574_v26 = vsel %vm1268_vm3, %v1565_v60, %v1573_v21 }
  0xc4   :  { %v2257_v12 = vsel %vm2199_vm5, %v2192_v22, %v1165_v49  ;;  %v1062_v23 = vsel %vm1011_vm0, %v1060_v56, %v1061_v44  ;;  %v2023_v2 = vrot.slane %v6742_v55, 2  ;;  %v132_v22 = vld [vmem:[%s8251_s0 + $0xd8] sm:$0xe]  ;;  %v5216_v44 = vld [vmem:[%s8252_s1 + $0xb0] ss:$12 sps:$4 sm:$0xff]  }
  0xc5   :  { %881 = vrot.lane.b32.xlu0 %v658_v63, %s5424_s16  ;;  %v2079_v47 = vpop.permute.xlu1 %2078  ;;  %v698_v63 = vshll.u32 %v6750_v1, 16  ;;  %v1555_v52 = vrot.slane %v1553_v51, 2  ;;  %v2027_v51 = vsel %vm1973_vm2, %v2025_v57, %v2026_v3 }
  0xc6   :  { %v6775_v19 = vsel %vm2329_vm7, %v2274_v39, %v2079_v47  ;;  %v6795_v39 = vcombine.low %v54_v15, %v6767_v4  ;;  %v6808_v15 = vld [vmem:[%s8251_s0 + $0xe0] ss:$0 sps:$4 sm:$0x11]   ;;  %v703_v47 = vshll.u32 %v6759_v40, 16 }
  0xc7   :  { %v1870_v30 = vpop.permute.xlu0 %1869  ;;  %885 = vrot.lane.b32.xlu1 %v682_v16, %s5424_s16  ;;  %4828 = vmatmul.mubr.msk.bf16.gmra.mrb[16].mxu0 %vm2394_vm8, %v6775_v19  ;;  %v5212_v16 = vld [vmem:[%s8252_s1 + $0x98] ss:$12 sps:$4 sm:$0xff]   ;;  %v700_v28 = vrot.slane %v698_v63, 1  ;;  %v1556_v60 = vor.u32 %v1555_v52, %v1552_v48  ;;  %v691_v21 = vshll.u32 %v6808_v15, 16  ;;  %v6863_v52 = vcombine.low %v132_v22, %v6767_v4 }
  0xc8   :  { %2702 = vmatprep.mubr.bf16.mxu0 %v8266_v25  ;;  %v2322_v31 = vsel %vm2264_vm6, %v2257_v12, %v1870_v30  ;;  %4940 = vmatprep.subr.bf16.mxu1 %v5212_v16  ;;  %v686_v20 = vshll.u32 %v6795_v39, 16  ;;  %v1548_v30 = vor.u32 %v1547_v50, %v6791_v9  ;;  %v705_v63 = vrot.slane %v703_v47, 1  ;;  %v60_v50 = vld [vmem:[%s8251_s0 + $0xfc] sm:$0xf]  ;;  %v197_v47 = vld [vmem:[%s8251_s0 + $0xe4] sm:$0xc] }
  0xc9   :  { %1843 = vrot.lane.b32.xlu0 %v1540_v41, %s5425_s23  ;;  %v862_v18 = vpop.permute.xlu1 %861  ;;  %v6817_v41 = vcombine.low %v133_v14, %v6719_v58  ;;  %v2022_v14 = vrot.slane %v4784_v7, 2  ;;  %4941 = vmatpush3.bf16.msra.mxu1 %v5212_v16  ;;  %v701_v57 = vor.u32 %v700_v28, %v696_v46  ;;  %v684_v16 = vshrl.u32 %v6795_v39, 16 }
  0xca   :  { %v2146_v55 = vsel %vm2134_vm4, %v5851_v17, %v862_v18  ;;  %v688_v48 = vrot.slane %v686_v20, 1  ;;  %v1601_v7 = vshrl.u32 %v6827_v45, 16  ;;  %v1604_v12 = vshll.u32 %v6827_v45, 16  ;;  %v6858_v17 = vld [vmem:[%s8251_s0 + $0x100] sm:$0xf]  ;;  %4942 = vmatprep.subr.bf16.mxu1 %v5216_v44 }
  0xcb   :  { %v2127_v24 = vpop.permute.xlu0 %2126  ;;  %1142 = vrot.lane.b32.xlu1 %v1065_v0, %s5423_s5  ;;  %v1593_v3 = vshrl.u32 %v6817_v41, 16  ;;  %v1596_v9 = vshll.u32 %v6817_v41, 16  ;;  %v1069_v46 = vrot.slane %v6817_v41, 1  ;;  %v1070_v28 = vrot.slane %v6759_v40, 1 }
  0xcc   :  { %v6820_v49 = vsel %vm2329_vm7, %v2322_v31, %v2127_v24  ;;  %v1557_v24 = vsel %vm1268_vm3, %v1548_v30, %v1556_v60  ;;  %v706_v30 = vsel %vm466_vm1, %v701_v57, %v705_v63  ;;  %v689_v41 = vor.u32 %v688_v48, %v684_v16  ;;  %v6893_v63 = vld [vmem:[%s8251_s0 + $0xf4] sm:$0xf]  ;;  %v6904_v16 = vld [vmem:[%s8251_s0 + $0x104] ss:$0 sps:$4 sm:$0x11]  }
  0xcd   :  { %8267 = vst [vmem:[#allocation5_spill] sm:$0xff] %v6820_v49  ;;  %883 = vrot.lane.b32.xlu0 %v670_v35, %s5424_s16  ;;  %4852 = vmatmul.mubr.msk.bf16.gmra.mrb[16].mxu1 %vm2394_vm8, %v6820_v49  ;;  %v1119_v0 = vpop.permute.xlu1 %1118  ;;  %v2024_v35 = vsel %vm1973_vm2, %v2022_v14, %v2023_v2  ;;  %v1595_v14 = vrot.slane %v1593_v3, 1  ;;  %v1598_v2 = vrot.slane %v1596_v9, 2  ;;  %v1603_v60 = vrot.slane %v1601_v7, 1  ;;  %v58_v3 = vld [vmem:[%s8251_s0 + $0xf0] sm:$0xf] }
  0xce   :  { %2942 = vmatprep.mubr.bf16.mxu1 %v8266_v25  ;;  %v2211_v31 = vsel %vm2199_vm5, %v2146_v55, %v1119_v0  ;;  %4943 = vmatpush3.bf16.msra.mxu1 %v5216_v44  ;;  %v6879_v0 = vcombine.low %v60_v50, %v6858_v17  ;;  %v1606_v40 = vrot.slane %v1604_v12, 2  ;;  %v4787_v44 = vcombine.low %v197_v47, %v6719_v58 }
  0xcf   :  { %v910_v56 = vpop.permute.xlu0 %909  ;;  %1847 = vrot.lane.b32.xlu1 %v1574_v26, %s5425_s23  ;;  %v6875_v26 = vld [vmem:[%s8251_s0 + $0xe0] ss:$0 sps:$4 sm:$0x33]   ;;  %v1071_v9 = vsel %vm1011_vm0, %v1069_v46, %v1070_v28  ;;  %v1599_v7 = vor.u32 %v1598_v2, %v1595_v14  ;;  %v1066_v12 = vrot.slane %v6863_v52, 1  ;;  %v2032_v46 = vrot.slane %v6827_v45, 2 }
  0xd0   :  { %v1584_v58 = vshrl.u32 %v6875_v26, 16  ;;  %v1587_v50 = vshll.u32 %v6875_v26, 16  ;;  %v722_v47 = vshll.u32 %v6879_v0, 16  ;;  %v135_v28 = vld [vmem:[%s8251_s0 + $0xfc] sm:$0xe]  ;;  %v2031_v14 = vrot.slane %v4787_v44, 2 }
  0xd1   :  { %1140 = vrot.lane.b32.xlu0 %v1062_v23, %s5423_s5  ;;  %v1824_v18 = vpop.permute.xlu1 %1823  ;;  %v693_v23 = vrot.slane %v691_v21, 1  ;;  %v1579_v21 = vshll.u32 %v6863_v52, 16  ;;  %v196_v45 = vld [vmem:[%s8251_s0 + $0xd8] sm:$0xc] }
  0xd2   :  { %v2276_v22 = vsel %vm2264_vm6, %v2211_v31, %v1824_v18  ;;  %v1067_v18 = vrot.slane %v6808_v15, 1  ;;  %v724_v44 = vrot.slane %v722_v47, 1  ;;  %v4786_v47 = vcombine.low %v196_v45, %v6767_v4 }
  0xd3   :  { %v1167_v20 = vpop.permute.xlu0 %1166  ;;  %2104 = vrot.lane.b32.xlu1 %v2027_v51, %s5426_s7  ;;  %v1576_v51 = vshrl.u32 %v6863_v52, 16  ;;  %v694_v31 = vsel %vm466_vm1, %v689_v41, %v693_v23  ;;  %v2194_v52 = vsel %vm2134_vm4, %v5893_v43, %v910_v56  ;;  %v1581_v2 = vrot.slane %v1579_v21, 2  ;;  %v6932_v43 = vld [vmem:[%s8251_s0 + $0xf8] ss:$0 sps:$4 sm:$0x11]  }
  0xd4   :  { %v2259_v41 = vsel %vm2199_vm5, %v2194_v52, %v1167_v20  ;;  %v715_v52 = vshll.u32 %v6932_v43, 16 }
  0xd5   :  { %1845 = vrot.lane.b32.xlu0 %v1557_v24, %s5425_s23  ;;  %v2081_v55 = vpop.permute.xlu1 %2080  ;;  %v1607_v24 = vor.u32 %v1606_v40, %v1603_v60  ;;  %v1578_v23 = vrot.slane %v1576_v51, 1  ;;  %v1586_v60 = vrot.slane %v1584_v58, 1  ;;  %v1589_v40 = vrot.slane %v1587_v50, 2  ;;  %v6946_v58 = vld [vmem:[%s8251_s0 + $0x104] ss:$0 sps:$4 sm:$0x33]  }
  0xd6   :  { %v6896_v57 = vsel %vm2329_vm7, %v2276_v22, %v2081_v55  ;;  %v727_v22 = vshll.u32 %v6904_v16, 16  ;;  %v720_v55 = vshrl.u32 %v6879_v0, 16  ;;  %v4725_v51 = vcombine.low %v135_v28, %v6858_v17 }
  0xd7   :  { %v1872_v48 = vpop.permute.xlu0 %1871  ;;  %889 = vrot.lane.b32.xlu1 %v706_v30, %s5424_s16  ;;  %4829 = vmatmul.mubr.msk.bf16.gmra.mrb[20].mxu0 %vm2394_vm8, %v6896_v57  ;;  %v6919_v30 = vcombine.low %v58_v3, %v6893_v63  ;;  %v1608_v21 = vsel %vm1268_vm3, %v1599_v7, %v1607_v24  ;;  %v1068_v50 = vsel %vm1011_vm0, %v1066_v12, %v1067_v18  ;;  %v1638_v45 = vshll.u32 %v6946_v58, 16 }
  0xd8   :  { %2712 = vmatprep.mubr.bf16.mxu0 %v8266_v25  ;;  %v2324_v56 = vsel %vm2264_vm6, %v2259_v41, %v1872_v48  ;;  %v2033_v48 = vsel %vm1973_vm2, %v2031_v14, %v2032_v46  ;;  %v1582_v7 = vor.u32 %v1581_v2, %v1578_v23  ;;  %v1590_v24 = vor.u32 %v1589_v40, %v1586_v60  ;;  %v64_v46 = vld [vmem:[%s8251_s0 + $0x114] sm:$0xf] }
  0xd9   :  { %2102 = vrot.lane.b32.xlu0 %v2024_v35, %s5426_s7  ;;  %v864_v15 = vpop.permute.xlu1 %863  ;;  %v710_v3 = vshll.u32 %v6919_v30, 16  ;;  %v729_v28 = vrot.slane %v727_v22, 1  ;;  %v725_v12 = vor.u32 %v724_v44, %v720_v55  ;;  %v1627_v18 = vshrl.u32 %v4725_v51, 16  ;;  %v199_v55 = vld [vmem:[%s8251_s0 + $0xfc] sm:$0xc] }
  0xda   :  { %v2148_v41 = vsel %vm2134_vm4, %v5964_v53, %v864_v15  ;;  %v1630_v4 = vshll.u32 %v4725_v51, 16  ;;  %v708_v14 = vshrl.u32 %v6919_v30, 16  ;;  %v1635_v2 = vshrl.u32 %v6946_v58, 16  ;;  %v6971_v53 = vld [vmem:[%s8251_s0 + $0x118] sm:$0xf] }
  0xdb   :  { %v2129_v35 = vpop.permute.xlu0 %2128  ;;  %1146 = vrot.lane.b32.xlu1 %v1071_v9, %s5423_s5  ;;  %v712_v23 = vrot.slane %v710_v3, 1  ;;  %v2028_v60 = vrot.slane %v4786_v47, 2  ;;  %v2029_v40 = vrot.slane %v6875_v26, 2  ;;  %v1076_v22 = vrot.slane %v6904_v16, 1 }
  0xdc   :  { %v6939_v20 = vsel %vm2329_vm7, %v2324_v56, %v2129_v35  ;;  %v1075_v3 = vrot.slane %v4725_v51, 1  ;;  %v730_v16 = vsel %vm466_vm1, %v725_v12, %v729_v28  ;;  %v1629_v47 = vrot.slane %v1627_v18, 1  ;;  %v7003_v12 = vld [vmem:[%s8251_s0 + $0x11c] ss:$0 sps:$4 sm:$0x11]  }
  0xdd   :  { %8268 = vst [vmem:[#allocation6_spill] sm:$0xff] %v6939_v20  ;;  %887 = vrot.lane.b32.xlu0 %v694_v31, %s5424_s16  ;;  %4853 = vmatmul.mubr.msk.bf16.gmra.mrb[20].mxu1 %vm2394_vm8, %v6939_v20  ;;  %v1121_v9 = vpop.permute.xlu1 %1120  ;;  %v134_v31 = vld [vmem:[%s8251_s0 + $0xf0] sm:$0xe]  ;;  %v717_v20 = vrot.slane %v715_v52, 1  ;;  %v6992_v49 = vcombine.low %v64_v46, %v6971_v53  ;;  %v4789_v51 = vcombine.low %v199_v55, %v6858_v17 }
  0xde   :  { %2952 = vmatprep.mubr.bf16.mxu1 %v8266_v25  ;;  %v6977_v35 = vcombine.low %v134_v31, %v6893_v63  ;;  %v2213_v44 = vsel %vm2199_vm5, %v2148_v41, %v1121_v9  ;;  %v1632_v31 = vrot.slane %v1630_v4, 2  ;;  %v713_v9 = vor.u32 %v712_v23, %v708_v14  ;;  %v62_v14 = vld [vmem:[%s8251_s0 + $0x108] sm:$0xf]  ;;  %v7017_v23 = vld [vmem:[%s8251_s0 + $0x10c] sm:$0xf] }
  0xdf   :  { %v912_v56 = vpop.permute.xlu0 %911  ;;  %1851 = vrot.lane.b32.xlu1 %v1608_v21, %s5425_s23  ;;  %v1591_v21 = vsel %vm1268_vm3, %v1582_v7, %v1590_v24  ;;  %v1637_v41 = vrot.slane %v1635_v2, 1  ;;  %v1640_v7 = vrot.slane %v1638_v45, 2  ;;  %v2030_v59 = vsel %vm1973_vm2, %v2028_v60, %v2029_v40 }
  0xe0   :  { %v1613_v28 = vshll.u32 %v6977_v35, 16  ;;  %v1077_v17 = vsel %vm1011_vm0, %v1075_v3, %v1076_v22  ;;  %v1633_v45 = vor.u32 %v1632_v31, %v1629_v47  ;;  %v1073_v60 = vrot.slane %v6932_v43, 1  ;;  %v198_v3 = vld [vmem:[%s8251_s0 + $0xf0] sm:$0xc] }
  0xe1   :  { %1144 = vrot.lane.b32.xlu0 %v1068_v50, %s5423_s5  ;;  %v1826_v15 = vpop.permute.xlu1 %1825  ;;  %v6987_v50 = vld [vmem:[%s8251_s0 + $0xf8] ss:$0 sps:$4 sm:$0x33]   ;;  %v746_v40 = vshll.u32 %v6992_v49, 16  ;;  %v718_v22 = vsel %vm466_vm1, %v713_v9, %v717_v20  ;;  %v1641_v55 = vor.u32 %v1640_v7, %v1637_v41  ;;  %v137_v20 = vld [vmem:[%s8251_s0 + $0x114] sm:$0xe] }
  0xe2   :  { %v2278_v24 = vsel %vm2264_vm6, %v2213_v44, %v1826_v15  ;;  %v1618_v4 = vshrl.u32 %v6987_v50, 16  ;;  %v1621_v46 = vshll.u32 %v6987_v50, 16  ;;  %v1072_v15 = vrot.slane %v6977_v35, 1 }
  0xe3   :  { %v1169_v26 = vpop.permute.xlu0 %1168  ;;  %2108 = vrot.lane.b32.xlu1 %v2033_v48, %s5426_s7  ;;  %v1610_v48 = vshrl.u32 %v6977_v35, 16  ;;  %v2037_v44 = vrot.slane %v4789_v51, 2  ;;  %v1615_v47 = vrot.slane %v1613_v28, 2  ;;  %v751_v7 = vshll.u32 %v7003_v12, 16 }
  0xe4   :  { %v1620_v9 = vrot.slane %v1618_v4, 1  ;;  %v1623_v41 = vrot.slane %v1621_v46, 2  ;;  %v748_v51 = vrot.slane %v746_v40, 1  ;;  %v7054_v28 = vld [vmem:[%s8251_s0 + $0x11c] ss:$0 sps:$4 sm:$0x33]  }
  0xe5   :  { %1849 = vrot.lane.b32.xlu0 %v1591_v21, %s5425_s23  ;;  %v2083_v52 = vpop.permute.xlu1 %2082  ;;  %v2038_v21 = vrot.slane %v6946_v58, 2  ;;  %v1612_v35 = vrot.slane %v1610_v48, 1  ;;  %v7038_v58 = vcombine.low %v62_v14, %v7017_v23  ;;  %v1642_v48 = vsel %vm1268_vm3, %v1633_v45, %v1641_v55  ;;  %v7063_v4 = vld [vmem:[%s8251_s0 + $0x110] ss:$0 sps:$4 sm:$0x11]  }
  0xe6   :  { %v7006_v18 = vsel %vm2329_vm7, %v2278_v24, %v2083_v52  ;;  %v4788_v24 = vcombine.low %v198_v3, %v6893_v63  ;;  %v1074_v63 = vsel %vm1011_vm0, %v1072_v15, %v1073_v60  ;;  %v1624_v45 = vor.u32 %v1623_v41, %v1620_v9 }
  0xe7   :  { %v1874_v2 = vpop.permute.xlu0 %1873  ;;  %893 = vrot.lane.b32.xlu1 %v730_v16, %s5424_s16  ;;  %4830 = vmatmul.mubr.msk.bf16.gmra.mrb[24].mxu0 %vm2394_vm8, %v7006_v18  ;;  %v2196_v16 = vsel %vm2134_vm4, %v6009_v8, %v912_v56  ;;  %v734_v46 = vshll.u32 %v7038_v58, 16  ;;  %v2039_v14 = vsel %vm1973_vm2, %v2037_v44, %v2038_v21  ;;  %v753_v40 = vrot.slane %v751_v7, 1  ;;  %v7086_v7 = vld [vmem:[%s8251_s0 + $0x110] ss:$0 sps:$4 sm:$0x33]  }
  0xe8   :  { %2722 = vmatprep.mubr.bf16.mxu0 %v8266_v25  ;;  %v2261_v31 = vsel %vm2199_vm5, %v2196_v16, %v1169_v26  ;;  %v4727_v26 = vcombine.low %v137_v20, %v6971_v53  ;;  %v2034_v3 = vrot.slane %v4788_v24, 2  ;;  %v2035_v16 = vrot.slane %v6987_v50, 2 }
  0xe9   :  { %2106 = vrot.lane.b32.xlu0 %v2030_v59, %s5426_s7  ;;  %v866_v43 = vpop.permute.xlu1 %865  ;;  %v2326_v8 = vsel %vm2264_vm6, %v2261_v31, %v1874_v2  ;;  %v744_v59 = vshrl.u32 %v6992_v49, 16  ;;  %v1616_v2 = vor.u32 %v1615_v47, %v1612_v35  ;;  %v1669_v35 = vshrl.u32 %v7054_v28, 16 }
  0xea   :  { %v2150_v15 = vsel %vm2134_vm4, %v6086_v32, %v866_v43  ;;  %v1661_v44 = vshrl.u32 %v4727_v26, 16  ;;  %v1664_v21 = vshll.u32 %v4727_v26, 16  ;;  %v1672_v47 = vshll.u32 %v7054_v28, 16 }
  0xeb   :  { %v2131_v56 = vpop.permute.xlu0 %2130  ;;  %1150 = vrot.lane.b32.xlu1 %v1077_v17, %s5423_s5  ;;  %v749_v55 = vor.u32 %v748_v51, %v744_v59  ;;  %v732_v31 = vshrl.u32 %v7038_v58, 16  ;;  %v736_v9 = vrot.slane %v734_v46, 1  ;;  %v739_v32 = vshll.u32 %v7063_v4, 16 }
  0xec   :  { %v7047_v52 = vsel %vm2329_vm7, %v2326_v8, %v2131_v56  ;;  %v1625_v50 = vsel %vm1268_vm3, %v1616_v2, %v1624_v45  ;;  %v2036_v59 = vsel %vm1973_vm2, %v2034_v3, %v2035_v16  ;;  %v1081_v51 = vrot.slane %v4727_v26, 1 }
  0xed   :  { %891 = vrot.lane.b32.xlu0 %v718_v22, %s5424_s16  ;;  %4854 = vmatmul.mubr.msk.bf16.gmra.mrb[24].mxu1 %vm2394_vm8, %v7047_v52  ;;  %v1123_v17 = vpop.permute.xlu1 %1122  ;;  %v136_v22 = vld [vmem:[%s8251_s0 + $0x108] sm:$0xe]  ;;  %v754_v56 = vsel %vm466_vm1, %v749_v55, %v753_v40  ;;  %v1082_v24 = vrot.slane %v7003_v12, 1  ;;  %v1674_v46 = vrot.slane %v1672_v47, 2  ;;  %v1652_v55 = vshrl.u32 %v7086_v7, 16 }
  0xee   :  { %2962 = vmatprep.mubr.bf16.mxu1 %v8266_v25  ;;  %v4726_v43 = vcombine.low %v136_v22, %v7017_v23  ;;  %v2215_v41 = vsel %vm2199_vm5, %v2150_v15, %v1123_v17  ;;  %v1671_v17 = vrot.slane %v1669_v35, 1  ;;  %v737_v22 = vor.u32 %v736_v9, %v732_v31 }
  0xef   :  { %v914_v60 = vpop.permute.xlu0 %913  ;;  %1855 = vrot.lane.b32.xlu1 %v1642_v48, %s5425_s23  ;;  %v1663_v48 = vrot.slane %v1661_v44, 1  ;;  %v741_v15 = vrot.slane %v739_v32, 1  ;;  %v1655_v3 = vshll.u32 %v7086_v7, 16  ;;  %v1083_v44 = vsel %vm1011_vm0, %v1081_v51, %v1082_v24 }
  0xf0   :  { %v1644_v40 = vshrl.u32 %v4726_v43, 16  ;;  %v1647_v12 = vshll.u32 %v4726_v43, 16  ;;  %v1675_v35 = vor.u32 %v1674_v46, %v1671_v17  ;;  %v1079_v47 = vrot.slane %v7063_v4, 1 }
  0xf1   :  { %1148 = vrot.lane.b32.xlu0 %v1074_v63, %s5423_s5  ;;  %v1828_v20 = vpop.permute.xlu1 %1827  ;;  %v1666_v63 = vrot.slane %v1664_v21, 2  ;;  %v2198_v31 = vsel %vm2134_vm4, %v6133_v36, %v914_v60  ;;  %v742_v32 = vsel %vm466_vm1, %v737_v22, %v741_v15  ;;  %v1654_v24 = vrot.slane %v1652_v55, 1  ;;  %v200_v36 = vld [vmem:[%s8251_s0 + $0x108] sm:$0xc] }
  0xf2   :  { %v2280_v2 = vsel %vm2264_vm6, %v2215_v41, %v1828_v20  ;;  %v1078_v41 = vrot.slane %v4726_v43, 1  ;;  %v1649_v51 = vrot.slane %v1647_v12, 2  ;;  %v2041_v12 = vrot.slane %v7086_v7, 2 }
  0xf3   :  { %v1171_v8 = vpop.permute.xlu0 %1170  ;;  %2112 = vrot.lane.b32.xlu1 %v2039_v14, %s5426_s7  ;;  %v201_v14 = vld [vmem:[%s8251_s0 + $0x114] sm:$0xc]  ;;  %v1667_v21 = vor.u32 %v1666_v63, %v1663_v48  ;;  %v1657_v48 = vrot.slane %v1655_v3, 2 }
  0xf4   :  { %v4791_v20 = vcombine.low %v201_v14, %v6971_v53  ;;  %v1080_v17 = vsel %vm1011_vm0, %v1078_v41, %v1079_v47 }
  0xf5   :  { %1853 = vrot.lane.b32.xlu0 %v1625_v50, %s5425_s23  ;;  %v2085_v45 = vpop.permute.xlu1 %2084  ;;  %v1646_v50 = vrot.slane %v1644_v40, 1  ;;  %v1676_v43 = vsel %vm1268_vm3, %v1667_v21, %v1675_v35 }
  0xf6   :  { %v7098_v26 = vsel %vm2329_vm7, %v2280_v2, %v2085_v45  ;;  %v1658_v2 = vor.u32 %v1657_v48, %v1654_v24  ;;  %v4790_v45 = vcombine.low %v200_v36, %v7017_v23 }
  0xf7   :  { %v1876_v16 = vpop.permute.xlu0 %1875  ;;  %897 = vrot.lane.b32.xlu1 %v754_v56, %s5424_s16  ;;  %4831 = vmatmul.mubr.msk.bf16.gmra.mrb[28].mxu0 %vm2394_vm8, %v7098_v26  ;;  %v2263_v56 = vsel %vm2199_vm5, %v2198_v31, %v1171_v8  ;;  %v2044_v8 = vrot.slane %v7054_v28, 2  ;;  %v1650_v46 = vor.u32 %v1649_v51, %v1646_v50 }
  0xf8   :  { %2732 = vmatprep.mubr.bf16.mxu0 %v8266_v25  ;;  %v2328_v4 = vsel %vm2264_vm6, %v2263_v56, %v1876_v16 }
  0xf9   :  { %2110 = vrot.lane.b32.xlu0 %v2036_v59, %s5426_s7  ;;  %v1125_v9 = vpop.permute.xlu1 %1124  ;;  %v2043_v59 = vrot.slane %v4791_v20, 2  ;;  %v1659_v40 = vsel %vm1268_vm3, %v1650_v46, %v1658_v2 }
  0xfb   :  { %v2133_v53 = vpop.permute.xlu0 %2132  ;;  %1154 = vrot.lane.b32.xlu1 %v1083_v44, %s5423_s5  ;;  %v2045_v15 = vsel %vm1973_vm2, %v2043_v59, %v2044_v8 }
  0xfc   :  { %v7120_v60 = vsel %vm2329_vm7, %v2328_v4, %v2133_v53 }
  0xfd   :  { %895 = vrot.lane.b32.xlu0 %v742_v32, %s5424_s16  ;;  %4855 = vmatmul.mubr.msk.bf16.gmra.mrb[28].mxu1 %vm2394_vm8, %v7120_v60  ;;  %v2087_v63 = vpop.permute.xlu1 %2086 }
  0xfe   :  { %4944 = vmatprep.mubr.msk.bf16.mxu1 %vm2394_vm8, %v6301_v34  ;;  %v2040_v34 = vrot.slane %v4790_v45, 2 }
  0xff   :  { %v868_v22 = vpop.permute.xlu0 %867  ;;  %1859 = vrot.lane.b32.xlu1 %v1676_v43, %s5425_s23 }
 0x100   :  { %v2152_v28 = vsel %vm2134_vm4, %v6214_v61, %v868_v22  ;;  %v2042_v7 = vsel %vm1973_vm2, %v2040_v34, %v2041_v12 }
 0x101   :  { %1152 = vrot.lane.b32.xlu0 %v1080_v17, %s5423_s5  ;;  %v1127_v14 = vpop.permute.xlu1 %1126  ;;  %v2217_v55 = vsel %vm2199_vm5, %v2152_v28, %v1125_v9 }
 0x103   :  { %v1830_v3 = vpop.permute.xlu0 %1829  ;;  %2116 = vrot.lane.b32.xlu1 %v2045_v15, %s5426_s7 }
 0x104   :  { %v2282_v23 = vsel %vm2264_vm6, %v2217_v55, %v1830_v3 }
 0x105   :  { %1857 = vrot.lane.b32.xlu0 %v1659_v40, %s5425_s23  ;;  %4945 = vmatmul.mubr.msk.bf16.vlgmr.msra.gmra.mrb[32].mxu1 %vm2394_vm8, %v6400_v6  ;;  %v2347_v61 = vsel %vm2329_vm7, %v2282_v23, %v2087_v63  ;;  %v2089_v16 = vpop.permute.xlu1 %2088 }
 0x106   :  { %4832 = vmatmul.mubr.msk.bf16.gmra.mrb[32].mxu0 %vm2394_vm8, %v2347_v61  ;;  %4948 = vmatprep.mubr.msk.bf16.mxu1 %vm2394_vm8, %v6511_v11 }
 0x107   :  { %v870_v44 = vpop.permute.xlu0 %869  ;;  %2742 = vmatprep.mubr.bf16.mxu0 %v8266_v25 }
 0x108   :  { %v2154_v21 = vsel %vm2134_vm4, %v6269_v62, %v870_v44 }
 0x109   :  { %2114 = vrot.lane.b32.xlu0 %v2042_v7, %s5426_s7  ;;  %v1129_v35 = vpop.permute.xlu1 %1128  ;;  %v2219_v6 = vsel %vm2199_vm5, %v2154_v21, %v1127_v14 }
 0x10b   :  { %v1832_v47 = vpop.permute.xlu0 %1831 }
 0x10c   :  { %v2284_v20 = vsel %vm2264_vm6, %v2219_v6, %v1832_v47 }
 0x10d   :  { %4949 = vmatmul.mubr.msk.bf16.gmra.mrb[36].mxu1 %vm2394_vm8, %v6651_v27  ;;  %v2349_v11 = vsel %vm2329_vm7, %v2284_v20, %v2089_v16  ;;  %v2091_v31 = vpop.permute.xlu1 %2090 }
 0x10e   :  { %4833 = vmatmul.mubr.msk.bf16.gmra.mrb[36].mxu0 %vm2394_vm8, %v2349_v11  ;;  %4952 = vmatprep.mubr.msk.bf16.mxu1 %vm2394_vm8, %v6775_v19 }
 0x10f   :  { %v872_v62 = vpop.permute.xlu0 %871  ;;  %2752 = vmatprep.mubr.bf16.mxu0 %v8266_v25 }
 0x110   :  { %v2156_v9 = vsel %vm2134_vm4, %v6296_v33, %v872_v62 }
 0x111   :  { %v1131_v32 = vpop.permute.xlu1 %1130  ;;  %v2221_v41 = vsel %vm2199_vm5, %v2156_v9, %v1129_v35 }
 0x113   :  { %v1834_v50 = vpop.permute.xlu0 %1833 }
 0x114   :  { %v2286_v27 = vsel %vm2264_vm6, %v2221_v41, %v1834_v50 }
 0x115   :  { %4953 = vmatmul.mubr.msk.bf16.gmra.mrb[40].mxu1 %vm2394_vm8, %v6896_v57  ;;  %v2351_v56 = vsel %vm2329_vm7, %v2286_v27, %v2091_v31  ;;  %v2093_v51 = vpop.permute.xlu1 %2092 }
 0x116   :  { %4834 = vmatmul.mubr.msk.bf16.gmra.mrb[40].mxu0 %vm2394_vm8, %v2351_v56  ;;  %4956 = vmatprep.mubr.msk.bf16.mxu1 %vm2394_vm8, %v7006_v18 }
 0x117   :  { %v874_v19 = vpop.permute.xlu0 %873  ;;  %2762 = vmatprep.mubr.bf16.mxu0 %v8266_v25 }
 0x118   :  { %v2158_v33 = vsel %vm2134_vm4, %v6375_v29, %v874_v19 }
 0x119   :  { %v1133_v24 = vpop.permute.xlu1 %1132  ;;  %v2223_v48 = vsel %vm2199_vm5, %v2158_v33, %v1131_v32 }
 0x11b   :  { %v1836_v4 = vpop.permute.xlu0 %1835 }
 0x11c   :  { %v2288_v57 = vsel %vm2264_vm6, %v2223_v48, %v1836_v4 }
 0x11d   :  { %4957 = vmatmul.mubr.msk.bf16.gmra.mrb[44].mxu1 %vm2394_vm8, %v7098_v26  ;;  %v2353_v53 = vsel %vm2329_vm7, %v2288_v57, %v2093_v51  ;;  %v2095_v36 = vpop.permute.xlu1 %2094 }
 0x11e   :  { %4835 = vmatmul.mubr.msk.bf16.gmra.mrb[44].mxu0 %vm2394_vm8, %v2353_v53  ;;  %4960 = vmatprep.mubr.msk.bf16.mxu1 %vm2394_vm8, %v2347_v61 }
 0x11f   :  { %v876_v18 = vpop.permute.xlu0 %875  ;;  %2772 = vmatprep.mubr.bf16.mxu0 %v8266_v25 }
 0x120   :  { %v2160_v29 = vsel %vm2134_vm4, %v6426_v54, %v876_v18 }
 0x121   :  { %v1135_v43 = vpop.permute.xlu1 %1134  ;;  %v2225_v59 = vsel %vm2199_vm5, %v2160_v29, %v1133_v24 }
 0x123   :  { %v1838_v8 = vpop.permute.xlu0 %1837 }
 0x124   :  { %v2290_v63 = vsel %vm2264_vm6, %v2225_v59, %v1838_v8 }
 0x125   :  { %4961 = vmatmul.mubr.msk.bf16.gmra.mrb[48].mxu1 %vm2394_vm8, %v2349_v11  ;;  %v2355_v26 = vsel %vm2329_vm7, %v2290_v63, %v2095_v36  ;;  %v2097_v17 = vpop.permute.xlu1 %2096 }
 0x126   :  { %4836 = vmatmul.mubr.msk.bf16.gmra.mrb[48].mxu0 %vm2394_vm8, %v2355_v26  ;;  %4964 = vmatprep.mubr.msk.bf16.mxu1 %vm2394_vm8, %v2351_v56 }
 0x127   :  { %v878_v46 = vpop.permute.xlu0 %877  ;;  %2782 = vmatprep.mubr.bf16.mxu0 %v8266_v25 }
 0x128   :  { %v2162_v54 = vsel %vm2134_vm4, %v6476_v5, %v878_v46 }
 0x129   :  { %v1137_v2 = vpop.permute.xlu1 %1136  ;;  %v2227_v45 = vsel %vm2199_vm5, %v2162_v54, %v1135_v43 }
 0x12b   :  { %v1840_v22 = vpop.permute.xlu0 %1839 }
 0x12c   :  { %v2292_v28 = vsel %vm2264_vm6, %v2227_v45, %v1840_v22  ;;  %v7261_v45 = vld [vmem:[%s8253_s3 + $0x20] sm:$0xff] }
 0x12d   :  { %4965 = vmatmul.mubr.msk.bf16.gmra.mrb[52].mxu1 %vm2394_vm8, %v2353_v53  ;;  %v2357_v15 = vsel %vm2329_vm7, %v2292_v28, %v2097_v17  ;;  %v2099_v14 = vpop.permute.xlu1 %2098  ;;  %v7244_v17 = vld [vmem:[%s8253_s3] sm:$0xff] }
 0x12e   :  { %4837 = vmatmul.mubr.msk.bf16.gmra.mrb[52].mxu0 %vm2394_vm8, %v2357_v15  ;;  %4968 = vmatprep.mubr.msk.bf16.mxu1 %vm2394_vm8, %v2355_v26 }
 0x12f   :  { %v880_v40 = vpop.permute.xlu0 %879  ;;  %2792 = vmatprep.mubr.bf16.mxu0 %v8266_v25 }
 0x130   :  { %v2164_v5 = vsel %vm2134_vm4, %v6542_v38, %v880_v40 }
 0x131   :  { %v1139_v34 = vpop.permute.xlu1 %1138  ;;  %v2229_v12 = vsel %vm2199_vm5, %v2164_v5, %v1137_v2  ;;  %v7256_v2 = vld [vmem:[%s8253_s3 + $0x8] sm:$0xff] }
 0x133   :  { %v1842_v55 = vpop.permute.xlu0 %1841 }
 0x134   :  { %v2294_v3 = vsel %vm2264_vm6, %v2229_v12, %v1842_v55 }
 0x135   :  { %4969 = vmatmul.mubr.msk.bf16.gmra.mrb[56].mxu1 %vm2394_vm8, %v2357_v15  ;;  %v2359_v23 = vsel %vm2329_vm7, %v2294_v3, %v2099_v14  ;;  %v2101_v61 = vpop.permute.xlu1 %2100 }
 0x136   :  { %4838 = vmatmul.mubr.msk.bf16.gmra.mrb[56].mxu0 %vm2394_vm8, %v2359_v23  ;;  %4972 = vmatprep.mubr.msk.bf16.mxu1 %vm2394_vm8, %v2359_v23 }
 0x137   :  { %v882_v16 = vpop.permute.xlu0 %881  ;;  %2802 = vmatprep.mubr.bf16.mxu0 %v8266_v25 }
 0x138   :  { %v2166_v38 = vsel %vm2134_vm4, %v6608_v10, %v882_v16 }
 0x139   :  { %v886_v7 = vpop.permute.xlu1 %885  ;;  %v2231_v44 = vsel %vm2199_vm5, %v2166_v38, %v1139_v34 }
 0x13a   :  { %v2170_v10 = vsel %vm2134_vm4, %v6614_v13, %v886_v7 }
 0x13b   :  { %v1844_v21 = vpop.permute.xlu0 %1843 }
 0x13c   :  { %v2296_v35 = vsel %vm2264_vm6, %v2231_v44, %v1844_v21 }
 0x13d   :  { %v2361_v6 = vsel %vm2329_vm7, %v2296_v35, %v2101_v61  ;;  %v1143_v47 = vpop.permute.xlu1 %1142 }
 0x13e   :  { %4839 = vmatmul.mubr.msk.bf16.gmra.mrb[60].mxu0 %vm2394_vm8, %v2361_v6  ;;  %4973 = vmatmul.mubr.msk.bf16.gmra.mrb[60].mxu1 %vm2394_vm8, %v2361_v6  ;;  %v2235_v32 = vsel %vm2199_vm5, %v2170_v10, %v1143_v47 }
 0x13f   :  { %v884_v20 = vpop.permute.xlu0 %883  ;;  %2812 = vmatprep.mubr.bf16.mxu0 %v8266_v25 }
 0x140   :  { %v2168_v41 = vsel %vm2134_vm4, %v6683_v37, %v884_v20 }
 0x141   :  { %v1848_v11 = vpop.permute.xlu1 %1847 }
 0x142   :  { %v2300_v19 = vsel %vm2264_vm6, %v2235_v32, %v1848_v11 }
 0x143   :  { %v1141_v31 = vpop.permute.xlu0 %1140 }
 0x144   :  { %v2233_v27 = vsel %vm2199_vm5, %v2168_v41, %v1141_v31  ;;  %v4134_v31 = vlaneseq }
 0x145   :  { %v2105_v62 = vpop.permute.xlu1 %2104 }
 0x146   :  { %v2365_v24 = vsel %vm2329_vm7, %v2300_v19, %v2105_v62 }
 0x147   :  { %v1846_v9 = vpop.permute.xlu0 %1845 }
 0x148   :  { %v2298_v56 = vsel %vm2264_vm6, %v2233_v27, %v1846_v9 }
 0x149   :  { %v890_v50 = vpop.permute.xlu1 %889 }
 0x14a   :  { %v2174_v53 = vsel %vm2134_vm4, %v6750_v1, %v890_v50  ;;  %v7249_v1 = vld [vmem:[%s8253_s3 + $0x18] sm:$0xff] }
 0x14b   :  { %v2103_v51 = vpop.permute.xlu0 %2102 }
 0x14c   :  { %v2363_v33 = vsel %vm2329_vm7, %v2298_v56, %v2103_v51 }
 0x14d   :  { %4840 = vmatmul.mubr.msk.bf16.gmra.mrb[64].mxu0 %vm2394_vm8, %v2363_v33  ;;  %4976 = vmatprep.mubr.msk.bf16.mxu1 %vm2394_vm8, %v2363_v33  ;;  %v1147_v13 = vpop.permute.xlu1 %1146 }
 0x14e   :  { %4977 = vmatmul.mubr.msk.bf16.gmra.mrb[64].mxu1 %vm2394_vm8, %v2365_v24  ;;  %2822 = vmatprep.mubr.bf16.mxu0 %v8266_v25  ;;  %v2239_v18 = vsel %vm2199_vm5, %v2174_v53, %v1147_v13 }
 0x14f   :  { %v888_v37 = vpop.permute.xlu0 %887 }
 0x150   :  { %v2172_v29 = vsel %vm2134_vm4, %v6795_v39, %v888_v37 }
 0x151   :  { %v1852_v48 = vpop.permute.xlu1 %1851 }
 0x152   :  { %v2304_v46 = vsel %vm2264_vm6, %v2239_v18, %v1852_v48 }
 0x153   :  { %v1145_v4 = vpop.permute.xlu0 %1144 }
 0x154   :  { %v2237_v59 = vsel %vm2199_vm5, %v2172_v29, %v1145_v4 }
 0x155   :  { %4841 = vmatmul.mubr.msk.bf16.gmra.mrb[68].mxu0 %vm2394_vm8, %v2365_v24  ;;  %v2109_v57 = vpop.permute.xlu1 %2108  ;;  %v7280_v24 = vshrl.u32 %v4134_v31, 7 }
 0x156   :  { %2832 = vmatprep.mubr.bf16.mxu0 %v8266_v25  ;;  %v2369_v22 = vsel %vm2329_vm7, %v2304_v46, %v2109_v57 }
 0x157   :  { %v1850_v36 = vpop.permute.xlu0 %1849 }
 0x158   :  { %v2302_v8 = vsel %vm2264_vm6, %v2237_v59, %v1850_v36 }
 0x159   :  { %v894_v43 = vpop.permute.xlu1 %893 }
 0x15a   :  { %v2178_v50 = vsel %vm2134_vm4, %v6879_v0, %v894_v43 }
 0x15b   :  { %v2107_v63 = vpop.permute.xlu0 %2106  ;;  %v2654_v26 = vpop.f32.mrb[0].mxu0 }
 0x15c   :  { %v2367_v39 = vsel %vm2329_vm7, %v2302_v8, %v2107_v63  ;;  %v2656_v54 = vpop.f32.mrb[1].mxu0  ;;  %v3268_v14 = vadd.f32 %v7244_v17, %v2654_v26  ;;  %v4136_v63 = vsub.s32 0, %v7280_v24 }
 0x15d   :  { %4842 = vmatmul.mubr.msk.bf16.gmra.mrb[72].mxu0 %vm2394_vm8, %v2367_v39  ;;  %4980 = vmatprep.mubr.msk.bf16.mxu1 %vm2394_vm8, %v2367_v39  ;;  %v2658_v28 = vpop.f32.mrb[2].mxu0  ;;  %v1151_v15 = vpop.permute.xlu1 %1150  ;;  %v3269_v34 = vadd.f32 %v7256_v2, %v2656_v54 }
 0x15e   :  { %v3271_v40 = vadd.f32 %v7249_v1, %v2658_v28  ;;  %4981 = vmatmul.mubr.msk.bf16.gmra.mrb[68].mxu1 %vm2394_vm8, %v2369_v22  ;;  %v2660_v5 = vpop.f32.mrb[3].mxu0  ;;  %2842 = vmatprep.mubr.bf16.mxu0 %v8266_v25  ;;  %v2243_v37 = vsel %vm2199_vm5, %v2178_v50, %v1151_v15 }
 0x15f   :  { %v3272_v12 = vadd.f32 %v7261_v45, %v2660_v5  ;;  %v892_v55 = vpop.permute.xlu0 %891 }
 0x160   :  { %v3460_v3 = vmax.f32 %v3268_v14, %v3271_v40  ;;  %v2894_v23 = vpop.f32.mrb[0].mxu1  ;;  %v2176_v48 = vsel %vm2134_vm4, %v6919_v30, %v892_v55 }
 0x161   :  { %v3467_v61 = vmax.f32 %v3269_v34, %v3272_v12  ;;  %v2896_v16 = vpop.f32.mrb[1].mxu1  ;;  %v1856_v38 = vpop.permute.xlu1 %1855  ;;  %v3412_v35 = vadd.f32 %v7244_v17, %v2894_v23  ;;  %v7298_v34 = vld [vmem:[%s8254_s2] sm:$0x7]  ;;  %v4140_v12 = vsub.s32 1, %v7280_v24 }
 0x162   :  { %v3461_v7 = vrot.slane %v3460_v3, 4  ;;  %v2898_v44 = vpop.f32.mrb[2].mxu1  ;;  %v3413_v62 = vadd.f32 %v7256_v2, %v2896_v16  ;;  %v2308_v46 = vsel %vm2264_vm6, %v2243_v37, %v1856_v38 }
 0x163   :  { %v3468_v21 = vrot.slane %v3467_v61, 4  ;;  %v3415_v6 = vadd.f32 %v7249_v1, %v2898_v44  ;;  %v2900_v47 = vpop.f32.mrb[3].mxu1  ;;  %v1149_v20 = vpop.permute.xlu0 %1148  ;;  %v7309_v31 = vrot.slane %v7298_v34, %v4140_v12 }
 0x164   :  { %v3462_v11 = vmax.f32 %v3460_v3, %v3461_v7  ;;  %v3416_v10 = vadd.f32 %v7261_v45, %v2900_v47  ;;  %v2241_v0 = vsel %vm2199_vm5, %v2176_v48, %v1149_v20 }
 0x165   :  { %v3469_v9 = vmax.f32 %v3467_v61, %v3468_v21  ;;  %v3964_v32 = vmax.f32 %v3412_v35, %v3415_v6  ;;  %4843 = vmatmul.mubr.msk.bf16.gmra.mrb[76].mxu0 %vm2394_vm8, %v2369_v22  ;;  %v2113_v41 = vpop.permute.xlu1 %2112  ;;  %v7306_v21 = vrot.slane %v7298_v34, %v4136_v63 }
 0x166   :  { %v3463_v27 = vrot.slane %v3462_v11, 2  ;;  %v3971_v56 = vmax.f32 %v3413_v62, %v3416_v10  ;;  %2852 = vmatprep.mubr.bf16.mxu0 %v8266_v25  ;;  %v2373_v22 = vsel %vm2329_vm7, %v2308_v46, %v2113_v41 }
 0x167   :  { %v3470_v51 = vrot.slane %v3469_v9, 2  ;;  %v3965_v19 = vrot.slane %v3964_v32, 4  ;;  %v1854_v33 = vpop.permute.xlu0 %1853 }
 0x168   :  { %v3972_v13 = vrot.slane %v3971_v56, 4  ;;  %v3464_v53 = vmax.f32 %v3462_v11, %v3463_v27  ;;  %v2306_v43 = vsel %vm2264_vm6, %v2241_v0, %v1854_v33 }
 0x169   :  { %v3966_v4 = vmax.f32 %v3964_v32, %v3965_v19  ;;  %v898_v57 = vpop.permute.xlu1 %897  ;;  %v3471_v29 = vmax.f32 %v3469_v9, %v3470_v51 }
 0x16a   :  { %v3973_v36 = vmax.f32 %v3971_v56, %v3972_v13  ;;  %v2664_v18 = vpop.f32.mrb[4].mxu0  ;;  %v3465_v5 = vrot.slane %v3464_v53, 1  ;;  %v2182_v62 = vsel %vm2134_vm4, %v6992_v49, %v898_v57 }
 0x16b   :  { %v2111_v59 = vpop.permute.xlu0 %2110  ;;  %v2666_v8 = vpop.f32.mrb[5].mxu0  ;;  %v3967_v26 = vrot.slane %v3966_v4, 2  ;;  %v3274_v28 = vadd.f32 %v7244_v17, %v2664_v18  ;;  %v3472_v23 = vrot.slane %v3471_v29, 1 }
 0x16c   :  { %v2371_v39 = vsel %vm2329_vm7, %v2306_v43, %v2111_v59  ;;  %v2668_v30 = vpop.f32.mrb[6].mxu0  ;;  %v3974_v54 = vrot.slane %v3973_v36, 2  ;;  %v3275_v55 = vadd.f32 %v7256_v2, %v2666_v8  ;;  %v3466_v11 = vmax.f32 %v3464_v53, %v3465_v5 }
 0x16d   :  { %4844 = vmatmul.mubr.msk.bf16.gmra.mrb[80].mxu0 %vm2394_vm8, %v2371_v39  ;;  %4984 = vmatprep.mubr.msk.bf16.mxu1 %vm2394_vm8, %v2371_v39  ;;  %v3277_v15 = vadd.f32 %v7249_v1, %v2668_v30  ;;  %v1155_v14 = vpop.permute.xlu1 %1154  ;;  %v2670_v40 = vpop.f32.mrb[7].mxu0  ;;  %v3968_v38 = vmax.f32 %v3966_v4, %v3967_v26  ;;  %v3473_v32 = vmax.f32 %v3471_v29, %v3472_v23 }
 0x16e   :  { %4985 = vmatmul.mubr.msk.bf16.gmra.mrb[72].mxu1 %vm2394_vm8, %v2373_v22  ;;  %v3278_v3 = vadd.f32 %v7261_v45, %v2670_v40  ;;  %2862 = vmatprep.mubr.bf16.mxu0 %v8266_v25  ;;  %v3975_v35 = vmax.f32 %v3973_v36, %v3974_v54  ;;  %v2247_v49 = vsel %vm2199_vm5, %v2182_v62, %v1155_v14 }
 0x16f   :  { %v3481_v61 = vmax.f32 %v3274_v28, %v3277_v15  ;;  %v896_v16 = vpop.permute.xlu0 %895  ;;  %v3969_v19 = vrot.slane %v3968_v38, 1  ;;  %v4149_v0 = vadd.f32 %v7306_v21, %v3466_v11  ;;  %v4150_v18 = vadd.f32 %v7309_v31, %v3473_v32 }
 0x170   :  { %v3488_v7 = vmax.f32 %v3275_v55, %v3278_v3  ;;  %v2904_v44 = vpop.f32.mrb[4].mxu1  ;;  %v3976_v48 = vrot.slane %v3975_v35, 1  ;;  %v2180_v46 = vsel %vm2134_vm4, %v7038_v58, %v896_v16 }
 0x171   :  { %v3482_v6 = vrot.slane %v3481_v61, 4  ;;  %v2906_v47 = vpop.f32.mrb[5].mxu1  ;;  %v1860_v20 = vpop.permute.xlu1 %1859  ;;  %v3418_v50 = vadd.f32 %v7244_v17, %v2904_v44  ;;  %v3970_v63 = vmax.f32 %v3968_v38, %v3969_v19  ;;  %5221 = vtanh.f32 %v4149_v0 }
 0x172   :  { %v3489_v10 = vrot.slane %v3488_v7, 4  ;;  %v2908_v9 = vpop.f32.mrb[6].mxu1  ;;  %v3419_v13 = vadd.f32 %v7256_v2, %v2906_v47  ;;  %v3977_v30 = vmax.f32 %v3975_v35, %v3976_v48  ;;  %v2312_v28 = vsel %vm2264_vm6, %v2247_v49, %v1860_v20 }
 0x173   :  { %v3483_v41 = vmax.f32 %v3481_v61, %v3482_v6  ;;  %v3421_v27 = vadd.f32 %v7249_v1, %v2908_v9  ;;  %v2910_v56 = vpop.f32.mrb[7].mxu1  ;;  %v1153_v51 = vpop.permute.xlu0 %1152 }
 0x174   :  { %v3490_v33 = vmax.f32 %v3488_v7, %v3489_v10  ;;  %v3422_v37 = vadd.f32 %v7261_v45, %v2910_v56  ;;  %v2245_v40 = vsel %vm2199_vm5, %v2180_v46, %v1153_v51  ;;  %v4222_v48 = vadd.f32 %v7309_v31, %v3977_v30 }
 0x175   :  { %v3484_v4 = vrot.slane %v3483_v41, 2  ;;  %v3985_v53 = vmax.f32 %v3418_v50, %v3421_v27  ;;  %4845 = vmatmul.mubr.msk.bf16.gmra.mrb[84].mxu0 %vm2394_vm8, %v2373_v22  ;;  %v2117_v59 = vpop.permute.xlu1 %2116 }
 0x176   :  { %v3491_v57 = vrot.slane %v3490_v33, 2  ;;  %v3992_v36 = vmax.f32 %v3419_v13, %v3422_v37  ;;  %2872 = vmatprep.mubr.bf16.mxu0 %v8266_v25  ;;  %v2377_v5 = vsel %vm2329_vm7, %v2312_v28, %v2117_v59  ;;  %v4221_v37 = vadd.f32 %v7306_v21, %v3970_v63 }
 0x177   :  { %v3485_v29 = vmax.f32 %v3483_v41, %v3484_v4  ;;  %v3986_v43 = vrot.slane %v3985_v53, 4  ;;  %v1858_v8 = vpop.permute.xlu0 %1857 }
 0x178   :  { %v3492_v26 = vmax.f32 %v3490_v33, %v3491_v57  ;;  %v3993_v39 = vrot.slane %v3992_v36, 4  ;;  %v2310_v23 = vsel %vm2264_vm6, %v2245_v40, %v1858_v8 }
 0x179   :  { %v3486_v54 = vrot.slane %v3485_v29, 1  ;;  %v3987_v22 = vmax.f32 %v3985_v53, %v3986_v43 }
 0x17a   :  { %v3493_v15 = vrot.slane %v3492_v26, 1  ;;  %v3994_v14 = vmax.f32 %v3992_v36, %v3993_v39  ;;  %v2674_v12 = vpop.f32.mrb[8].mxu0  ;;  %v8269_v39 = vld [vmem:[#allocation2_spill] sm:$0xff] }
 0x17b   :  { %v3487_v55 = vmax.f32 %v3485_v29, %v3486_v54  ;;  %v3988_v3 = vrot.slane %v3987_v22, 2  ;;  %v2115_v61 = vpop.permute.xlu0 %2114  ;;  %v3280_v58 = vadd.f32 %v7244_v17, %v2674_v12  ;;  %v2676_v16 = vpop.f32.mrb[9].mxu0 }
 0x17c   :  { %v3494_v38 = vmax.f32 %v3492_v26, %v3493_v15  ;;  %v3995_v7 = vrot.slane %v3994_v14, 2  ;;  %v2375_v44 = vsel %vm2329_vm7, %v2310_v23, %v2115_v61  ;;  %v3281_v35 = vadd.f32 %v7256_v2, %v2676_v16  ;;  %v2678_v6 = vpop.f32.mrb[10].mxu0  ;;  %v5222_v28 = vpop.eup %5221 }
 0x17d   :  { %v4152_v47 = vadd.f32 %v7306_v21, %v3487_v55  ;;  %v3989_v20 = vmax.f32 %v3987_v22, %v3988_v3  ;;  %4846 = vmatmul.mubr.msk.bf16.gmra.mrb[88].mxu0 %vm2394_vm8, %v2375_v44  ;;  %4988 = vmatprep.mubr.msk.bf16.mxu1 %vm2394_vm8, %v2375_v44  ;;  %v3283_v11 = vadd.f32 %v7249_v1, %v2678_v6  ;;  %v2680_v62 = vpop.f32.mrb[11].mxu0  ;;  %v8270_v22 = vld [vmem:[#allocation3_spill] sm:$0xff] }
 0x17e   :  { %v4153_v10 = vadd.f32 %v7309_v31, %v3494_v38  ;;  %v3996_v9 = vmax.f32 %v3994_v14, %v3995_v7  ;;  %4989 = vmatmul.mubr.msk.bf16.gmra.mrb[76].mxu1 %vm2394_vm8, %v2377_v5  ;;  %v3284_v32 = vadd.f32 %v7261_v45, %v2680_v62  ;;  %2882 = vmatprep.mubr.bf16.mxu0 %v8266_v25 }
 0x17f   :  { %5223 = vtanh.f32 %v4152_v47  ;;  %v3990_v41 = vrot.slane %v3989_v20, 1  ;;  %v3502_v50 = vmax.f32 %v3280_v58, %v3283_v11  ;;  %4992 = vmatprep.mubr.msk.bf16.mxu1 %vm2394_vm8, %v6337_v42 }
 0x180   :  { %5225 = vtanh.f32 %v4153_v10  ;;  %v3997_v27 = vrot.slane %v3996_v9, 1  ;;  %v3509_v56 = vmax.f32 %v3281_v35, %v3284_v32  ;;  %v2914_v51 = vpop.f32.mrb[8].mxu1 }
 0x181   :  { %5227 = vtanh.f32 %v4150_v18  ;;  %v3991_v19 = vmax.f32 %v3989_v20, %v3990_v41  ;;  %v3503_v33 = vrot.slane %v3502_v50, 4  ;;  %v2916_v13 = vpop.f32.mrb[9].mxu1  ;;  %v3424_v42 = vadd.f32 %v7244_v17, %v2914_v51 }
 0x182   :  { %v3998_v4 = vmax.f32 %v3996_v9, %v3997_v27  ;;  %v3510_v25 = vrot.slane %v3509_v56, 4  ;;  %v2918_v53 = vpop.f32.mrb[10].mxu1  ;;  %v3425_v43 = vadd.f32 %v7256_v2, %v2916_v13 }
 0x183   :  { %v4224_v49 = vadd.f32 %v7306_v21, %v3991_v19  ;;  %v3504_v57 = vmax.f32 %v3502_v50, %v3503_v33  ;;  %v3427_v36 = vadd.f32 %v7249_v1, %v2918_v53  ;;  %v2920_v0 = vpop.f32.mrb[11].mxu1  ;;  %v8271_v19 = vld [vmem:[#allocation4_spill] sm:$0xff] }
 0x184   :  { %v4225_v18 = vadd.f32 %v7309_v31, %v3998_v4  ;;  %v3511_v29 = vmax.f32 %v3509_v56, %v3510_v25  ;;  %v3428_v59 = vadd.f32 %v7261_v45, %v2920_v0  ;;  %v8272_v4 = vld [vmem:[#allocation5_spill] sm:$0xff] }
 0x185   :  { %5229 = vtanh.f32 %v4224_v49  ;;  %v3505_v8 = vrot.slane %v3504_v57, 2  ;;  %v4006_v63 = vmax.f32 %v3424_v42, %v3427_v36  ;;  %4847 = vmatmul.mubr.msk.bf16.gmra.mrb[92].mxu0 %vm2394_vm8, %v2377_v5 }
 0x186   :  { %5231 = vtanh.f32 %v4225_v18  ;;  %v3512_v26 = vrot.slane %v3511_v29, 2  ;;  %v4013_v46 = vmax.f32 %v3425_v43, %v3428_v59  ;;  %4993 = vmatmul.mubr.msk.bf16.gmra.mrb[80].mxu1 %vm2394_vm8, %v8269_v39 }
 0x187   :  { %5233 = vtanh.f32 %v4221_v37  ;;  %v3506_v30 = vmax.f32 %v3504_v57, %v3505_v8  ;;  %v4007_v54 = vrot.slane %v4006_v63, 4  ;;  %4996 = vmatprep.mubr.msk.bf16.mxu1 %vm2394_vm8, %v8270_v22 }
 0x188   :  { %5235 = vtanh.f32 %v4222_v48  ;;  %v3513_v15 = vmax.f32 %v3511_v29, %v3512_v26  ;;  %v4014_v14 = vrot.slane %v4013_v46, 4 }
 0x189   :  { %v5224_v40 = vpop.eup %5223  ;;  %v3507_v12 = vrot.slane %v3506_v30, 1  ;;  %v4008_v5 = vmax.f32 %v4006_v63, %v4007_v54 }
 0x18a   :  { %v5226_v55 = vpop.eup %5225  ;;  %v4437_v3 = vrot.slane %v5224_v40, 7  ;;  %v3514_v23 = vrot.slane %v3513_v15, 1  ;;  %v4015_v61 = vmax.f32 %v4013_v46, %v4014_v14  ;;  %v2684_v58 = vpop.f32.mrb[12].mxu0 }
 0x18b   :  { %v5228_v16 = vpop.eup %5227  ;;  %v4458_v38 = vrot.slane %v5226_v55, 7  ;;  %v3508_v7 = vmax.f32 %v3506_v30, %v3507_v12  ;;  %v4009_v44 = vrot.slane %v4008_v5, 2  ;;  %v2686_v35 = vpop.f32.mrb[13].mxu0  ;;  %v3286_v11 = vadd.f32 %v7244_v17, %v2684_v58  ;;  %v8273_v58 = vld [vmem:[#allocation6_spill] sm:$0xff] }
 0x18c   :  { %v7355_v6 = vsel %vm4438_vm9, %v4437_v3, %v5222_v28  ;;  %v3515_v47 = vmax.f32 %v3513_v15, %v3514_v23  ;;  %v4016_v20 = vrot.slane %v4015_v61, 2  ;;  %v2688_v62 = vpop.f32.mrb[14].mxu0  ;;  %v3287_v51 = vadd.f32 %v7256_v2, %v2686_v35 }
 0x18d   :  { %v7359_v10 = vsel %vm4438_vm9, %v4458_v38, %v5228_v16  ;;  %v4155_v9 = vadd.f32 %v7306_v21, %v3508_v7  ;;  %v4010_v32 = vmax.f32 %v4008_v5, %v4009_v44  ;;  %v3289_v41 = vadd.f32 %v7249_v1, %v2688_v62  ;;  %v2690_v50 = vpop.f32.mrb[15].mxu0 }
 0x18e   :  { %v4156_v27 = vadd.f32 %v7309_v31, %v3515_v47  ;;  %v4017_v56 = vmax.f32 %v4015_v61, %v4016_v20  ;;  %4997 = vmatmul.mubr.msk.bf16.gmra.mrb[84].mxu1 %vm2394_vm8, %v8271_v19  ;;  %v3290_v33 = vadd.f32 %v7261_v45, %v2690_v50 }
 0x18f   :  { %v5230_v13 = vpop.eup %5229  ;;  %5237 = vtanh.f32 %v4155_v9  ;;  %v4011_v37 = vrot.slane %v4010_v32, 1  ;;  %v3523_v48 = vmax.f32 %v3286_v11, %v3289_v41  ;;  %5000 = vmatprep.mubr.msk.bf16.mxu1 %vm2394_vm8, %v8272_v4 }
 0x190   :  { %v5232_v25 = vpop.eup %5231  ;;  %v4570_v53 = vrot.slane %v5230_v13, 7  ;;  %5239 = vtanh.f32 %v4156_v27  ;;  %v4018_v49 = vrot.slane %v4017_v56, 1  ;;  %v3530_v57 = vmax.f32 %v3287_v51, %v3290_v33  ;;  %v2924_v42 = vpop.f32.mrb[12].mxu1 }
 0x191   :  { %v5234_v36 = vpop.eup %5233  ;;  %v4584_v0 = vrot.slane %v5232_v25, 7  ;;  %v4012_v18 = vmax.f32 %v4010_v32, %v4011_v37  ;;  %v3524_v29 = vrot.slane %v3523_v48, 4  ;;  %v2926_v43 = vpop.f32.mrb[13].mxu1  ;;  %v3430_v46 = vadd.f32 %v7244_v17, %v2924_v42 }
 0x192   :  { %v5236_v59 = vpop.eup %5235  ;;  %v7371_v8 = vsel %vm4438_vm9, %v4570_v53, %v5234_v36  ;;  %v4019_v63 = vmax.f32 %v4017_v56, %v4018_v49  ;;  %v3531_v26 = vrot.slane %v3530_v57, 4  ;;  %v2928_v39 = vpop.f32.mrb[14].mxu1  ;;  %v3431_v12 = vadd.f32 %v7256_v2, %v2926_v43 }
 0x193   :  { %v7375_v30 = vsel %vm4438_vm9, %v4584_v0, %v5236_v59  ;;  %v4227_v54 = vadd.f32 %v7306_v21, %v4012_v18  ;;  %v3525_v22 = vmax.f32 %v3523_v48, %v3524_v29  ;;  %v3433_v28 = vadd.f32 %v7249_v1, %v2928_v39  ;;  %v2930_v15 = vpop.f32.mrb[15].mxu1 }
 0x194   :  { %v4228_v14 = vadd.f32 %v7309_v31, %v4019_v63  ;;  %v3532_v40 = vmax.f32 %v3530_v57, %v3531_v26  ;;  %v3434_v5 = vadd.f32 %v7261_v45, %v2930_v15 }
 0x195   :  { %5241 = vtanh.f32 %v4227_v54  ;;  %v3526_v55 = vrot.slane %v3525_v22, 2  ;;  %v4027_v3 = vmax.f32 %v3430_v46, %v3433_v28 }
 0x196   :  { %5243 = vtanh.f32 %v4228_v14  ;;  %v3533_v23 = vrot.slane %v3532_v40, 2  ;;  %v4034_v61 = vmax.f32 %v3431_v12, %v3434_v5  ;;  %5001 = vmatmul.mubr.msk.bf16.gmra.mrb[88].mxu1 %vm2394_vm8, %v8273_v58 }
 0x197   :  { %v3527_v16 = vmax.f32 %v3525_v22, %v3526_v55  ;;  %v4028_v38 = vrot.slane %v4027_v3, 4  ;;  %5004 = vmatprep.mubr.msk.bf16.mxu1 %vm2394_vm8, %v7047_v52 }
 0x198   :  { %v3534_v7 = vmax.f32 %v3532_v40, %v3533_v23  ;;  %v4035_v44 = vrot.slane %v4034_v61, 4 }
 0x199   :  { %v5238_v35 = vpop.eup %5237  ;;  %v3528_v47 = vrot.slane %v3527_v16, 1  ;;  %v4029_v20 = vmax.f32 %v4027_v3, %v4028_v38 }
 0x19a   :  { %v5240_v11 = vpop.eup %5239  ;;  %v4440_v62 = vrot.slane %v5238_v35, 6  ;;  %v3535_v9 = vrot.slane %v3534_v7, 1  ;;  %v4036_v32 = vmax.f32 %v4034_v61, %v4035_v44  ;;  %v2694_v41 = vpop.f32.mrb[16].mxu0 }
 0x19b   :  { %v4460_v50 = vrot.slane %v5240_v11, 6  ;;  %v3529_v27 = vmax.f32 %v3527_v16, %v3528_v47  ;;  %v4030_v56 = vrot.slane %v4029_v20, 2  ;;  %v2696_v51 = vpop.f32.mrb[17].mxu0  ;;  %v3292_v13 = vadd.f32 %v7244_v17, %v2694_v41 }
 0x19c   :  { %v7388_v19 = vsel %vm4441_vm10, %v4440_v62, %v7355_v6  ;;  %v3536_v52 = vmax.f32 %v3534_v7, %v3535_v9  ;;  %v4037_v33 = vrot.slane %v4036_v32, 2  ;;  %v2698_v37 = vpop.f32.mrb[18].mxu0  ;;  %v3293_v6 = vadd.f32 %v7256_v2, %v2696_v51 }
 0x19d   :  { %v7393_v48 = vsel %vm4441_vm10, %v4460_v50, %v7359_v10  ;;  %v4158_v4 = vadd.f32 %v7306_v21, %v3529_v27  ;;  %v4031_v25 = vmax.f32 %v4029_v20, %v4030_v56  ;;  %v3295_v53 = vadd.f32 %v7249_v1, %v2698_v37  ;;  %v2700_v49 = vpop.f32.mrb[19].mxu0 }
 0x19e   :  { %v4159_v57 = vadd.f32 %v7309_v31, %v3536_v52  ;;  %v4038_v42 = vmax.f32 %v4036_v32, %v4037_v33  ;;  %5005 = vmatmul.mubr.msk.bf16.gmra.mrb[92].mxu1 %vm2394_vm8, %v7120_v60  ;;  %v3296_v36 = vadd.f32 %v7261_v45, %v2700_v49 }
 0x19f   :  { %v5242_v0 = vpop.eup %5241  ;;  %5245 = vtanh.f32 %v4158_v4  ;;  %v4032_v10 = vrot.slane %v4031_v25, 1  ;;  %v3544_v18 = vmax.f32 %v3292_v13, %v3295_v53 }
 0x1a0   :  { %v5244_v29 = vpop.eup %5243  ;;  %v4572_v43 = vrot.slane %v5242_v0, 6  ;;  %5247 = vtanh.f32 %v4159_v57  ;;  %v4039_v59 = vrot.slane %v4038_v42, 1  ;;  %v3551_v63 = vmax.f32 %v3293_v6, %v3296_v36  ;;  %v2934_v26 = vpop.f32.mrb[16].mxu1 }
 0x1a1   :  { %v4586_v46 = vrot.slane %v5244_v29, 6  ;;  %v4033_v39 = vmax.f32 %v4031_v25, %v4032_v10  ;;  %v3545_v54 = vrot.slane %v3544_v18, 4  ;;  %v2936_v22 = vpop.f32.mrb[17].mxu1  ;;  %v3436_v14 = vadd.f32 %v7244_v17, %v2934_v26 }
 0x1a2   :  { %v7404_v28 = vsel %vm4441_vm10, %v4572_v43, %v7371_v8  ;;  %v4040_v60 = vmax.f32 %v4038_v42, %v4039_v59  ;;  %v3552_v15 = vrot.slane %v3551_v63, 4  ;;  %v2938_v40 = vpop.f32.mrb[18].mxu1  ;;  %v3437_v8 = vadd.f32 %v7256_v2, %v2936_v22 }
 0x1a3   :  { %v7409_v12 = vsel %vm4441_vm10, %v4586_v46, %v7375_v30  ;;  %v4230_v5 = vadd.f32 %v7306_v21, %v4033_v39  ;;  %v3546_v55 = vmax.f32 %v3544_v18, %v3545_v54  ;;  %v3439_v3 = vadd.f32 %v7249_v1, %v2938_v40  ;;  %v2940_v23 = vpop.f32.mrb[19].mxu1 }
 0x1a4   :  { %v4231_v61 = vadd.f32 %v7309_v31, %v4040_v60  ;;  %v3553_v58 = vmax.f32 %v3551_v63, %v3552_v15  ;;  %v3440_v16 = vadd.f32 %v7261_v45, %v2940_v23 }
 0x1a5   :  { %5249 = vtanh.f32 %v4230_v5  ;;  %v3547_v38 = vrot.slane %v3546_v55, 2  ;;  %v4048_v7 = vmax.f32 %v3436_v14, %v3439_v3 }
 0x1a6   :  { %5251 = vtanh.f32 %v4231_v61  ;;  %v3554_v44 = vrot.slane %v3553_v58, 2  ;;  %v4055_v30 = vmax.f32 %v3437_v8, %v3440_v16 }
 0x1a7   :  { %v3548_v35 = vmax.f32 %v3546_v55, %v3547_v38  ;;  %v4049_v47 = vrot.slane %v4048_v7, 4 }
 0x1a8   :  { %v3555_v20 = vmax.f32 %v3553_v58, %v3554_v44  ;;  %v4056_v11 = vrot.slane %v4055_v30, 4 }
 0x1a9   :  { %v5246_v62 = vpop.eup %5245  ;;  %v3549_v9 = vrot.slane %v3548_v35, 1  ;;  %v4050_v32 = vmax.f32 %v4048_v7, %v4049_v47 }
 0x1aa   :  { %v5248_v41 = vpop.eup %5247  ;;  %v4443_v50 = vrot.slane %v5246_v62, 5  ;;  %v3556_v27 = vrot.slane %v3555_v20, 1  ;;  %v4057_v56 = vmax.f32 %v4055_v30, %v4056_v11  ;;  %v2704_v51 = vpop.f32.mrb[20].mxu0 }
 0x1ab   :  { %v4462_v52 = vrot.slane %v5248_v41, 5  ;;  %v3550_v33 = vmax.f32 %v3548_v35, %v3549_v9  ;;  %v4051_v13 = vrot.slane %v4050_v32, 2  ;;  %v2706_v37 = vpop.f32.mrb[21].mxu0  ;;  %v3298_v49 = vadd.f32 %v7244_v17, %v2704_v51 }
 0x1ac   :  { %v7418_v4 = vsel %vm4444_vm11, %v4443_v50, %v7388_v19  ;;  %v3557_v25 = vmax.f32 %v3555_v20, %v3556_v27  ;;  %v4058_v53 = vrot.slane %v4057_v56, 2  ;;  %v2708_v57 = vpop.f32.mrb[22].mxu0  ;;  %v3299_v19 = vadd.f32 %v7256_v2, %v2706_v37 }
 0x1ad   :  { %v7423_v42 = vsel %vm4444_vm11, %v4462_v52, %v7393_v48  ;;  %v4161_v6 = vadd.f32 %v7306_v21, %v3550_v33  ;;  %v4052_v36 = vmax.f32 %v4050_v32, %v4051_v13  ;;  %v3301_v0 = vadd.f32 %v7249_v1, %v2708_v57  ;;  %v2710_v10 = vpop.f32.mrb[23].mxu0 }
 0x1ae   :  { %v4162_v18 = vadd.f32 %v7309_v31, %v3557_v25  ;;  %v4059_v29 = vmax.f32 %v4057_v56, %v4058_v53  ;;  %v3302_v43 = vadd.f32 %v7261_v45, %v2710_v10 }
 0x1af   :  { %v5250_v59 = vpop.eup %5249  ;;  %5253 = vtanh.f32 %v4161_v6  ;;  %v4053_v63 = vrot.slane %v4052_v36, 1  ;;  %v3565_v26 = vmax.f32 %v3298_v49, %v3301_v0 }
 0x1b0   :  { %v5252_v46 = vpop.eup %5251  ;;  %v4574_v48 = vrot.slane %v5250_v59, 5  ;;  %5255 = vtanh.f32 %v4162_v18  ;;  %v4060_v39 = vrot.slane %v4059_v29, 1  ;;  %v3572_v54 = vmax.f32 %v3299_v19, %v3302_v43  ;;  %v2944_v22 = vpop.f32.mrb[20].mxu1 }
 0x1b1   :  { %v4588_v60 = vrot.slane %v5252_v46, 5  ;;  %v4054_v15 = vmax.f32 %v4052_v36, %v4053_v63  ;;  %v3566_v14 = vrot.slane %v3565_v26, 4  ;;  %v2946_v40 = vpop.f32.mrb[21].mxu1  ;;  %v3442_v23 = vadd.f32 %v7244_v17, %v2944_v22 }
 0x1b2   :  { %v7432_v5 = vsel %vm4444_vm11, %v4574_v48, %v7404_v28  ;;  %v4061_v55 = vmax.f32 %v4059_v29, %v4060_v39  ;;  %v3573_v3 = vrot.slane %v3572_v54, 4  ;;  %v2948_v61 = vpop.f32.mrb[22].mxu1  ;;  %v3443_v28 = vadd.f32 %v7256_v2, %v2946_v40 }
 0x1b3   :  { %v7437_v58 = vsel %vm4444_vm11, %v4588_v60, %v7409_v12  ;;  %v4233_v8 = vadd.f32 %v7306_v21, %v4054_v15  ;;  %v3567_v16 = vmax.f32 %v3565_v26, %v3566_v14  ;;  %v3445_v38 = vadd.f32 %v7249_v1, %v2948_v61  ;;  %v2950_v7 = vpop.f32.mrb[23].mxu1 }
 0x1b4   :  { %v4234_v44 = vadd.f32 %v7309_v31, %v4061_v55  ;;  %v3574_v30 = vmax.f32 %v3572_v54, %v3573_v3  ;;  %v3446_v35 = vadd.f32 %v7261_v45, %v2950_v7 }
 0x1b5   :  { %5257 = vtanh.f32 %v4233_v8  ;;  %v3568_v47 = vrot.slane %v3567_v16, 2  ;;  %v4069_v20 = vmax.f32 %v3442_v23, %v3445_v38 }
 0x1b6   :  { %5259 = vtanh.f32 %v4234_v44  ;;  %v3575_v11 = vrot.slane %v3574_v30, 2  ;;  %v4076_v12 = vmax.f32 %v3443_v28, %v3446_v35 }
 0x1b7   :  { %v3569_v62 = vmax.f32 %v3567_v16, %v3568_v47  ;;  %v4070_v9 = vrot.slane %v4069_v20, 4 }
 0x1b8   :  { %v3576_v32 = vmax.f32 %v3574_v30, %v3575_v11  ;;  %v4077_v41 = vrot.slane %v4076_v12, 4 }
 0x1b9   :  { %v5254_v50 = vpop.eup %5253  ;;  %v3570_v27 = vrot.slane %v3569_v62, 1  ;;  %v4071_v56 = vmax.f32 %v4069_v20, %v4070_v9 }
 0x1ba   :  { %v5256_v51 = vpop.eup %5255  ;;  %v4446_v52 = vrot.slane %v5254_v50, 4  ;;  %v3577_v33 = vrot.slane %v3576_v32, 1  ;;  %v4078_v13 = vmax.f32 %v4076_v12, %v4077_v41  ;;  %v2714_v37 = vpop.f32.mrb[24].mxu0 }
 0x1bb   :  { %v4464_v25 = vrot.slane %v5256_v51, 4  ;;  %v3571_v53 = vmax.f32 %v3569_v62, %v3570_v27  ;;  %v4072_v49 = vrot.slane %v4071_v56, 2  ;;  %v2716_v57 = vpop.f32.mrb[25].mxu0  ;;  %v3304_v10 = vadd.f32 %v7244_v17, %v2714_v37 }
 0x1bc   :  { %v7446_v6 = vsel %vm4447_vm12, %v4446_v52, %v7418_v4  ;;  %v3578_v36 = vmax.f32 %v3576_v32, %v3577_v33  ;;  %v4079_v0 = vrot.slane %v4078_v13, 2  ;;  %v2718_v18 = vpop.f32.mrb[26].mxu0  ;;  %v3305_v4 = vadd.f32 %v7256_v2, %v2716_v57 }
 0x1bd   :  { %v7451_v29 = vsel %vm4447_vm12, %v4464_v25, %v7423_v42  ;;  %v4164_v19 = vadd.f32 %v7306_v21, %v3571_v53  ;;  %v4073_v43 = vmax.f32 %v4071_v56, %v4072_v49  ;;  %v3307_v59 = vadd.f32 %v7249_v1, %v2718_v18  ;;  %v2720_v63 = vpop.f32.mrb[27].mxu0 }
 0x1be   :  { %v4165_v26 = vadd.f32 %v7309_v31, %v3578_v36  ;;  %v4080_v46 = vmax.f32 %v4078_v13, %v4079_v0  ;;  %v3308_v48 = vadd.f32 %v7261_v45, %v2720_v63 }
 0x1bf   :  { %v5258_v39 = vpop.eup %5257  ;;  %5261 = vtanh.f32 %v4164_v19  ;;  %v4074_v54 = vrot.slane %v4073_v43, 1  ;;  %v3586_v22 = vmax.f32 %v3304_v10, %v3307_v59 }
 0x1c0   :  { %v5260_v60 = vpop.eup %5259  ;;  %v4576_v42 = vrot.slane %v5258_v39, 4  ;;  %5263 = vtanh.f32 %v4165_v26  ;;  %v4081_v15 = vrot.slane %v4080_v46, 1  ;;  %v3593_v14 = vmax.f32 %v3305_v4, %v3308_v48  ;;  %v2954_v40 = vpop.f32.mrb[24].mxu1 }
 0x1c1   :  { %v4590_v55 = vrot.slane %v5260_v60, 4  ;;  %v4075_v3 = vmax.f32 %v4073_v43, %v4074_v54  ;;  %v3587_v23 = vrot.slane %v3586_v22, 4  ;;  %v2956_v61 = vpop.f32.mrb[25].mxu1  ;;  %v3448_v7 = vadd.f32 %v7244_v17, %v2954_v40 }
 0x1c2   :  { %v7460_v8 = vsel %vm4447_vm12, %v4576_v42, %v7432_v5  ;;  %v4082_v16 = vmax.f32 %v4080_v46, %v4081_v15  ;;  %v3594_v38 = vrot.slane %v3593_v14, 4  ;;  %v2958_v44 = vpop.f32.mrb[26].mxu1  ;;  %v3449_v5 = vadd.f32 %v7256_v2, %v2956_v61 }
 0x1c3   :  { %v7465_v30 = vsel %vm4447_vm12, %v4590_v55, %v7437_v58  ;;  %v4236_v28 = vadd.f32 %v7306_v21, %v4075_v3  ;;  %v3588_v35 = vmax.f32 %v3586_v22, %v3587_v23  ;;  %v3451_v47 = vadd.f32 %v7249_v1, %v2958_v44  ;;  %v2960_v20 = vpop.f32.mrb[27].mxu1  ;;  %v7493_v44 = vld [vmem:[%s8253_s3] sm:$0xff] }
 0x1c4   :  { %v4237_v11 = vadd.f32 %v7309_v31, %v4082_v16  ;;  %v3595_v12 = vmax.f32 %v3593_v14, %v3594_v38  ;;  %v3452_v62 = vadd.f32 %v7261_v45, %v2960_v20 }
 0x1c5   :  { %5265 = vtanh.f32 %v4236_v28  ;;  %v3589_v9 = vrot.slane %v3588_v35, 2  ;;  %v4090_v32 = vmax.f32 %v3448_v7, %v3451_v47 }
 0x1c6   :  { %5267 = vtanh.f32 %v4237_v11  ;;  %v3596_v41 = vrot.slane %v3595_v12, 2  ;;  %v4097_v58 = vmax.f32 %v3449_v5, %v3452_v62 }
 0x1c7   :  { %v3590_v50 = vmax.f32 %v3588_v35, %v3589_v9  ;;  %v4091_v27 = vrot.slane %v4090_v32, 4 }
 0x1c8   :  { %v3597_v56 = vmax.f32 %v3595_v12, %v3596_v41  ;;  %v4098_v51 = vrot.slane %v4097_v58, 4  ;;  %v7517_v41 = vld [vmem:[%s8253_s3 + $0x20] sm:$0xff] }
 0x1c9   :  { %v5262_v52 = vpop.eup %5261  ;;  %v3591_v33 = vrot.slane %v3590_v50, 1  ;;  %v4092_v13 = vmax.f32 %v4090_v32, %v4091_v27  ;;  %v7511_v32 = vld [vmem:[%s8253_s3 + $0x8] sm:$0xff] }
 0x1ca   :  { %v5264_v37 = vpop.eup %5263  ;;  %v4449_v25 = vrot.slane %v5262_v52, 3  ;;  %v3598_v53 = vrot.slane %v3597_v56, 1  ;;  %v4099_v49 = vmax.f32 %v4097_v58, %v4098_v51  ;;  %v2724_v57 = vpop.f32.mrb[28].mxu0 }
 0x1cb   :  { %v4466_v36 = vrot.slane %v5264_v37, 3  ;;  %v3592_v0 = vmax.f32 %v3590_v50, %v3591_v33  ;;  %v4093_v10 = vrot.slane %v4092_v13, 2  ;;  %v2726_v18 = vpop.f32.mrb[29].mxu0  ;;  %v3310_v63 = vadd.f32 %v7244_v17, %v2724_v57  ;;  %v7524_v33 = vld [vmem:[%s8253_s3 + $0x10] sm:$0xff] }
 0x1cc   :  { %v7474_v19 = vsel %vm4450_vm13, %v4449_v25, %v7446_v6  ;;  %v3599_v43 = vmax.f32 %v3597_v56, %v3598_v53  ;;  %v4100_v59 = vrot.slane %v4099_v49, 2  ;;  %v2728_v26 = vpop.f32.mrb[30].mxu0  ;;  %v3311_v6 = vadd.f32 %v7256_v2, %v2726_v18 }
 0x1cd   :  { %v7479_v46 = vsel %vm4450_vm13, %v4466_v36, %v7451_v29  ;;  %v4167_v4 = vadd.f32 %v7306_v21, %v3592_v0  ;;  %v4094_v48 = vmax.f32 %v4092_v13, %v4093_v10  ;;  %v3313_v39 = vadd.f32 %v7249_v1, %v2728_v26  ;;  %v2730_v54 = vpop.f32.mrb[31].mxu0 }
 0x1ce   :  { %v4168_v22 = vadd.f32 %v7309_v31, %v3599_v43  ;;  %v4101_v60 = vmax.f32 %v4099_v49, %v4100_v59  ;;  %v3314_v42 = vadd.f32 %v7261_v45, %v2730_v54  ;;  %v4144_v56 = vsub.s32 2, %v7280_v24 }
 0x1cf   :  { %v5266_v15 = vpop.eup %5265  ;;  %5269 = vtanh.f32 %v4167_v4  ;;  %v4095_v17 = vrot.slane %v4094_v48, 1  ;;  %v3607_v14 = vmax.f32 %v3310_v63, %v3313_v39 }
 0x1d0   :  { %v5268_v40 = vpop.eup %5267  ;;  %v4578_v29 = vrot.slane %v5266_v15, 3  ;;  %5271 = vtanh.f32 %v4168_v22  ;;  %v4102_v55 = vrot.slane %v4101_v60, 1  ;;  %v3614_v3 = vmax.f32 %v3311_v6, %v3314_v42  ;;  %v2964_v23 = vpop.f32.mrb[28].mxu1  ;;  %v7534_v22 = vld [vmem:[%s8253_s3 + $0x28] sm:$0xff] }
 0x1d1   :  { %v4592_v61 = vrot.slane %v5268_v40, 3  ;;  %v4096_v1 = vmax.f32 %v4094_v48, %v4095_v17  ;;  %v3608_v16 = vrot.slane %v3607_v14, 4  ;;  %v2966_v38 = vpop.f32.mrb[29].mxu1  ;;  %v3454_v28 = vadd.f32 %v7493_v44, %v2964_v23 }
 0x1d2   :  { %v7488_v7 = vsel %vm4450_vm13, %v4578_v29, %v7460_v8  ;;  %v4103_v2 = vmax.f32 %v4101_v60, %v4102_v55  ;;  %v3615_v45 = vrot.slane %v3614_v3, 4  ;;  %v2968_v35 = vpop.f32.mrb[30].mxu1  ;;  %v7504_v8 = vld [vmem:[%s8253_s3 + $0x18] sm:$0xff]  ;;  %v7528_v43 = vrot.slane %v7298_v34, %v4144_v56 }
 0x1d3   :  { %v7498_v47 = vsel %vm4450_vm13, %v4592_v61, %v7465_v30  ;;  %v4239_v20 = vadd.f32 %v7306_v21, %v4096_v1  ;;  %v3609_v11 = vmax.f32 %v3607_v14, %v3608_v16  ;;  %v3457_v12 = vadd.f32 %v7504_v8, %v2968_v35  ;;  %v2970_v5 = vpop.f32.mrb[31].mxu1 }
 0x1d4   :  { %v4240_v62 = vadd.f32 %v7309_v31, %v4103_v2  ;;  %v3616_v9 = vmax.f32 %v3614_v3, %v3615_v45  ;;  %v3455_v30 = vadd.f32 %v7511_v32, %v2966_v38  ;;  %v3458_v58 = vadd.f32 %v7517_v41, %v2970_v5 }
 0x1d5   :  { %5273 = vtanh.f32 %v4239_v20  ;;  %v3610_v50 = vrot.slane %v3609_v11, 2  ;;  %v4111_v27 = vmax.f32 %v3454_v28, %v3457_v12 }
 0x1d6   :  { %5275 = vtanh.f32 %v4240_v62  ;;  %v3617_v51 = vrot.slane %v3616_v9, 2  ;;  %v4118_v52 = vmax.f32 %v3455_v30, %v3458_v58 }
 0x1d7   :  { %v3611_v13 = vmax.f32 %v3609_v11, %v3610_v50  ;;  %v4112_v37 = vrot.slane %v4111_v27, 4 }
 0x1d8   :  { %v3618_v25 = vmax.f32 %v3616_v9, %v3617_v51  ;;  %v4119_v53 = vrot.slane %v4118_v52, 4  ;;  %v4946_v49 = vpop.f32.mrb[32].mxu1 }
 0x1d9   :  { %v5270_v57 = vpop.eup %5269  ;;  %v3612_v36 = vrot.slane %v3611_v13, 1  ;;  %v4113_v0 = vmax.f32 %v4111_v27, %v4112_v37  ;;  %v3276_v10 = vadd.f32 %v4946_v49, %v7524_v33  ;;  %v2734_v24 = vpop.f32.mrb[32].mxu0 }
 0x1da   :  { %v3007_v18 = vpop.f32.mrb[33].mxu1  ;;  %v5272_v59 = vpop.eup %5271  ;;  %v4452_v63 = vrot.slane %v5270_v57, 2  ;;  %v3619_v26 = vrot.slane %v3618_v25, 1  ;;  %v4120_v4 = vmax.f32 %v4118_v52, %v4119_v53  ;;  %v3316_v48 = vadd.f32 %v7493_v44, %v2734_v24 }
 0x1db   :  { %v2736_v39 = vpop.f32.mrb[33].mxu0  ;;  %v4947_v54 = vpop.f32.mrb[34].mxu1  ;;  %v4468_v60 = vrot.slane %v5272_v59, 2  ;;  %v3613_v6 = vmax.f32 %v3611_v13, %v3612_v36  ;;  %v4114_v42 = vrot.slane %v4113_v0, 2  ;;  %v3270_v15 = vadd.f32 %v7524_v33, %v3007_v18 }
 0x1dc   :  { %v2738_v34 = vpop.f32.mrb[34].mxu0  ;;  %v3010_v17 = vpop.f32.mrb[35].mxu1  ;;  %v7539_v14 = vsel %vm4453_vm14, %v4452_v63, %v7474_v19  ;;  %v3620_v40 = vmax.f32 %v3618_v25, %v3619_v26  ;;  %v4121_v29 = vrot.slane %v4120_v4, 2  ;;  %v3317_v55 = vadd.f32 %v7511_v32, %v2736_v39 }
 0x1dd   :  { %v2740_v3 = vpop.f32.mrb[35].mxu0  ;;  %v7544_v23 = vsel %vm4453_vm14, %v4468_v60, %v7479_v46  ;;  %v4170_v61 = vadd.f32 %v7306_v21, %v3613_v6  ;;  %v4115_v1 = vmax.f32 %v4113_v0, %v4114_v42  ;;  %v3279_v16 = vadd.f32 %v4947_v54, %v7534_v22 }
 0x1de   :  { %v4171_v38 = vadd.f32 %v7309_v31, %v3620_v40  ;;  %v4122_v2 = vmax.f32 %v4120_v4, %v4121_v29  ;;  %v3319_v19 = vadd.f32 %v7504_v8, %v2738_v34  ;;  %v3273_v45 = vadd.f32 %v7534_v22, %v3010_v17 }
 0x1df   :  { %v5274_v28 = vpop.eup %5273  ;;  %5277 = vtanh.f32 %v4170_v61  ;;  %v4116_v35 = vrot.slane %v4115_v1, 1  ;;  %v3495_v20 = vmax.f32 %v3276_v10, %v3279_v16  ;;  %v3320_v11 = vadd.f32 %v7517_v41, %v2740_v3 }
 0x1e0   :  { %v5276_v46 = vpop.eup %5275  ;;  %v4580_v12 = vrot.slane %v5274_v28, 2  ;;  %5279 = vtanh.f32 %v4171_v38  ;;  %v4123_v5 = vrot.slane %v4122_v2, 1  ;;  %v3628_v62 = vmax.f32 %v3316_v48, %v3319_v19  ;;  %v4950_v9 = vpop.f32.mrb[36].mxu1 }
 0x1e1   :  { %v4594_v30 = vrot.slane %v5276_v46, 2  ;;  %v4117_v58 = vmax.f32 %v4115_v1, %v4116_v35  ;;  %v3496_v50 = vrot.slane %v3495_v20, 4  ;;  %v3474_v27 = vmax.f32 %v3270_v15, %v3273_v45  ;;  %v2744_v56 = vpop.f32.mrb[36].mxu0  ;;  %v3023_v51 = vpop.f32.mrb[37].mxu1 }
 0x1e2   :  { %v7554_v52 = vsel %vm4453_vm14, %v4580_v12, %v7488_v7  ;;  %v4124_v13 = vmax.f32 %v4122_v2, %v4123_v5  ;;  %v3629_v37 = vrot.slane %v3628_v62, 4  ;;  %v3635_v25 = vmax.f32 %v3317_v55, %v3320_v11  ;;  %v2746_v53 = vpop.f32.mrb[37].mxu0  ;;  %v4951_v49 = vpop.f32.mrb[38].mxu1 }
 0x1e3   :  { %v7558_v57 = vsel %vm4453_vm14, %v4594_v30, %v7498_v47  ;;  %v4242_v36 = vadd.f32 %v7306_v21, %v4117_v58  ;;  %v3497_v0 = vmax.f32 %v3495_v20, %v3496_v50  ;;  %v3475_v10 = vrot.slane %v3474_v27, 4  ;;  %v2748_v24 = vpop.f32.mrb[38].mxu0  ;;  %v3026_v18 = vpop.f32.mrb[39].mxu1 }
 0x1e4   :  { %v4243_v59 = vadd.f32 %v7309_v31, %v4124_v13  ;;  %v3630_v63 = vmax.f32 %v3628_v62, %v3629_v37  ;;  %v3636_v7 = vrot.slane %v3635_v25, 4  ;;  %v3288_v26 = vadd.f32 %v4950_v9, %v7524_v33  ;;  %v2750_v4 = vpop.f32.mrb[39].mxu0 }
 0x1e5   :  { %5281 = vtanh.f32 %v4242_v36  ;;  %v3498_v48 = vrot.slane %v3497_v0, 2  ;;  %v3476_v39 = vmax.f32 %v3474_v27, %v3475_v10  ;;  %v3322_v54 = vadd.f32 %v7493_v44, %v2744_v56 }
 0x1e6   :  { %5283 = vtanh.f32 %v4243_v59  ;;  %v3631_v47 = vrot.slane %v3630_v63, 2  ;;  %v3637_v60 = vmax.f32 %v3635_v25, %v3636_v7  ;;  %v3282_v6 = vadd.f32 %v7524_v33, %v3023_v51 }
 0x1e7   :  { %v3499_v42 = vmax.f32 %v3497_v0, %v3498_v48  ;;  %v3477_v15 = vrot.slane %v3476_v39, 2  ;;  %v3323_v34 = vadd.f32 %v7511_v32, %v2746_v53  ;;  %v3291_v17 = vadd.f32 %v4951_v49, %v7534_v22 }
 0x1e8   :  { %v3632_v40 = vmax.f32 %v3630_v63, %v3631_v47  ;;  %v3638_v29 = vrot.slane %v3637_v60, 2  ;;  %v3325_v55 = vadd.f32 %v7504_v8, %v2748_v24  ;;  %v3285_v3 = vadd.f32 %v7534_v22, %v3026_v18  ;;  %v7569_v61 = vpop.f32.mrb[40].mxu1 }
 0x1e9   :  { %v5278_v1 = vpop.eup %5277  ;;  %v3500_v16 = vrot.slane %v3499_v42, 1  ;;  %v3478_v38 = vmax.f32 %v3476_v39, %v3477_v15  ;;  %v3537_v2 = vmax.f32 %v3288_v26, %v3291_v17  ;;  %v3326_v19 = vadd.f32 %v7517_v41, %v2750_v4  ;;  %v7572_v45 = vpop.f32.mrb[40].mxu0 }
 0x1ea   :  { %v7574_v28 = vpop.f32.mrb[41].mxu1  ;;  %v5280_v35 = vpop.eup %5279  ;;  %v4455_v20 = vrot.slane %v5278_v1, 1  ;;  %v3633_v11 = vrot.slane %v3632_v40, 1  ;;  %v3639_v46 = vmax.f32 %v3637_v60, %v3638_v29  ;;  %v3649_v12 = vmax.f32 %v3322_v54, %v3325_v55 }
 0x1eb   :  { %v2756_v5 = vpop.f32.mrb[41].mxu0  ;;  %v4955_v62 = vpop.f32.mrb[42].mxu1  ;;  %v4470_v9 = vrot.slane %v5280_v35, 1  ;;  %v3501_v30 = vmax.f32 %v3499_v42, %v3500_v16  ;;  %v3479_v58 = vrot.slane %v3478_v38, 1  ;;  %v3538_v50 = vrot.slane %v3537_v2, 4 }
 0x1ec   :  { %v2758_v27 = vpop.f32.mrb[42].mxu0  ;;  %v3042_v56 = vpop.f32.mrb[43].mxu1  ;;  %v4457_v51 = vsel %vm4456_vm15, %v4455_v20, %v7539_v14  ;;  %v3634_v13 = vmax.f32 %v3632_v40, %v3633_v11  ;;  %v3640_v37 = vrot.slane %v3639_v46, 1  ;;  %v3650_v25 = vrot.slane %v3649_v12, 4 }
 0x1ed   :  { %v2760_v53 = vpop.f32.mrb[43].mxu0  ;;  %4624 = vst [vmem:[%s8255_s4] sm:$0xff] %v4457_v51  ;;  %v4471_v49 = vsel %vm4456_vm15, %v4470_v9, %v7544_v23  ;;  %v4154_v36 = vadd.f32 %v7528_v43, %v3501_v30  ;;  %v3480_v0 = vmax.f32 %v3478_v38, %v3479_v58  ;;  %v3539_v10 = vmax.f32 %v3537_v2, %v3538_v50 }
 0x1ee   :  { %4625 = vst [vmem:[%s8255_s4 + $0x8] sm:$0xff] %v4471_v49  ;;  %v4173_v14 = vadd.f32 %v7306_v21, %v3634_v13  ;;  %v3641_v24 = vmax.f32 %v3639_v46, %v3640_v37  ;;  %v3651_v18 = vmax.f32 %v3649_v12, %v3650_v25  ;;  %v3516_v59 = vmax.f32 %v3282_v6, %v3285_v3 }
 0x1ef   :  { %v5282_v63 = vpop.eup %5281  ;;  %5285 = vtanh.f32 %v4154_v36  ;;  %v4151_v7 = vadd.f32 %v7528_v43, %v3480_v0  ;;  %v3540_v26 = vrot.slane %v3539_v10, 2  ;;  %v3656_v4 = vmax.f32 %v3323_v34, %v3326_v19 }
 0x1f0   :  { %v5284_v23 = vpop.eup %5283  ;;  %v4582_v48 = vrot.slane %v5282_v63, 1  ;;  %5287 = vtanh.f32 %v4173_v14  ;;  %v4174_v39 = vadd.f32 %v7309_v31, %v3641_v24  ;;  %v3652_v54 = vrot.slane %v3651_v18, 2  ;;  %v7590_v47 = vpop.f32.mrb[44].mxu1 }
 0x1f1   :  { %v4596_v60 = vrot.slane %v5284_v23, 1  ;;  %5289 = vtanh.f32 %v4151_v7  ;;  %v3541_v42 = vmax.f32 %v3539_v10, %v3540_v26  ;;  %v3517_v15 = vrot.slane %v3516_v59, 4  ;;  %v7592_v17 = vpop.f32.mrb[44].mxu0  ;;  %v7594_v6 = vpop.f32.mrb[45].mxu1 }
 0x1f2   :  { %v4583_v40 = vsel %vm4456_vm15, %v4582_v48, %v7554_v52  ;;  %5291 = vtanh.f32 %v4174_v39  ;;  %v3653_v34 = vmax.f32 %v3651_v18, %v3652_v54  ;;  %v3657_v29 = vrot.slane %v3656_v4, 4  ;;  %v7598_v55 = vpop.f32.mrb[45].mxu0  ;;  %v7600_v3 = vpop.f32.mrb[46].mxu1 }
 0x1f3   :  { %4633 = vst [vmem:[%s8255_s4 + $0x48] sm:$0xff] %v4583_v40  ;;  %v4597_v1 = vsel %vm4456_vm15, %v4596_v60, %v7558_v57  ;;  %v3542_v16 = vrot.slane %v3541_v42, 1  ;;  %v3518_v38 = vmax.f32 %v3516_v59, %v3517_v15  ;;  %v3300_v2 = vadd.f32 %v7569_v61, %v7524_v33  ;;  %v7609_v52 = vpop.f32.mrb[46].mxu0  ;;  %v7611_v19 = vpop.f32.mrb[47].mxu1 }
 0x1f4   :  { %4634 = vst [vmem:[%s8255_s4 + $0x50] sm:$0xff] %v4597_v1  ;;  %v3654_v35 = vrot.slane %v3653_v34, 1  ;;  %v3658_v20 = vmax.f32 %v3656_v4, %v3657_v29  ;;  %v3328_v11 = vadd.f32 %v7493_v44, %v7572_v45  ;;  %v3294_v57 = vadd.f32 %v7524_v33, %v7574_v28  ;;  %v7620_v46 = vpop.f32.mrb[47].mxu0 }
 0x1f5   :  { %v3543_v12 = vmax.f32 %v3541_v42, %v3542_v16  ;;  %v3519_v61 = vrot.slane %v3518_v38, 2  ;;  %v3329_v9 = vadd.f32 %v7511_v32, %v2756_v5  ;;  %v3303_v30 = vadd.f32 %v4955_v62, %v7534_v22 }
 0x1f6   :  { %v3655_v58 = vmax.f32 %v3653_v34, %v3654_v35  ;;  %v3659_v50 = vrot.slane %v3658_v20, 2  ;;  %v3331_v51 = vadd.f32 %v7504_v8, %v2758_v27  ;;  %v3297_v13 = vadd.f32 %v7534_v22, %v3042_v56 }
 0x1f7   :  { %v4160_v37 = vadd.f32 %v7528_v43, %v3543_v12  ;;  %v3520_v45 = vmax.f32 %v3518_v38, %v3519_v61  ;;  %v3579_v25 = vmax.f32 %v3300_v2, %v3303_v30  ;;  %v3332_v28 = vadd.f32 %v7517_v41, %v2760_v53 }
 0x1f8   :  { %v4176_v49 = vadd.f32 %v7306_v21, %v3655_v58  ;;  %v3660_v36 = vmax.f32 %v3658_v20, %v3659_v50  ;;  %v3670_v0 = vmax.f32 %v3328_v11, %v3331_v51  ;;  %v3558_v10 = vmax.f32 %v3294_v57, %v3297_v13  ;;  %v7629_v5 = vpop.f32.mrb[48].mxu1 }
 0x1f9   :  { %v5286_v62 = vpop.eup %5285  ;;  %5293 = vtanh.f32 %v4160_v37  ;;  %v3521_v14 = vrot.slane %v3520_v45, 1  ;;  %v3580_v24 = vrot.slane %v3579_v25, 4  ;;  %v3677_v27 = vmax.f32 %v3329_v9, %v3332_v28  ;;  %v7631_v18 = vpop.f32.mrb[48].mxu0 }
 0x1fa   :  { %v7633_v56 = vpop.f32.mrb[49].mxu1  ;;  %v7635_v59 = vpop.eup %5287  ;;  %v4472_v63 = vrot.slane %v5286_v62, 7  ;;  %5295 = vtanh.f32 %v4176_v49  ;;  %v3661_v53 = vrot.slane %v3660_v36, 1  ;;  %v3671_v7 = vrot.slane %v3670_v0, 4 }
 0x1fb   :  { %v7637_v26 = vpop.f32.mrb[49].mxu0  ;;  %v7639_v4 = vpop.f32.mrb[50].mxu1  ;;  %v3522_v48 = vmax.f32 %v3520_v45, %v3521_v14  ;;  %v3581_v39 = vmax.f32 %v3579_v25, %v3580_v24  ;;  %v3559_v54 = vrot.slane %v3558_v10, 4  ;;  %v3678_v60 = vrot.slane %v3677_v27, 4 }
 0x1fc   :  { %v5290_v23 = vpop.eup %5289  ;;  %v7641_v42 = vpop.f32.mrb[50].mxu0  ;;  %v3662_v29 = vmax.f32 %v3660_v36, %v3661_v53  ;;  %v3672_v1 = vmax.f32 %v3670_v0, %v3671_v7  ;;  %v3312_v16 = vadd.f32 %v7590_v47, %v7524_v33  ;;  %v3334_v61 = vadd.f32 %v7493_v44, %v7592_v17 }
 0x1fd   :  { %v7643_v15 = vpop.f32.mrb[51].mxu1  ;;  %v7645_v40 = vpop.eup %5291  ;;  %v7648_v34 = vsel %vm4438_vm9, %v4472_v63, %v5290_v23  ;;  %v4157_v2 = vadd.f32 %v7528_v43, %v3522_v48  ;;  %v3582_v35 = vrot.slane %v3581_v39, 2  ;;  %v3560_v20 = vmax.f32 %v3558_v10, %v3559_v54 }
 0x1fe   :  { %v7652_v38 = vpop.f32.mrb[51].mxu0  ;;  %v3679_v11 = vmax.f32 %v3677_v27, %v3678_v60  ;;  %v4177_v57 = vadd.f32 %v7309_v31, %v3662_v29  ;;  %v3673_v12 = vrot.slane %v3672_v1, 2  ;;  %v3306_v9 = vadd.f32 %v7524_v33, %v7594_v6 }
 0x1ff   :  { %5297 = vtanh.f32 %v4157_v2  ;;  %v3583_v30 = vmax.f32 %v3581_v39, %v3582_v35  ;;  %v3561_v58 = vrot.slane %v3560_v20, 2  ;;  %v3335_v51 = vadd.f32 %v7511_v32, %v7598_v55 }
 0x200   :  { %v3680_v47 = vrot.slane %v3679_v11, 2  ;;  %5299 = vtanh.f32 %v4177_v57  ;;  %v3674_v50 = vmax.f32 %v3672_v1, %v3673_v12  ;;  %v3315_v13 = vadd.f32 %v7600_v3, %v7534_v22  ;;  %v7664_v37 = vpop.f32.mrb[52].mxu1 }
 0x201   :  { %v3584_v45 = vrot.slane %v3583_v30, 1  ;;  %v3562_v25 = vmax.f32 %v3560_v20, %v3561_v58  ;;  %v3337_v6 = vadd.f32 %v7504_v8, %v7609_v52  ;;  %v7668_v28 = vpop.f32.mrb[52].mxu0  ;;  %v7670_v49 = vpop.f32.mrb[53].mxu1  ;;  %v3309_v55 = vadd.f32 %v7534_v22, %v7611_v19 }
 0x202   :  { %v3681_v17 = vmax.f32 %v3679_v11, %v3680_v47  ;;  %v3675_v36 = vrot.slane %v3674_v50, 1  ;;  %v3621_v0 = vmax.f32 %v3312_v16, %v3315_v13  ;;  %v3338_v3 = vadd.f32 %v7517_v41, %v7620_v46  ;;  %v7676_v10 = vpop.f32.mrb[53].mxu0  ;;  %v7678_v62 = vpop.f32.mrb[54].mxu1 }
 0x203   :  { %v5294_v14 = vpop.eup %5293  ;;  %v3585_v24 = vmax.f32 %v3583_v30, %v3584_v45  ;;  %v3563_v27 = vrot.slane %v3562_v25, 1  ;;  %v3691_v63 = vmax.f32 %v3334_v61, %v3337_v6  ;;  %v7680_v53 = vpop.f32.mrb[54].mxu0  ;;  %v3600_v54 = vmax.f32 %v3306_v9, %v3309_v55 }
 0x204   :  { %v3682_v52 = vrot.slane %v3681_v17, 1  ;;  %v7682_v7 = vpop.f32.mrb[55].mxu1  ;;  %v5296_v23 = vpop.eup %5295  ;;  %v4476_v48 = vrot.slane %v5294_v14, 5  ;;  %v3676_v39 = vmax.f32 %v3674_v50, %v3675_v36  ;;  %v3622_v19 = vrot.slane %v3621_v0, 4 }
 0x205   :  { %v7684_v60 = vpop.f32.mrb[55].mxu0  ;;  %v4486_v46 = vrot.slane %v5296_v23, 7  ;;  %v4166_v29 = vadd.f32 %v7528_v43, %v3585_v24  ;;  %v3564_v1 = vmax.f32 %v3562_v25, %v3563_v27  ;;  %v3692_v20 = vrot.slane %v3691_v63, 4 }
 0x206   :  { %v3683_v16 = vmax.f32 %v3681_v17, %v3682_v52  ;;  %v4179_v2 = vadd.f32 %v7306_v21, %v3676_v39  ;;  %v3623_v35 = vmax.f32 %v3621_v0, %v3622_v19  ;;  %v3601_v11 = vrot.slane %v3600_v54, 4 }
 0x207   :  { %v7690_v57 = vsel %vm4438_vm9, %v4486_v46, %v7635_v59  ;;  %5301 = vtanh.f32 %v4166_v29  ;;  %v4163_v12 = vadd.f32 %v7528_v43, %v3564_v1  ;;  %v3693_v30 = vmax.f32 %v3691_v63, %v3692_v20 }
 0x208   :  { %v4180_v61 = vadd.f32 %v7309_v31, %v3683_v16  ;;  %5303 = vtanh.f32 %v4179_v2  ;;  %v3624_v9 = vrot.slane %v3623_v35, 2  ;;  %v3602_v58 = vmax.f32 %v3600_v54, %v3601_v11  ;;  %v7694_v47 = vpop.f32.mrb[56].mxu1 }
 0x209   :  { %v5298_v50 = vpop.eup %5297  ;;  %5305 = vtanh.f32 %v4163_v12  ;;  %v3698_v13 = vmax.f32 %v3335_v51, %v3338_v3  ;;  %v3324_v45 = vadd.f32 %v7629_v5, %v7524_v33  ;;  %v3340_v59 = vadd.f32 %v7493_v44, %v7631_v18  ;;  %v7700_v25 = vpop.f32.mrb[56].mxu0 }
 0x20a   :  { %v7702_v17 = vpop.f32.mrb[57].mxu1  ;;  %v5300_v6 = vpop.eup %5299  ;;  %v4474_v36 = vrot.slane %v5298_v50, 6  ;;  %5307 = vtanh.f32 %v4180_v61  ;;  %v3625_v0 = vmax.f32 %v3623_v35, %v3624_v9  ;;  %v3694_v55 = vrot.slane %v3693_v30, 2 }
 0x20b   :  { %v7704_v14 = vpop.f32.mrb[57].mxu0  ;;  %v7706_v24 = vpop.f32.mrb[58].mxu1  ;;  %v4500_v51 = vrot.slane %v5300_v6, 7  ;;  %v3603_v3 = vrot.slane %v3602_v58, 2  ;;  %v3699_v27 = vrot.slane %v3698_v13, 4  ;;  %v3318_v5 = vadd.f32 %v7524_v33, %v7633_v56 }
 0x20c   :  { %v7710_v18 = vpop.f32.mrb[58].mxu0  ;;  %v7712_v52 = vpop.f32.mrb[59].mxu1  ;;  %v4475_v63 = vsel %vm4441_vm10, %v4474_v36, %v7648_v34  ;;  %v3626_v23 = vrot.slane %v3625_v0, 1  ;;  %v3695_v39 = vmax.f32 %v3693_v30, %v3694_v55  ;;  %v3341_v19 = vadd.f32 %v7511_v32, %v7637_v26 }
 0x20d   :  { %v7718_v54 = vpop.f32.mrb[59].mxu0  ;;  %v4501_v46 = vsel %vm4438_vm9, %v4500_v51, %v7645_v40  ;;  %v4477_v29 = vsel %vm4444_vm11, %v4476_v48, %v4475_v63  ;;  %v3604_v56 = vmax.f32 %v3602_v58, %v3603_v3  ;;  %v3700_v1 = vmax.f32 %v3698_v13, %v3699_v27 }
 0x20e   :  { %v3627_v16 = vmax.f32 %v3625_v0, %v3626_v23  ;;  %v3696_v2 = vrot.slane %v3695_v39, 1  ;;  %v3327_v35 = vadd.f32 %v7639_v4, %v7534_v22  ;;  %v3343_v34 = vadd.f32 %v7504_v8, %v7641_v42 }
 0x20f   :  { %v3605_v20 = vrot.slane %v3604_v56, 1  ;;  %v3701_v11 = vrot.slane %v3700_v1, 2  ;;  %v3321_v26 = vadd.f32 %v7534_v22, %v7643_v15  ;;  %v3344_v40 = vadd.f32 %v7517_v41, %v7652_v38 }
 0x210   :  { %v4172_v48 = vadd.f32 %v7528_v43, %v3627_v16  ;;  %v3697_v12 = vmax.f32 %v3695_v39, %v3696_v2  ;;  %v3663_v61 = vmax.f32 %v3324_v45, %v3327_v35  ;;  %v3712_v9 = vmax.f32 %v3340_v59, %v3343_v34 }
 0x211   :  { %v5302_v30 = vpop.eup %5301  ;;  %v3606_v58 = vmax.f32 %v3604_v56, %v3605_v20  ;;  %v3702_v50 = vmax.f32 %v3700_v1, %v3701_v11  ;;  %v3642_v4 = vmax.f32 %v3318_v5, %v3321_v26  ;;  %v3719_v13 = vmax.f32 %v3341_v19, %v3344_v40  ;;  %v7732_v6 = vpop.f32.mrb[60].mxu0 }
 0x212   :  { %v7734_v42 = vpop.f32.mrb[60].mxu1  ;;  %v5304_v36 = vpop.eup %5303  ;;  %v4480_v0 = vrot.slane %v5302_v30, 3  ;;  %5309 = vtanh.f32 %v4172_v48  ;;  %v4182_v15 = vadd.f32 %v7306_v21, %v3697_v12  ;;  %v3664_v38 = vrot.slane %v3663_v61, 4 }
 0x213   :  { %v7737_v55 = vpop.f32.mrb[61].mxu0  ;;  %v7739_v51 = vpop.f32.mrb[61].mxu1  ;;  %v4488_v59 = vrot.slane %v5304_v36, 6  ;;  %v4169_v3 = vadd.f32 %v7528_v43, %v3606_v58  ;;  %v3703_v27 = vrot.slane %v3702_v50, 1  ;;  %v3713_v5 = vrot.slane %v3712_v9, 4 }
 0x214   :  { %v5306_v45 = vpop.eup %5305  ;;  %v7742_v63 = vpop.f32.mrb[62].mxu0  ;;  %5311 = vtanh.f32 %v4182_v15  ;;  %v3665_v56 = vmax.f32 %v3663_v61, %v3664_v38  ;;  %v3643_v1 = vrot.slane %v3642_v4, 4  ;;  %v3720_v58 = vrot.slane %v3719_v13, 4 }
 0x215   :  { %v7744_v23 = vpop.f32.mrb[62].mxu1  ;;  %v5308_v39 = vpop.eup %5307  ;;  %v4478_v19 = vrot.slane %v5306_v45, 4  ;;  %v4489_v35 = vsel %vm4441_vm10, %v4488_v59, %v7690_v57  ;;  %5313 = vtanh.f32 %v4169_v3  ;;  %v3704_v20 = vmax.f32 %v3702_v50, %v3703_v27 }
 0x216   :  { %v7746_v16 = vpop.f32.mrb[63].mxu0  ;;  %v7748_v2 = vpop.f32.mrb[63].mxu1  ;;  %v4502_v34 = vrot.slane %v5308_v39, 6  ;;  %v3666_v26 = vrot.slane %v3665_v56, 2  ;;  %v3714_v40 = vmax.f32 %v3712_v9, %v3713_v5  ;;  %v3644_v48 = vmax.f32 %v3642_v4, %v3643_v1 }
 0x217   :  { %v4479_v11 = vsel %vm4447_vm12, %v4478_v19, %v4477_v29  ;;  %v4183_v30 = vadd.f32 %v7309_v31, %v3704_v20  ;;  %v3336_v57 = vadd.f32 %v7664_v37, %v7524_v33  ;;  %v3721_v50 = vmax.f32 %v3719_v13, %v3720_v58 }
 0x218   :  { %v7754_v12 = vsel %vm4441_vm10, %v4502_v34, %v4501_v46  ;;  %v4481_v61 = vsel %vm4450_vm13, %v4480_v0, %v4479_v11  ;;  %v3667_v36 = vmax.f32 %v3665_v56, %v3666_v26  ;;  %v3715_v15 = vrot.slane %v3714_v40, 2 }
 0x219   :  { %v3645_v38 = vrot.slane %v3644_v48, 2  ;;  %5315 = vtanh.f32 %v4183_v30  ;;  %v3346_v29 = vadd.f32 %v7493_v44, %v7668_v28  ;;  %v3330_v46 = vadd.f32 %v7524_v33, %v7670_v49 }
 0x21a   :  { %v3668_v9 = vrot.slane %v3667_v36, 1  ;;  %v3716_v4 = vmax.f32 %v3714_v40, %v3715_v15  ;;  %v3347_v45 = vadd.f32 %v7511_v32, %v7676_v10  ;;  %v3722_v59 = vrot.slane %v3721_v50, 2 }
 0x21b   :  { %v3646_v0 = vmax.f32 %v3644_v48, %v3645_v38  ;;  %v3339_v3 = vadd.f32 %v7678_v62, %v7534_v22  ;;  %v3349_v37 = vadd.f32 %v7504_v8, %v7680_v53  ;;  %v3333_v13 = vadd.f32 %v7534_v22, %v7682_v7 }
 0x21c   :  { %v5310_v28 = vpop.eup %5309  ;;  %v3669_v27 = vmax.f32 %v3667_v36, %v3668_v9  ;;  %v3717_v5 = vrot.slane %v3716_v4, 1  ;;  %v3350_v39 = vadd.f32 %v7517_v41, %v7684_v60  ;;  %v3723_v56 = vmax.f32 %v3721_v50, %v3722_v59 }
 0x21d   :  { %v3647_v49 = vrot.slane %v3646_v0, 1  ;;  %v4484_v19 = vrot.slane %v5310_v28, 1  ;;  %v3705_v10 = vmax.f32 %v3336_v57, %v3339_v3  ;;  %v3733_v1 = vmax.f32 %v3346_v29, %v3349_v37 }
 0x21e   :  { %v5312_v34 = vpop.eup %5311  ;;  %v4178_v62 = vadd.f32 %v7528_v43, %v3669_v27  ;;  %v3718_v20 = vmax.f32 %v3716_v4, %v3717_v5  ;;  %v3684_v53 = vmax.f32 %v3330_v46, %v3333_v13  ;;  %v3724_v7 = vrot.slane %v3723_v56, 1 }
 0x21f   :  { %v3648_v11 = vmax.f32 %v3646_v0, %v3647_v49  ;;  %v5314_v26 = vpop.eup %5313  ;;  %v4490_v40 = vrot.slane %v5312_v34, 5  ;;  %v3706_v48 = vrot.slane %v3705_v10, 4  ;;  %v3734_v30 = vrot.slane %v3733_v1, 4 }
 0x220   :  { %v4482_v58 = vrot.slane %v5314_v26, 2  ;;  %5317 = vtanh.f32 %v4178_v62  ;;  %v4185_v36 = vadd.f32 %v7306_v21, %v3718_v20  ;;  %v7777_v15 = vpop.f32.mrb[64].mxu0  ;;  %v3725_v57 = vmax.f32 %v3723_v56, %v3724_v7 }
 0x221   :  { %v4175_v60 = vadd.f32 %v7528_v43, %v3648_v11  ;;  %v7780_v38 = vsel %vm4444_vm11, %v4490_v40, %v4489_v35  ;;  %v3707_v50 = vmax.f32 %v3705_v10, %v3706_v48  ;;  %v3735_v29 = vmax.f32 %v3733_v1, %v3734_v30  ;;  %v7782_v46 = vpop.f32.mrb[65].mxu0  ;;  %v7784_v9 = vpop.f32.mrb[64].mxu1 }
 0x222   :  { %v4483_v4 = vsel %vm4453_vm14, %v4482_v58, %v4481_v61  ;;  %5319 = vtanh.f32 %v4185_v36  ;;  %v3685_v0 = vrot.slane %v3684_v53, 4  ;;  %v3740_v59 = vmax.f32 %v3347_v45, %v3350_v39  ;;  %v7787_v3 = vpop.f32.mrb[66].mxu0  ;;  %v7789_v37 = vpop.f32.mrb[65].mxu1 }
 0x223   :  { %v5316_v13 = vpop.eup %5315  ;;  %v4485_v35 = vsel %vm4456_vm15, %v4484_v19, %v4483_v4  ;;  %5321 = vtanh.f32 %v4175_v60  ;;  %v4186_v28 = vadd.f32 %v7309_v31, %v3725_v57  ;;  %v3708_v27 = vrot.slane %v3707_v50, 2  ;;  %v7793_v5 = vpop.f32.mrb[67].mxu0 }
 0x224   :  { %v7795_v49 = vpop.f32.mrb[66].mxu1  ;;  %4626 = vst [vmem:[%s8255_s4 + $0x10] sm:$0xff] %v4485_v35  ;;  %v4504_v61 = vrot.slane %v5316_v13, 5  ;;  %v3736_v45 = vrot.slane %v3735_v29, 2  ;;  %v3686_v39 = vmax.f32 %v3684_v53, %v3685_v0  ;;  %v3741_v56 = vrot.slane %v3740_v59, 4 }
 0x225   :  { %v7800_v10 = vpop.f32.mrb[67].mxu1  ;;  %5323 = vtanh.f32 %v4186_v28  ;;  %v3709_v19 = vmax.f32 %v3707_v50, %v3708_v27  ;;  %v3348_v1 = vadd.f32 %v7694_v47, %v7524_v33  ;;  %v3352_v34 = vadd.f32 %v7493_v44, %v7700_v25 }
 0x226   :  { %v4505_v62 = vsel %vm4444_vm11, %v4504_v61, %v7754_v12  ;;  %v3737_v20 = vmax.f32 %v3735_v29, %v3736_v45  ;;  %v3687_v11 = vrot.slane %v3686_v39, 2  ;;  %v3742_v26 = vmax.f32 %v3740_v59, %v3741_v56 }
 0x227   :  { %v3710_v40 = vrot.slane %v3709_v19, 1  ;;  %v3342_v53 = vadd.f32 %v7524_v33, %v7702_v17  ;;  %v3353_v7 = vadd.f32 %v7511_v32, %v7704_v14  ;;  %v3351_v48 = vadd.f32 %v7706_v24, %v7534_v22 }
 0x228   :  { %v3738_v47 = vrot.slane %v3737_v20, 1  ;;  %v3688_v30 = vmax.f32 %v3686_v39, %v3687_v11  ;;  %v3743_v58 = vrot.slane %v3742_v26, 2  ;;  %v3355_v25 = vadd.f32 %v7504_v8, %v7710_v18  ;;  %v7816_v12 = vpop.f32.mrb[68].mxu0 }
 0x229   :  { %v3711_v36 = vmax.f32 %v3709_v19, %v3710_v40  ;;  %v3747_v60 = vmax.f32 %v3348_v1, %v3351_v48  ;;  %v3345_v57 = vadd.f32 %v7534_v22, %v7712_v52  ;;  %v3356_v17 = vadd.f32 %v7517_v41, %v7718_v54  ;;  %v7822_v14 = vpop.f32.mrb[69].mxu0 }
 0x22a   :  { %v5318_v50 = vpop.eup %5317  ;;  %v3739_v24 = vmax.f32 %v3737_v20, %v3738_v47  ;;  %v3689_v29 = vrot.slane %v3688_v30, 1  ;;  %v3744_v4 = vmax.f32 %v3742_v26, %v3743_v58  ;;  %v3754_v0 = vmax.f32 %v3352_v34, %v3355_v25  ;;  %v7824_v59 = vpop.f32.mrb[70].mxu0 }
 0x22b   :  { %v4514_v18 = vrot.slane %v5318_v50, 7  ;;  %v4184_v13 = vadd.f32 %v7528_v43, %v3711_v36  ;;  %v3748_v35 = vrot.slane %v3747_v60, 4  ;;  %v3726_v28 = vmax.f32 %v3342_v53, %v3345_v57  ;;  %v7827_v27 = vpop.f32.mrb[71].mxu0 }
 0x22c   :  { %v5320_v52 = vpop.eup %5319  ;;  %v4188_v61 = vadd.f32 %v7306_v21, %v3739_v24  ;;  %v3690_v54 = vmax.f32 %v3688_v30, %v3689_v29  ;;  %v3745_v45 = vrot.slane %v3744_v4, 1  ;;  %v3755_v39 = vrot.slane %v3754_v0, 4 }
 0x22d   :  { %v5322_v56 = vpop.eup %5321  ;;  %v4492_v19 = vrot.slane %v5320_v52, 4  ;;  %5325 = vtanh.f32 %v4184_v13  ;;  %v3749_v1 = vmax.f32 %v3747_v60, %v3748_v35  ;;  %v3727_v34 = vrot.slane %v3726_v28, 4 }
 0x22e   :  { %5327 = vtanh.f32 %v4188_v61  ;;  %v4181_v20 = vadd.f32 %v7528_v43, %v3690_v54  ;;  %v7832_v11 = vsel %vm4438_vm9, %v4514_v18, %v5322_v56  ;;  %v3746_v26 = vmax.f32 %v3744_v4, %v3745_v45 }
 0x22f   :  { %v5324_v40 = vpop.eup %5323  ;;  %v7836_v53 = vsel %vm4447_vm12, %v4492_v19, %v7780_v38  ;;  %v3750_v48 = vrot.slane %v3749_v1, 2  ;;  %v3756_v47 = vmax.f32 %v3754_v0, %v3755_v39  ;;  %v3728_v30 = vmax.f32 %v3726_v28, %v3727_v34 }
 0x230   :  { %v4506_v58 = vrot.slane %v5324_v40, 4  ;;  %5329 = vtanh.f32 %v4181_v20  ;;  %v4189_v25 = vadd.f32 %v7309_v31, %v3746_v26  ;;  %v3761_v36 = vmax.f32 %v3353_v7, %v3356_v17  ;;  %v7839_v60 = vpop.f32.mrb[72].mxu0 }
 0x231   :  { %v3751_v57 = vmax.f32 %v3749_v1, %v3750_v48  ;;  %v3757_v50 = vrot.slane %v3756_v47, 2  ;;  %v3729_v24 = vrot.slane %v3728_v30, 2  ;;  %v3358_v29 = vadd.f32 %v7493_v44, %v7732_v6  ;;  %v7843_v4 = vpop.f32.mrb[73].mxu0  ;;  %v7845_v38 = vpop.f32.mrb[68].mxu1 }
 0x232   :  { %v7848_v0 = vsel %vm4447_vm12, %v4506_v58, %v4505_v62  ;;  %5331 = vtanh.f32 %v4189_v25  ;;  %v3762_v18 = vrot.slane %v3761_v36, 4  ;;  %v3360_v7 = vadd.f32 %v7734_v42, %v7524_v33  ;;  %v7852_v17 = vpop.f32.mrb[74].mxu0  ;;  %v7854_v13 = vpop.f32.mrb[69].mxu1 }
 0x233   :  { %v3752_v35 = vrot.slane %v3751_v57, 1  ;;  %v3758_v28 = vmax.f32 %v3756_v47, %v3757_v50  ;;  %v3730_v52 = vmax.f32 %v3728_v30, %v3729_v24  ;;  %v3359_v44 = vadd.f32 %v7511_v32, %v7737_v55  ;;  %v7858_v6 = vpop.f32.mrb[75].mxu0  ;;  %v7860_v61 = vpop.f32.mrb[70].mxu1 }
 0x234   :  { %v3763_v62 = vmax.f32 %v3761_v36, %v3762_v18  ;;  %v3354_v54 = vadd.f32 %v7524_v33, %v7739_v51  ;;  %v3361_v42 = vadd.f32 %v7504_v8, %v7742_v63  ;;  %v3363_v45 = vadd.f32 %v7744_v23, %v7534_v22  ;;  %v7868_v39 = vpop.f32.mrb[71].mxu1 }
 0x235   :  { %v3753_v56 = vmax.f32 %v3751_v57, %v3752_v35  ;;  %v3759_v19 = vrot.slane %v3758_v28, 1  ;;  %v3731_v1 = vrot.slane %v3730_v52, 1  ;;  %v3362_v32 = vadd.f32 %v7517_v41, %v7746_v16 }
 0x236   :  { %v3764_v55 = vrot.slane %v3763_v62, 2  ;;  %v3775_v34 = vmax.f32 %v3358_v29, %v3361_v42  ;;  %v3789_v20 = vmax.f32 %v3360_v7, %v3363_v45  ;;  %v3357_v33 = vadd.f32 %v7534_v22, %v7748_v2 }
 0x237   :  { %v5326_v51 = vpop.eup %5325  ;;  %v4190_v8 = vadd.f32 %v7528_v43, %v3753_v56  ;;  %v3760_v63 = vmax.f32 %v3758_v28, %v3759_v19  ;;  %v3732_v26 = vmax.f32 %v3730_v52, %v3731_v1  ;;  %v3782_v23 = vmax.f32 %v3359_v44, %v3362_v32 }
 0x238   :  { %v5328_v40 = vpop.eup %5327  ;;  %v4518_v48 = vrot.slane %v5326_v51, 5  ;;  %v3765_v47 = vmax.f32 %v3763_v62, %v3764_v55  ;;  %v3776_v30 = vrot.slane %v3775_v34, 4  ;;  %v3790_v58 = vrot.slane %v3789_v20, 4  ;;  %v7875_v25 = vpop.f32.mrb[76].mxu0 }
 0x239   :  { %v4494_v41 = vrot.slane %v5328_v40, 3  ;;  %5333 = vtanh.f32 %v4190_v8  ;;  %v4191_v16 = vadd.f32 %v7306_v21, %v3760_v63  ;;  %v4187_v36 = vadd.f32 %v7528_v43, %v3732_v26  ;;  %v7879_v22 = vpop.f32.mrb[77].mxu0 }
 0x23a   :  { %v5330_v2 = vpop.eup %5329  ;;  %v3766_v57 = vrot.slane %v3765_v47, 1  ;;  %v3777_v50 = vmax.f32 %v3775_v34, %v3776_v30  ;;  %v3791_v24 = vmax.f32 %v3789_v20, %v3790_v58  ;;  %v3783_v29 = vrot.slane %v3782_v23, 4  ;;  %v7881_v18 = vpop.f32.mrb[78].mxu0  ;;  %v7918_v30 = vld [vmem:[%s8253_s3 + $0x10] sm:$0xff]  ;;  %v7925_v58 = vld [vmem:[%s8253_s3 + $0x18] sm:$0xff] }
 0x23b   :  { %v7885_v7 = vsel %vm4450_vm13, %v4494_v41, %v7836_v53  ;;  %v4516_v35 = vrot.slane %v5330_v2, 6  ;;  %5335 = vtanh.f32 %v4191_v16  ;;  %v3768_v28 = vmax.f32 %v3354_v54, %v3357_v33  ;;  %v7887_v52 = vpop.f32.mrb[79].mxu0 }
 0x23c   :  { %v5332_v44 = vpop.eup %5331  ;;  %5337 = vtanh.f32 %v4187_v36  ;;  %v3767_v62 = vmax.f32 %v3765_v47, %v3766_v57  ;;  %v3778_v42 = vrot.slane %v3777_v50, 2  ;;  %v3792_v45 = vrot.slane %v3791_v24, 2 }
 0x23d   :  { %v4517_v56 = vsel %vm4441_vm10, %v4516_v35, %v7832_v11  ;;  %v4508_v19 = vrot.slane %v5332_v44, 3  ;;  %v3784_v1 = vmax.f32 %v3782_v23, %v3783_v29  ;;  %v3769_v32 = vrot.slane %v3768_v28, 4  ;;  %v7902_v11 = vld [vmem:[%s8253_s3] sm:$0xff]  ;;  %v7909_v23 = vld [vmem:[%s8253_s3 + $0x8] sm:$0xff] }
 0x23e   :  { %v7892_v55 = vsel %vm4444_vm11, %v4518_v48, %v4517_v56  ;;  %v4192_v53 = vadd.f32 %v7309_v31, %v3767_v62  ;;  %v3779_v34 = vmax.f32 %v3777_v50, %v3778_v42  ;;  %v3793_v54 = vmax.f32 %v3791_v24, %v3792_v45 }
 0x23f   :  { %v7897_v20 = vsel %vm4450_vm13, %v4508_v19, %v7848_v0  ;;  %v3785_v33 = vrot.slane %v3784_v1, 2  ;;  %v3770_v51 = vmax.f32 %v3768_v28, %v3769_v32  ;;  %v3364_v8 = vadd.f32 %v7902_v11, %v7777_v15 }
 0x240   :  { %5339 = vtanh.f32 %v4192_v53  ;;  %v3780_v63 = vrot.slane %v3779_v34, 1  ;;  %v3794_v26 = vrot.slane %v3793_v54, 1  ;;  %v3365_v0 = vadd.f32 %v7909_v23, %v7782_v46  ;;  %v7913_v40 = vpop.f32.mrb[80].mxu0 }
 0x241   :  { %v3786_v48 = vmax.f32 %v3784_v1, %v3785_v33  ;;  %v3771_v47 = vrot.slane %v3770_v51, 2  ;;  %v3372_v15 = vadd.f32 %v7918_v30, %v7784_v9  ;;  %v3367_v46 = vadd.f32 %v7925_v58, %v7787_v3  ;;  %v7929_v41 = vpop.f32.mrb[81].mxu0  ;;  %v7931_v16 = vpop.f32.mrb[72].mxu1  ;;  %v7938_v9 = vld [vmem:[%s8253_s3 + $0x20] sm:$0xff] }
 0x242   :  { %v3781_v36 = vmax.f32 %v3779_v34, %v3780_v63  ;;  %v3795_v2 = vmax.f32 %v3793_v54, %v3794_v26  ;;  %v3366_v57 = vadd.f32 %v7918_v30, %v7789_v37  ;;  %v3368_v50 = vadd.f32 %v7938_v9, %v7793_v5  ;;  %v7942_v24 = vpop.f32.mrb[82].mxu0  ;;  %v7944_v3 = vpop.f32.mrb[73].mxu1  ;;  %v7949_v37 = vld [vmem:[%s8253_s3 + $0x28] sm:$0xff] }
 0x243   :  { %v5334_v29 = vpop.eup %5333  ;;  %v3787_v35 = vrot.slane %v3786_v48, 1  ;;  %v3772_v28 = vmax.f32 %v3770_v51, %v3771_v47  ;;  %v3796_v44 = vmax.f32 %v3364_v8, %v3367_v46  ;;  %v3375_v62 = vadd.f32 %v7949_v37, %v7795_v49  ;;  %v7953_v42 = vpop.f32.mrb[83].mxu0 }
 0x244   :  { %v7955_v45 = vpop.f32.mrb[74].mxu1  ;;  %v4522_v5 = vrot.slane %v5334_v29, 3  ;;  %v4194_v56 = vadd.f32 %v7306_v21, %v3781_v36  ;;  %v4196_v19 = vadd.f32 %v7528_v43, %v3795_v2  ;;  %v3803_v1 = vmax.f32 %v3365_v0, %v3368_v50 }
 0x245   :  { %v7959_v32 = vpop.f32.mrb[75].mxu1  ;;  %v5336_v53 = vpop.eup %5335  ;;  %v3788_v34 = vmax.f32 %v3786_v48, %v3787_v35  ;;  %v3773_v54 = vrot.slane %v3772_v28, 1  ;;  %v3797_v33 = vrot.slane %v3796_v44, 4  ;;  %v3831_v51 = vmax.f32 %v3372_v15, %v3375_v62 }
 0x246   :  { %v5338_v8 = vpop.eup %5337  ;;  %v4496_v63 = vrot.slane %v5336_v53, 2  ;;  %5341 = vtanh.f32 %v4194_v56  ;;  %v3804_v49 = vrot.slane %v3803_v1, 4  ;;  %v3369_v26 = vadd.f32 %v7949_v37, %v7800_v10 }
 0x247   :  { %v4520_v47 = vrot.slane %v5338_v8, 4  ;;  %5343 = vtanh.f32 %v4196_v19  ;;  %v4195_v46 = vadd.f32 %v7309_v31, %v3788_v34  ;;  %v3774_v36 = vmax.f32 %v3772_v28, %v3773_v54 }
 0x248   :  { %v4497_v0 = vsel %vm4453_vm14, %v4496_v63, %v7885_v7  ;;  %v3798_v2 = vmax.f32 %v3796_v44, %v3797_v33  ;;  %v3805_v48 = vmax.f32 %v3803_v1, %v3804_v49  ;;  %v3832_v50 = vrot.slane %v3831_v51, 4  ;;  %v7966_v29 = vpop.f32.mrb[84].mxu0 }
 0x249   :  { %v4521_v15 = vsel %vm4447_vm12, %v4520_v47, %v7892_v55  ;;  %5345 = vtanh.f32 %v4195_v46  ;;  %v4193_v35 = vadd.f32 %v7528_v43, %v3774_v36  ;;  %v3810_v10 = vmax.f32 %v3366_v57, %v3369_v26  ;;  %v7971_v62 = vpop.f32.mrb[85].mxu0 }
 0x24a   :  { %v5340_v56 = vpop.eup %5339  ;;  %v7974_v28 = vsel %vm4450_vm13, %v4522_v5, %v4521_v15  ;;  %v3799_v19 = vrot.slane %v3798_v2, 2  ;;  %v3806_v7 = vrot.slane %v3805_v48, 2  ;;  %v3833_v44 = vmax.f32 %v3831_v51, %v3832_v50  ;;  %v7976_v1 = vpop.f32.mrb[86].mxu0 }
 0x24b   :  { %v4510_v53 = vrot.slane %v5340_v56, 2  ;;  %5347 = vtanh.f32 %v4193_v35  ;;  %v3811_v34 = vrot.slane %v3810_v10, 4  ;;  %v3370_v55 = vadd.f32 %v7902_v11, %v7816_v12  ;;  %v7980_v54 = vpop.f32.mrb[87].mxu0 }
 0x24c   :  { %v3800_v57 = vmax.f32 %v3798_v2, %v3799_v19  ;;  %v3807_v33 = vmax.f32 %v3805_v48, %v3806_v7  ;;  %v3834_v8 = vrot.slane %v3833_v44, 2  ;;  %v3371_v5 = vadd.f32 %v7909_v23, %v7822_v14 }
 0x24d   :  { %v4511_v63 = vsel %vm4453_vm14, %v4510_v53, %v7897_v20  ;;  %v3812_v51 = vmax.f32 %v3810_v10, %v3811_v34  ;;  %v3373_v49 = vadd.f32 %v7925_v58, %v7824_v59  ;;  %v3374_v26 = vadd.f32 %v7938_v9, %v7827_v27 }
 0x24e   :  { %v3801_v47 = vrot.slane %v3800_v57, 1  ;;  %v3808_v12 = vrot.slane %v3807_v33, 1  ;;  %v3835_v46 = vmax.f32 %v3833_v44, %v3834_v8  ;;  %v3376_v36 = vadd.f32 %v7902_v11, %v7839_v60 }
 0x24f   :  { %v3813_v2 = vrot.slane %v3812_v51, 2  ;;  %v3817_v48 = vmax.f32 %v3370_v55, %v3373_v49  ;;  %v3824_v50 = vmax.f32 %v3371_v5, %v3374_v26  ;;  %v3377_v14 = vadd.f32 %v7909_v23, %v7843_v4 }
 0x250   :  { %v5342_v20 = vpop.eup %5341  ;;  %v3802_v15 = vmax.f32 %v3800_v57, %v3801_v47  ;;  %v3809_v35 = vmax.f32 %v3807_v33, %v3808_v12  ;;  %v3836_v10 = vrot.slane %v3835_v46, 1  ;;  %v3384_v59 = vadd.f32 %v7918_v30, %v7845_v38  ;;  %v7996_v27 = vpop.f32.mrb[88].mxu0 }
 0x251   :  { %v5344_v56 = vpop.eup %5343  ;;  %v4498_v19 = vrot.slane %v5342_v20, 1  ;;  %v3814_v7 = vmax.f32 %v3812_v51, %v3813_v2  ;;  %v3818_v44 = vrot.slane %v3817_v48, 4  ;;  %v3825_v60 = vrot.slane %v3824_v50, 4  ;;  %v7998_v53 = vpop.f32.mrb[89].mxu0 }
 0x252   :  { %v8000_v34 = vpop.f32.mrb[76].mxu1  ;;  %v4526_v55 = vrot.slane %v5344_v56, 1  ;;  %v4197_v4 = vadd.f32 %v7306_v21, %v3802_v15  ;;  %v4198_v57 = vadd.f32 %v7309_v31, %v3809_v35  ;;  %v3837_v33 = vmax.f32 %v3835_v46, %v3836_v10  ;;  %v8004_v8 = vpop.f32.mrb[90].mxu0 }
 0x253   :  { %v8006_v38 = vpop.f32.mrb[77].mxu1  ;;  %v5346_v5 = vpop.eup %5345  ;;  %v4499_v49 = vsel %vm4456_vm15, %v4498_v19, %v4497_v0  ;;  %v3815_v51 = vrot.slane %v3814_v7, 1  ;;  %v3819_v26 = vmax.f32 %v3817_v48, %v3818_v44  ;;  %v3826_v47 = vmax.f32 %v3824_v50, %v3825_v60 }
 0x254   :  { %v8009_v12 = vpop.f32.mrb[91].mxu0  ;;  %v8011_v2 = vpop.f32.mrb[78].mxu1  ;;  %4627 = vst [vmem:[%s8255_s4 + $0x18] sm:$0xff] %v4499_v49  ;;  %v4512_v20 = vrot.slane %v5346_v5, 1  ;;  %5349 = vtanh.f32 %v4197_v4  ;;  %v4202_v46 = vadd.f32 %v7528_v43, %v3837_v33  ;;  %v3379_v15 = vadd.f32 %v7925_v58, %v7852_v17 }
 0x255   :  { %v8019_v35 = vpop.f32.mrb[79].mxu1  ;;  %v5348_v0 = vpop.eup %5347  ;;  %5351 = vtanh.f32 %v4198_v57  ;;  %v3816_v48 = vmax.f32 %v3814_v7, %v3815_v51  ;;  %v3820_v50 = vrot.slane %v3819_v26, 2  ;;  %v3827_v10 = vrot.slane %v3826_v47, 2 }
 0x256   :  { %v4513_v56 = vsel %vm4456_vm15, %v4512_v20, %v4511_v63  ;;  %v4524_v19 = vrot.slane %v5348_v0, 2  ;;  %5353 = vtanh.f32 %v4202_v46  ;;  %v3838_v44 = vmax.f32 %v3376_v36, %v3379_v15 }
 0x257   :  { %4628 = vst [vmem:[%s8255_s4 + $0x20] sm:$0xff] %v4513_v56  ;;  %v4199_v60 = vadd.f32 %v7528_v43, %v3816_v48  ;;  %v3821_v4 = vmax.f32 %v3819_v26, %v3820_v50  ;;  %v3828_v17 = vmax.f32 %v3826_v47, %v3827_v10  ;;  %v3378_v33 = vadd.f32 %v7918_v30, %v7854_v13 }
 0x258   :  { %v4525_v7 = vsel %vm4453_vm14, %v4524_v19, %v7974_v28  ;;  %v3839_v57 = vrot.slane %v3838_v44, 4  ;;  %v3380_v63 = vadd.f32 %v7938_v9, %v7858_v6  ;;  %v3387_v36 = vadd.f32 %v7949_v37, %v7860_v61  ;;  %v8034_v5 = vpop.f32.mrb[92].mxu0 }
 0x259   :  { %v4527_v49 = vsel %vm4456_vm15, %v4526_v55, %v4525_v7  ;;  %5355 = vtanh.f32 %v4199_v60  ;;  %v3822_v51 = vrot.slane %v3821_v4, 1  ;;  %v3829_v26 = vrot.slane %v3828_v17, 1  ;;  %v8037_v47 = vpop.f32.mrb[93].mxu0  ;;  %v8039_v13 = vpop.f32.mrb[80].mxu1 }
 0x25a   :  { %4629 = vst [vmem:[%s8255_s4 + $0x28] sm:$0xff] %v4527_v49  ;;  %v3840_v28 = vmax.f32 %v3838_v44, %v3839_v57  ;;  %v3845_v6 = vmax.f32 %v3377_v14, %v3380_v63  ;;  %v3873_v20 = vmax.f32 %v3384_v59, %v3387_v36  ;;  %v3381_v61 = vadd.f32 %v7949_v37, %v7868_v39  ;;  %v8046_v46 = vpop.f32.mrb[94].mxu0  ;;  %v8048_v55 = vpop.f32.mrb[81].mxu1 }
 0x25b   :  { %v3823_v15 = vmax.f32 %v3821_v4, %v3822_v51  ;;  %v3830_v0 = vmax.f32 %v3828_v17, %v3829_v26  ;;  %v3382_v48 = vadd.f32 %v7902_v11, %v7875_v25  ;;  %v3383_v50 = vadd.f32 %v7909_v23, %v7879_v22  ;;  %v8054_v10 = vpop.f32.mrb[95].mxu0  ;;  %v8056_v56 = vpop.f32.mrb[82].mxu1 }
 0x25c   :  { %8274 = vst [vmem:[#allocation2_spill] sm:$0xff] %v8056_v56  ;;  %v3841_v14 = vrot.slane %v3840_v28, 2  ;;  %v3846_v59 = vrot.slane %v3845_v6, 4  ;;  %v3874_v19 = vrot.slane %v3873_v20, 4  ;;  %v3852_v39 = vmax.f32 %v3378_v33, %v3381_v61  ;;  %v8058_v44 = vpop.f32.mrb[83].mxu1 }
 0x25d   :  { %8275 = vst [vmem:[#allocation3_spill] sm:$0xff] %v8058_v44  ;;  %v4200_v60 = vadd.f32 %v7306_v21, %v3823_v15  ;;  %v4201_v4 = vadd.f32 %v7309_v31, %v3830_v0  ;;  %v3385_v25 = vadd.f32 %v7925_v58, %v7881_v18  ;;  %v3386_v22 = vadd.f32 %v7938_v9, %v7887_v52 }
 0x25e   :  { %v8066_v17 = vpop.eup %5349  ;;  %v3842_v7 = vmax.f32 %v3840_v28, %v3841_v14  ;;  %v3847_v57 = vmax.f32 %v3845_v6, %v3846_v59  ;;  %v3875_v63 = vmax.f32 %v3873_v20, %v3874_v19  ;;  %v3853_v36 = vrot.slane %v3852_v39, 4 }
 0x25f   :  { %v8068_v49 = vpop.eup %5351  ;;  %5357 = vtanh.f32 %v4200_v60  ;;  %v3859_v33 = vmax.f32 %v3382_v48, %v3385_v25  ;;  %v3866_v51 = vmax.f32 %v3383_v50, %v3386_v22  ;;  %v3388_v26 = vadd.f32 %v7902_v11, %v7913_v40 }
 0x260   :  { %v5354_v61 = vpop.eup %5353  ;;  %5359 = vtanh.f32 %v4201_v4  ;;  %v3843_v18 = vrot.slane %v3842_v7, 1  ;;  %v3848_v15 = vrot.slane %v3847_v57, 2  ;;  %v3876_v0 = vrot.slane %v3875_v63, 2 }
 0x261   :  { %v4556_v52 = vrot.slane %v5354_v61, 7  ;;  %v3854_v44 = vmax.f32 %v3852_v39, %v3853_v36  ;;  %v3860_v56 = vrot.slane %v3859_v33, 4  ;;  %v3867_v28 = vrot.slane %v3866_v51, 4  ;;  %v8072_v6 = vpop.f32.mrb[84].mxu1 }
 0x262   :  { %v3844_v20 = vmax.f32 %v3842_v7, %v3843_v18  ;;  %v3849_v14 = vmax.f32 %v3847_v57, %v3848_v15  ;;  %v3877_v59 = vmax.f32 %v3875_v63, %v3876_v0  ;;  %v3389_v48 = vadd.f32 %v7909_v23, %v7929_v41  ;;  %v8076_v50 = vpop.f32.mrb[85].mxu1 }
 0x263   :  { %v5356_v40 = vpop.eup %5355  ;;  %v3855_v19 = vrot.slane %v3854_v44, 2  ;;  %v3861_v60 = vmax.f32 %v3859_v33, %v3860_v56  ;;  %v3868_v4 = vmax.f32 %v3866_v51, %v3867_v28  ;;  %v3396_v25 = vadd.f32 %v7918_v30, %v7931_v16  ;;  %v8080_v39 = vpop.f32.mrb[86].mxu1 }
 0x264   :  { %v4203_v22 = vadd.f32 %v7306_v21, %v3844_v20  ;;  %v3850_v36 = vrot.slane %v3849_v14, 1  ;;  %v3878_v7 = vrot.slane %v3877_v59, 1  ;;  %v8084_v57 = vsel %vm4438_vm9, %v4556_v52, %v5356_v40  ;;  %v8086_v63 = vpop.f32.mrb[87].mxu1 }
 0x265   :  { %v3856_v41 = vmax.f32 %v3854_v44, %v3855_v19  ;;  %v3862_v61 = vrot.slane %v3861_v60, 2  ;;  %v3869_v18 = vrot.slane %v3868_v4, 2  ;;  %v3391_v56 = vadd.f32 %v7925_v58, %v7942_v24 }
 0x266   :  { %5361 = vtanh.f32 %v4203_v22  ;;  %v3851_v33 = vmax.f32 %v3849_v14, %v3850_v36  ;;  %v3879_v16 = vmax.f32 %v3877_v59, %v3878_v7  ;;  %v3390_v51 = vadd.f32 %v7918_v30, %v7944_v3 }
 0x267   :  { %v3857_v15 = vrot.slane %v3856_v41, 1  ;;  %v3863_v0 = vmax.f32 %v3861_v60, %v3862_v61  ;;  %v3870_v28 = vmax.f32 %v3868_v4, %v3869_v18  ;;  %v3880_v20 = vmax.f32 %v3388_v26, %v3391_v56 }
 0x268   :  { %v4204_v52 = vadd.f32 %v7309_v31, %v3851_v33  ;;  %v4208_v40 = vadd.f32 %v7528_v43, %v3879_v16  ;;  %v3392_v44 = vadd.f32 %v7938_v9, %v7953_v42  ;;  %v3399_v24 = vadd.f32 %v7949_v37, %v7955_v45 }
 0x269   :  { %v5358_v19 = vpop.eup %5357  ;;  %v3858_v14 = vmax.f32 %v3856_v41, %v3857_v15  ;;  %v3864_v59 = vrot.slane %v3863_v0, 1  ;;  %v3871_v22 = vrot.slane %v3870_v28, 1  ;;  %v3881_v36 = vrot.slane %v3880_v20, 4  ;;  %v8098_v3 = vpop.f32.mrb[88].mxu1 }
 0x26a   :  { %8276 = vst [vmem:[#allocation4_spill] sm:$0xff] %v8098_v3  ;;  %v5360_v60 = vpop.eup %5359  ;;  %v4528_v4 = vrot.slane %v5358_v19, 7  ;;  %5363 = vtanh.f32 %v4204_v52  ;;  %v3887_v26 = vmax.f32 %v3389_v48, %v3392_v44  ;;  %v3915_v7 = vmax.f32 %v3396_v25, %v3399_v24  ;;  %v8100_v61 = vpop.f32.mrb[89].mxu1 }
 0x26b   :  { %v4542_v18 = vrot.slane %v5360_v60, 7  ;;  %5365 = vtanh.f32 %v4208_v40  ;;  %v4205_v42 = vadd.f32 %v7528_v43, %v3858_v14  ;;  %v3865_v56 = vmax.f32 %v3863_v0, %v3864_v59  ;;  %v8103_v45 = vpop.f32.mrb[90].mxu1 }
 0x26c   :  { %v4529_v41 = vsel %vm4438_vm9, %v4528_v4, %v8066_v17  ;;  %v3872_v33 = vmax.f32 %v3870_v28, %v3871_v22  ;;  %v3882_v16 = vmax.f32 %v3880_v20, %v3881_v36  ;;  %v3888_v15 = vrot.slane %v3887_v26, 4  ;;  %v8107_v3 = vpop.f32.mrb[91].mxu1 }
 0x26d   :  { %v4543_v48 = vsel %vm4438_vm9, %v4542_v18, %v8068_v49  ;;  %5367 = vtanh.f32 %v4205_v42  ;;  %v4206_v25 = vadd.f32 %v7306_v21, %v3865_v56  ;;  %v3916_v52 = vrot.slane %v3915_v7, 4 }
 0x26e   :  { %v4207_v40 = vadd.f32 %v7309_v31, %v3872_v33  ;;  %v3883_v0 = vrot.slane %v3882_v16, 2  ;;  %v3889_v44 = vmax.f32 %v3887_v26, %v3888_v15  ;;  %v3393_v24 = vadd.f32 %v7949_v37, %v7959_v32 }
 0x26f   :  { %5369 = vtanh.f32 %v4206_v25  ;;  %v3917_v17 = vmax.f32 %v3915_v7, %v3916_v52  ;;  %v3394_v28 = vadd.f32 %v7902_v11, %v7966_v29  ;;  %v3395_v20 = vadd.f32 %v7909_v23, %v7971_v62 }
 0x270   :  { %v5362_v49 = vpop.eup %5361  ;;  %5371 = vtanh.f32 %v4207_v40  ;;  %v3884_v19 = vmax.f32 %v3882_v16, %v3883_v0  ;;  %v3890_v14 = vrot.slane %v3889_v44, 2  ;;  %v3894_v59 = vmax.f32 %v3390_v51, %v3393_v24 }
 0x271   :  { %v4530_v22 = vrot.slane %v5362_v49, 6  ;;  %v3918_v36 = vrot.slane %v3917_v17, 2  ;;  %v3397_v60 = vadd.f32 %v7925_v58, %v7976_v1  ;;  %v3398_v32 = vadd.f32 %v7938_v9, %v7980_v54  ;;  %v8123_v4 = vpop.f32.mrb[92].mxu1 }
 0x272   :  { %v3885_v26 = vrot.slane %v3884_v19, 1  ;;  %v3891_v29 = vmax.f32 %v3889_v44, %v3890_v14  ;;  %v3895_v7 = vrot.slane %v3894_v59, 4  ;;  %v3400_v62 = vadd.f32 %v7902_v11, %v7996_v27  ;;  %v8127_v18 = vpop.f32.mrb[93].mxu1 }
 0x273   :  { %v4531_v51 = vsel %vm4441_vm10, %v4530_v22, %v4529_v41  ;;  %v3919_v42 = vmax.f32 %v3917_v17, %v3918_v36  ;;  %v3901_v56 = vmax.f32 %v3394_v28, %v3397_v60  ;;  %v3908_v33 = vmax.f32 %v3395_v20, %v3398_v32  ;;  %v8130_v16 = vpop.f32.mrb[94].mxu1 }
 0x274   :  { %v5364_v1 = vpop.eup %5363  ;;  %v3886_v15 = vmax.f32 %v3884_v19, %v3885_v26  ;;  %v3892_v54 = vrot.slane %v3891_v29, 1  ;;  %v3896_v25 = vmax.f32 %v3894_v59, %v3895_v7  ;;  %v3401_v52 = vadd.f32 %v7909_v23, %v7998_v53  ;;  %v8134_v40 = vpop.f32.mrb[95].mxu1 }
 0x275   :  { %v5366_v0 = vpop.eup %5365  ;;  %v4544_v27 = vrot.slane %v5364_v1, 6  ;;  %v3920_v44 = vrot.slane %v3919_v42, 1  ;;  %v3902_v24 = vrot.slane %v3901_v56, 4  ;;  %v3909_v49 = vrot.slane %v3908_v33, 4 }
 0x276   :  { %v4560_v41 = vrot.slane %v5366_v0, 5  ;;  %v4209_v17 = vadd.f32 %v7306_v21, %v3886_v15  ;;  %v3893_v28 = vmax.f32 %v3891_v29, %v3892_v54  ;;  %v3897_v20 = vrot.slane %v3896_v25, 2 }
 0x277   :  { %v5368_v14 = vpop.eup %5367  ;;  %v4545_v19 = vsel %vm4441_vm10, %v4544_v27, %v4543_v48  ;;  %v3921_v22 = vmax.f32 %v3919_v42, %v3920_v44  ;;  %v3903_v59 = vmax.f32 %v3901_v56, %v3902_v24  ;;  %v3910_v36 = vmax.f32 %v3908_v33, %v3909_v49 }
 0x278   :  { %v4558_v60 = vrot.slane %v5368_v14, 6  ;;  %5373 = vtanh.f32 %v4209_v17  ;;  %v4210_v53 = vadd.f32 %v7309_v31, %v3893_v28  ;;  %v3898_v32 = vmax.f32 %v3896_v25, %v3897_v20 }
 0x279   :  { %v5370_v26 = vpop.eup %5369  ;;  %v4214_v7 = vadd.f32 %v7528_v43, %v3921_v22  ;;  %v3904_v1 = vrot.slane %v3903_v59, 2  ;;  %v3911_v0 = vrot.slane %v3910_v36, 2  ;;  %v3408_v29 = vadd.f32 %v7918_v30, %v8000_v34 }
 0x27a   :  { %v5372_v15 = vpop.eup %5371  ;;  %v4559_v48 = vsel %vm4441_vm10, %v4558_v60, %v8084_v57  ;;  %v4532_v42 = vrot.slane %v5370_v26, 5  ;;  %5375 = vtanh.f32 %v4210_v53  ;;  %v3899_v56 = vrot.slane %v3898_v32, 1 }
 0x27b   :  { %v4546_v33 = vrot.slane %v5372_v15, 5  ;;  %5377 = vtanh.f32 %v4214_v7  ;;  %v8145_v54 = vsel %vm4444_vm11, %v4560_v41, %v4559_v48  ;;  %v3905_v25 = vmax.f32 %v3903_v59, %v3904_v1 }
 0x27c   :  { %v4533_v27 = vsel %vm4444_vm11, %v4532_v42, %v4531_v51  ;;  %v3900_v44 = vmax.f32 %v3898_v32, %v3899_v56  ;;  %v3912_v24 = vmax.f32 %v3910_v36, %v3911_v0  ;;  %v3403_v34 = vadd.f32 %v7925_v58, %v8004_v8 }
 0x27d   :  { %v4547_v49 = vsel %vm4444_vm11, %v4546_v33, %v4545_v19  ;;  %v3906_v17 = vrot.slane %v3905_v25, 1  ;;  %v3402_v57 = vadd.f32 %v7918_v30, %v8006_v38  ;;  %v3404_v28 = vadd.f32 %v7938_v9, %v8009_v12 }
 0x27e   :  { %v4211_v41 = vadd.f32 %v7528_v43, %v3900_v44  ;;  %v3913_v20 = vrot.slane %v3912_v24, 1  ;;  %v3922_v14 = vmax.f32 %v3400_v62, %v3403_v34  ;;  %v3411_v51 = vadd.f32 %v7949_v37, %v8011_v2 }
 0x27f   :  { %v3907_v22 = vmax.f32 %v3905_v25, %v3906_v17  ;;  %v3929_v59 = vmax.f32 %v3401_v52, %v3404_v28  ;;  %v3405_v8 = vadd.f32 %v7949_v37, %v8019_v35  ;;  %v3406_v19 = vadd.f32 %v7902_v11, %v8034_v5 }
 0x280   :  { %5379 = vtanh.f32 %v4211_v41  ;;  %v3914_v38 = vmax.f32 %v3912_v24, %v3913_v20  ;;  %v3923_v36 = vrot.slane %v3922_v14, 4  ;;  %v3957_v60 = vmax.f32 %v3408_v29, %v3411_v51  ;;  %v8277_v51 = vld [vmem:[#allocation2_spill] sm:$0xff] }
 0x281   :  { %v4212_v12 = vadd.f32 %v7306_v21, %v3907_v22  ;;  %v3930_v53 = vrot.slane %v3929_v59, 4  ;;  %v3936_v32 = vmax.f32 %v3402_v57, %v3405_v8  ;;  %v3407_v62 = vadd.f32 %v7909_v23, %v8037_v47 }
 0x282   :  { %v5374_v2 = vpop.eup %5373  ;;  %v4213_v52 = vadd.f32 %v7309_v31, %v3914_v38  ;;  %v3924_v26 = vmax.f32 %v3922_v14, %v3923_v36  ;;  %v3958_v7 = vrot.slane %v3957_v60, 4  ;;  %v3420_v35 = vadd.f32 %v7918_v30, %v8039_v13 }
 0x283   :  { %v4534_v11 = vrot.slane %v5374_v2, 4  ;;  %5381 = vtanh.f32 %v4212_v12  ;;  %v3931_v5 = vmax.f32 %v3929_v59, %v3930_v53  ;;  %v3937_v1 = vrot.slane %v3936_v32, 4  ;;  %v8278_v59 = vld [vmem:[#allocation3_spill] sm:$0xff] }
 0x284   :  { %v5376_v0 = vpop.eup %5375  ;;  %5383 = vtanh.f32 %v4213_v52  ;;  %v3925_v29 = vrot.slane %v3924_v26, 2  ;;  %v3959_v15 = vmax.f32 %v3957_v60, %v3958_v7  ;;  %v3409_v48 = vadd.f32 %v7925_v58, %v8046_v46 }
 0x285   :  { %v5378_v23 = vpop.eup %5377  ;;  %v4535_v47 = vsel %vm4447_vm12, %v4534_v11, %v4533_v27  ;;  %v4548_v42 = vrot.slane %v5376_v0, 4  ;;  %v3932_v56 = vrot.slane %v3931_v5, 2  ;;  %v3938_v33 = vmax.f32 %v3936_v32, %v3937_v1 }
 0x286   :  { %v4564_v25 = vrot.slane %v5378_v23, 3  ;;  %v3926_v44 = vmax.f32 %v3924_v26, %v3925_v29  ;;  %v3960_v13 = vrot.slane %v3959_v15, 2  ;;  %v3943_v24 = vmax.f32 %v3406_v19, %v3409_v48 }
 0x287   :  { %v4549_v34 = vsel %vm4447_vm12, %v4548_v42, %v4547_v49  ;;  %v3933_v17 = vmax.f32 %v3931_v5, %v3932_v56  ;;  %v3939_v57 = vrot.slane %v3938_v33, 2  ;;  %v3414_v28 = vadd.f32 %v7918_v30, %v8048_v55 }
 0x288   :  { %v3927_v41 = vrot.slane %v3926_v44, 1  ;;  %v3961_v20 = vmax.f32 %v3959_v15, %v3960_v13  ;;  %v3944_v58 = vrot.slane %v3943_v24, 4  ;;  %v3410_v46 = vadd.f32 %v7938_v9, %v8054_v10 }
 0x289   :  { %v3934_v27 = vrot.slane %v3933_v17, 1  ;;  %v3940_v14 = vmax.f32 %v3938_v33, %v3939_v57  ;;  %v3423_v22 = vadd.f32 %v7949_v37, %v8277_v51  ;;  %v3417_v8 = vadd.f32 %v7949_v37, %v8278_v59 }
 0x28a   :  { %v5380_v49 = vpop.eup %5379  ;;  %v3928_v19 = vmax.f32 %v3926_v44, %v3927_v41  ;;  %v3962_v38 = vrot.slane %v3961_v20, 1  ;;  %v3945_v36 = vmax.f32 %v3943_v24, %v3944_v58  ;;  %v3950_v60 = vmax.f32 %v3407_v62, %v3410_v46 }
 0x28b   :  { %v4562_v55 = vrot.slane %v5380_v49, 4  ;;  %v3935_v12 = vmax.f32 %v3933_v17, %v3934_v27  ;;  %v3941_v53 = vrot.slane %v3940_v14, 1  ;;  %v3999_v32 = vmax.f32 %v3420_v35, %v3423_v22  ;;  %v8279_v27 = vld [vmem:[#allocation4_spill] sm:$0xff] }
 0x28c   :  { %v4215_v2 = vadd.f32 %v7306_v21, %v3928_v19  ;;  %v3963_v9 = vmax.f32 %v3961_v20, %v3962_v38  ;;  %v3946_v10 = vrot.slane %v3945_v36, 2  ;;  %v3951_v52 = vrot.slane %v3950_v60, 4 }
 0x28d   :  { %v5382_v26 = vpop.eup %5381  ;;  %v4563_v7 = vsel %vm4447_vm12, %v4562_v55, %v8145_v54  ;;  %v4216_v11 = vadd.f32 %v7309_v31, %v3935_v12  ;;  %v3942_v5 = vmax.f32 %v3940_v14, %v3941_v53  ;;  %v4000_v1 = vrot.slane %v3999_v32, 4 }
 0x28e   :  { %v5384_v0 = vpop.eup %5383  ;;  %v4536_v29 = vrot.slane %v5382_v26, 3  ;;  %5385 = vtanh.f32 %v4215_v2  ;;  %v4220_v62 = vadd.f32 %v7528_v43, %v3963_v9  ;;  %v8186_v35 = vsel %vm4450_vm13, %v4564_v25, %v4563_v7 }
 0x28f   :  { %v4550_v15 = vrot.slane %v5384_v0, 3  ;;  %5387 = vtanh.f32 %v4216_v11  ;;  %v4217_v48 = vadd.f32 %v7528_v43, %v3942_v5  ;;  %v3947_v23 = vmax.f32 %v3945_v36, %v3946_v10 }
 0x290   :  { %v4537_v42 = vsel %vm4450_vm13, %v4536_v29, %v4535_v47  ;;  %5389 = vtanh.f32 %v4220_v62  ;;  %v3952_v54 = vmax.f32 %v3950_v60, %v3951_v52  ;;  %v4001_v56 = vmax.f32 %v3999_v32, %v4000_v1 }
 0x291   :  { %v4551_v33 = vsel %vm4450_vm13, %v4550_v15, %v4549_v34  ;;  %5391 = vtanh.f32 %v4217_v48  ;;  %v3948_v44 = vrot.slane %v3947_v23, 1  ;;  %v3978_v13 = vmax.f32 %v3414_v28, %v3417_v8 }
 0x292   :  { %v3953_v24 = vrot.slane %v3952_v54, 2  ;;  %v4002_v17 = vrot.slane %v4001_v56, 2  ;;  %v3432_v25 = vadd.f32 %v7918_v30, %v8072_v6  ;;  %v3426_v57 = vadd.f32 %v7918_v30, %v8076_v50 }
 0x293   :  { %v3949_v41 = vmax.f32 %v3947_v23, %v3948_v44  ;;  %v3979_v20 = vrot.slane %v3978_v13, 4  ;;  %v3435_v47 = vadd.f32 %v7949_v37, %v8080_v39  ;;  %v3429_v58 = vadd.f32 %v7949_v37, %v8086_v63 }
 0x294   :  { %v3954_v34 = vmax.f32 %v3952_v54, %v3953_v24  ;;  %v4003_v46 = vmax.f32 %v4001_v56, %v4002_v17  ;;  %v3444_v28 = vadd.f32 %v7918_v30, %v8279_v27  ;;  %v3438_v14 = vadd.f32 %v7918_v30, %v8100_v61 }
 0x295   :  { %v4218_v6 = vadd.f32 %v7306_v21, %v3949_v41  ;;  %v3980_v51 = vmax.f32 %v3978_v13, %v3979_v20  ;;  %v4041_v50 = vmax.f32 %v3432_v25, %v3435_v47  ;;  %v4020_v22 = vmax.f32 %v3426_v57, %v3429_v58 }
 0x296   :  { %v3955_v59 = vrot.slane %v3954_v34, 1  ;;  %v4004_v8 = vrot.slane %v4003_v46, 1  ;;  %v3447_v39 = vadd.f32 %v7949_v37, %v8103_v45  ;;  %v3441_v63 = vadd.f32 %v7949_v37, %v8107_v3 }
 0x297   :  { %5393 = vtanh.f32 %v4218_v6  ;;  %v3981_v49 = vrot.slane %v3980_v51, 2  ;;  %v4042_v19 = vrot.slane %v4041_v50, 4  ;;  %v4021_v38 = vrot.slane %v4020_v22, 4 }
 0x298   :  { %v5386_v36 = vpop.eup %5385  ;;  %v3956_v60 = vmax.f32 %v3954_v34, %v3955_v59  ;;  %v4005_v61 = vmax.f32 %v4003_v46, %v4004_v8  ;;  %v4083_v55 = vmax.f32 %v3444_v28, %v3447_v39  ;;  %v4062_v21 = vmax.f32 %v3438_v14, %v3441_v63 }
 0x299   :  { %v5388_v12 = vpop.eup %5387  ;;  %v4538_v53 = vrot.slane %v5386_v36, 2  ;;  %v3982_v32 = vmax.f32 %v3980_v51, %v3981_v49  ;;  %v4043_v2 = vmax.f32 %v4041_v50, %v4042_v19  ;;  %v4022_v9 = vmax.f32 %v4020_v22, %v4021_v38 }
 0x29a   :  { %v5390_v10 = vpop.eup %5389  ;;  %v4552_v52 = vrot.slane %v5388_v12, 2  ;;  %v4219_v45 = vadd.f32 %v7309_v31, %v3956_v60  ;;  %v4226_v3 = vadd.f32 %v7528_v43, %v4005_v61  ;;  %v4084_v26 = vrot.slane %v4083_v55, 4 }
 0x29b   :  { %v5392_v7 = vpop.eup %5391  ;;  %v4539_v11 = vsel %vm4453_vm14, %v4538_v53, %v4537_v42  ;;  %v4568_v5 = vrot.slane %v5390_v10, 1  ;;  %v3983_v1 = vrot.slane %v3982_v32, 1  ;;  %v4044_v0 = vrot.slane %v4043_v2, 2 }
 0x29c   :  { %v4553_v29 = vsel %vm4453_vm14, %v4552_v52, %v4551_v33  ;;  %v4566_v62 = vrot.slane %v5392_v7, 2  ;;  %5395 = vtanh.f32 %v4219_v45  ;;  %v4023_v15 = vrot.slane %v4022_v9, 2 }
 0x29d   :  { %5397 = vtanh.f32 %v4226_v3  ;;  %v3984_v48 = vmax.f32 %v3982_v32, %v3983_v1  ;;  %v4045_v23 = vmax.f32 %v4043_v2, %v4044_v0  ;;  %v4085_v54 = vmax.f32 %v4083_v55, %v4084_v26 }
 0x29e   :  { %v4567_v31 = vsel %vm4453_vm14, %v4566_v62, %v8186_v35  ;;  %v4024_v56 = vmax.f32 %v4022_v9, %v4023_v15  ;;  %v4063_v44 = vrot.slane %v4062_v21, 4  ;;  %v3456_v42 = vadd.f32 %v7918_v30, %v8123_v4 }
 0x29f   :  { %v4569_v13 = vsel %vm4456_vm15, %v4568_v5, %v4567_v31  ;;  %v4223_v24 = vadd.f32 %v7528_v43, %v3984_v48  ;;  %v4046_v33 = vrot.slane %v4045_v23, 1  ;;  %v4086_v17 = vrot.slane %v4085_v54, 2 }
 0x2a0   :  { %4632 = vst [vmem:[%s8255_s4 + $0x40] sm:$0xff] %v4569_v13  ;;  %v4025_v25 = vrot.slane %v4024_v56, 1  ;;  %v4064_v57 = vmax.f32 %v4062_v21, %v4063_v44  ;;  %v3450_v35 = vadd.f32 %v7918_v30, %v8127_v18  ;;  %v3459_v41 = vadd.f32 %v7949_v37, %v8130_v16 }
 0x2a1   :  { %v5394_v20 = vpop.eup %5393  ;;  %5399 = vtanh.f32 %v4223_v24  ;;  %v4047_v4 = vmax.f32 %v4045_v23, %v4046_v33  ;;  %v4087_v47 = vmax.f32 %v4085_v54, %v4086_v17  ;;  %v3453_v58 = vadd.f32 %v7949_v37, %v8134_v40 }
 0x2a2   :  { %v4540_v34 = vrot.slane %v5394_v20, 1  ;;  %v4026_v46 = vmax.f32 %v4024_v56, %v4025_v25  ;;  %v4065_v27 = vrot.slane %v4064_v57, 2  ;;  %v4125_v28 = vmax.f32 %v3456_v42, %v3459_v41 }
 0x2a3   :  { %v4232_v14 = vadd.f32 %v7528_v43, %v4047_v4  ;;  %v4088_v6 = vrot.slane %v4087_v47, 1  ;;  %v4104_v51 = vmax.f32 %v3450_v35, %v3453_v58 }
 0x2a4   :  { %v4541_v30 = vsel %vm4456_vm15, %v4540_v34, %v4539_v11  ;;  %v4229_v18 = vadd.f32 %v7528_v43, %v4026_v46  ;;  %v4066_v16 = vmax.f32 %v4064_v57, %v4065_v27  ;;  %v4126_v50 = vrot.slane %v4125_v28, 4 }
 0x2a5   :  { %4630 = vst [vmem:[%s8255_s4 + $0x30] sm:$0xff] %v4541_v30  ;;  %5401 = vtanh.f32 %v4232_v14  ;;  %v4089_v37 = vmax.f32 %v4087_v47, %v4088_v6  ;;  %v4105_v40 = vrot.slane %v4104_v51, 4 }
 0x2a6   :  { %v5396_v22 = vpop.eup %5395  ;;  %5403 = vtanh.f32 %v4229_v18  ;;  %v4067_v59 = vrot.slane %v4066_v16, 1  ;;  %v4127_v8 = vmax.f32 %v4125_v28, %v4126_v50 }
 0x2a7   :  { %v5398_v39 = vpop.eup %5397  ;;  %v4554_v63 = vrot.slane %v5396_v22, 1  ;;  %v4238_v49 = vadd.f32 %v7528_v43, %v4089_v37  ;;  %v4106_v19 = vmax.f32 %v4104_v51, %v4105_v40 }
 0x2a8   :  { %v4598_v38 = vrot.slane %v5398_v39, 7  ;;  %v4068_v36 = vmax.f32 %v4066_v16, %v4067_v59  ;;  %v4128_v60 = vrot.slane %v4127_v8, 2 }
 0x2a9   :  { %v4555_v61 = vsel %vm4456_vm15, %v4554_v63, %v4553_v29  ;;  %v4107_v55 = vrot.slane %v4106_v19, 2  ;;  %5405 = vtanh.f32 %v4238_v49 }
 0x2aa   :  { %4631 = vst [vmem:[%s8255_s4 + $0x38] sm:$0xff] %v4555_v61  ;;  %v4235_v21 = vadd.f32 %v7528_v43, %v4068_v36  ;;  %v4129_v12 = vmax.f32 %v4127_v8, %v4128_v60 }
 0x2ab   :  { %v5400_v53 = vpop.eup %5399  ;;  %v4108_v32 = vmax.f32 %v4106_v19, %v4107_v55 }
 0x2ac   :  { %v4599_v2 = vsel %vm4438_vm9, %v4598_v38, %v5400_v53  ;;  %5407 = vtanh.f32 %v4235_v21  ;;  %v4130_v9 = vrot.slane %v4129_v12, 1 }
 0x2ad   :  { %v4109_v10 = vrot.slane %v4108_v32, 1 }
 0x2ae   :  { %v4131_v52 = vmax.f32 %v4129_v12, %v4130_v9 }
 0x2af   :  { %v5402_v45 = vpop.eup %5401  ;;  %v4110_v3 = vmax.f32 %v4108_v32, %v4109_v10 }
 0x2b0   :  { %v5404_v26 = vpop.eup %5403  ;;  %v4244_v7 = vadd.f32 %v7528_v43, %v4131_v52  ;;  %v4602_v1 = vrot.slane %v5402_v45, 5 }
 0x2b1   :  { %v4600_v11 = vrot.slane %v5404_v26, 6  ;;  %v4241_v5 = vadd.f32 %v7528_v43, %v4110_v3 }
 0x2b2   :  { %5409 = vtanh.f32 %v4244_v7 }
 0x2b3   :  { %v4601_v0 = vsel %vm4441_vm10, %v4600_v11, %v4599_v2  ;;  %5411 = vtanh.f32 %v4241_v5  ;;  %v5406_v62 = vpop.eup %5405 }
 0x2b4   :  { %v4603_v29 = vsel %vm4444_vm11, %v4602_v1, %v4601_v0  ;;  %v4606_v23 = vrot.slane %v5406_v62, 3 }
 0x2b6   :  { %v5408_v15 = vpop.eup %5407 }
 0x2b7   :  { %v4604_v48 = vrot.slane %v5408_v15, 4 }
 0x2b9   :  { %v4605_v54 = vsel %vm4447_vm12, %v4604_v48, %v4603_v29 }
 0x2ba   :  { %v4607_v31 = vsel %vm4450_vm13, %v4606_v23, %v4605_v54 }
 0x2bc   :  { %v5410_v56 = vpop.eup %5409 }
 0x2bd   :  { %v5412_v44 = vpop.eup %5411  ;;  %v4610_v13 = vrot.slane %v5410_v56, 1 }
 0x2be   :  { %v4608_v42 = vrot.slane %v5412_v44, 2 }
 0x2c0   :  { %v4609_v43 = vsel %vm4453_vm14, %v4608_v42, %v4607_v31 }
 0x2c1   :  { %v4611_v24 = vsel %vm4456_vm15, %v4610_v13, %v4609_v43 }
 0x2c2   :  { %4635 = vst [vmem:[%s8255_s4 + $0x58] sm:$0xff] %v4611_v24 }

</bundles_post_ra>
